<compile_context>
chip_gen: v6e
topology: v6e:2x2x1
jax: 0.10.0
libtpu: 0.0.40
codegen_flags: <defaults>
</compile_context>

<pallas_src>
import functools

import numpy as np
import jax
import jax.numpy as jnp
from jax.experimental import pallas as pl
from jax.experimental.pallas import tpu as pltpu

LANE = 128          # TPU lane width: all channel dims zero-padded to this
FC_HIDDEN = 512


# ----------------------------------------------------------------------------
# Geometry helpers / constant gather matrices (param-prep time, numpy)
# ----------------------------------------------------------------------------
def _conv_out_hw(ih, iw, kh, kw, stride, pad):
    return (ih + 2 * pad - kh) // stride + 1, (iw + 2 * pad - kw) // stride + 1


def _build_gather_matrix(ih, iw, kh, kw, stride, pad):
    """0/1 matrix G of shape (kh*kw*oh*ow, ih*iw).

    Row t*oh*ow + (oy*ow+ox) selects input row (y*iw + x) with
    y = oy*stride + i - pad, x = ox*stride + j - pad (t = i*kw + j), and is all
    zero when that position falls in the zero padding.  For activations stored
    as (spatial_rows, channels):  patches_for_tap_t = G[t block] @ h_in.
    """
    oh, ow = _conv_out_hw(ih, iw, kh, kw, stride, pad)
    m_out, m_in = oh * ow, ih * iw
    g = np.zeros((kh * kw * m_out, m_in), np.float32)
    for oy in range(oh):
        for ox in range(ow):
            for i in range(kh):
                for j in range(kw):
                    y = oy * stride + i - pad
                    x = ox * stride + j - pad
                    if 0 <= y < ih and 0 <= x < iw:
                        t = i * kw + j
                        g[t * m_out + oy * ow + ox, y * iw + x] = 1.0
    return g, oh, ow


def _pack_conv_taps(w_oihw):
    """(O, I, kh, kw) -> (kh*kw, 128, 128) bf16, layout [tap, c_in, c_out]."""
    o, i, kh, kw = w_oihw.shape
    w = jnp.transpose(w_oihw, (2, 3, 1, 0)).reshape(kh * kw, i, o)
    w = jnp.pad(w, ((0, 0), (0, LANE - i), (0, LANE - o)))
    return w.astype(jnp.bfloat16)


def _pad_bias(b, width):
    return jnp.pad(b, (0, width - b.shape[0])).reshape(1, width).astype(jnp.float32)


# ----------------------------------------------------------------------------
# Fused Pallas kernel: whole network for one batch element per grid step
# ----------------------------------------------------------------------------
def _fused_net_kernel(patches_ref, w1_ref, b1_ref,
                      g2_ref, w2_ref, b2_ref,
                      g3_ref, w3_ref, b3_ref,
                      wfc1_ref, bfc1_ref, wfc2_ref, bfc2_ref,
                      out_ref, *, m2, m3, t2, t3):
    bf16, f32 = jnp.bfloat16, jnp.float32

    # conv1 + ReLU: one GEMM on precomputed im2col patches; 1/256 folded in w1.
    x = patches_ref[0]                                              # (m1, Cin*64)
    h1 = jnp.dot(x, w1_ref[...], preferred_element_type=f32)
    h1 = jnp.maximum(h1 + b1_ref[...], 0.0).astype(bf16)            # (m1, 128)

    # conv2 + ReLU: gather all taps with one 0/1 matmul, accumulate per tap.
    p2 = jnp.dot(g2_ref[...], h1, preferred_element_type=f32).astype(bf16)
    acc = jnp.zeros((m2, LANE), f32)
    for t in range(t2):
        acc = acc + jnp.dot(p2[t * m2:(t + 1) * m2, :], w2_ref[t],
                            preferred_element_type=f32)
    h2 = jnp.maximum(acc + b2_ref[...], 0.0).astype(bf16)           # (m2, 128)

    # conv3 + ReLU
    p3 = jnp.dot(g3_ref[...], h2, preferred_element_type=f32).astype(bf16)
    acc = jnp.zeros((m3, LANE), f32)
    for t in range(t3):
        acc = acc + jnp.dot(p3[t * m3:(t + 1) * m3, :], w3_ref[t],
                            preferred_element_type=f32)
    h3 = jnp.maximum(acc + b3_ref[...], 0.0).astype(bf16)           # (m3, 128)

    # fc1 + ReLU: PyTorch NCHW flatten order folded into per-position slabs.
    acc = jnp.zeros((1, FC_HIDDEN), f32)
    for p in range(m3):
        acc = acc + jnp.dot(h3[p:p + 1, :], wfc1_ref[p],
                            preferred_element_type=f32)
    hf = jnp.maximum(acc + bfc1_ref[...], 0.0).astype(bf16)         # (1, 512)

    # fc2 (linear head, outputs lane-padded to 128)
    out = jnp.dot(hf, wfc2_ref[...], preferred_element_type=f32) + bfc2_ref[...]
    out_ref[0] = out


# ----------------------------------------------------------------------------
# Param prep + wrapper
# ----------------------------------------------------------------------------
def build_net_forward(params, in_channels, height, width, n_actions):
    """Packs weights / builds constant gather matrices once; returns forward()."""
    kh1 = kw1 = 8
    oh1, ow1 = _conv_out_hw(height, width, kh1, kw1, 4, 0)
    g2_np, oh2, ow2 = _build_gather_matrix(oh1, ow1, 4, 4, 2, 2)
    g3_np, oh3, ow3 = _build_gather_matrix(oh2, ow2, 3, 3, 1, 1)
    m1, m2, m3 = oh1 * ow1, oh2 * ow2, oh3 * ow3
    t2, t3 = 16, 9
    k1 = in_channels * kh1 * kw1

    # conv1 weights: (i, j, c) patch-column order; fold the 1/256 input scale.
    w1p = jnp.transpose(params["w1"], (2, 3, 1, 0)).reshape(k1, 32) / 256.0
    w1p = jnp.pad(w1p, ((0, 0), (0, LANE - 32))).astype(jnp.bfloat16)
    b1p = _pad_bias(params["b1"], LANE)

    g2 = jnp.asarray(g2_np, jnp.bfloat16)            # (t2*m2, m1), exact 0/1
    w2p = _pack_conv_taps(params["w2"])              # (t2, 128, 128)
    b2p = _pad_bias(params["b2"], LANE)

    g3 = jnp.asarray(g3_np, jnp.bfloat16)            # (t3*m3, m2)
    w3p = _pack_conv_taps(params["w3"])              # (t3, 128, 128)
    b3p = _pad_bias(params["b3"], LANE)

    # fc1: PyTorch flattens NCHW (col = c*m3 + p); regroup into per-position
    # (m3, 128, 512) slabs so the kernel never transposes activations.
    assert params["fc1_w"].shape[1] == 64 * m3
    wfc1 = params["fc1_w"].reshape(FC_HIDDEN, 64, m3)
    wfc1 = jnp.transpose(wfc1, (2, 1, 0))                            # (m3, 64, 512)
    wfc1 = jnp.pad(wfc1, ((0, 0), (0, LANE - 64), (0, 0))).astype(jnp.bfloat16)
    bfc1 = _pad_bias(params["fc1_b"], FC_HIDDEN)

    wfc2 = jnp.pad(params["fc2_w"].T, ((0, 0), (0, LANE - n_actions)))
    wfc2 = wfc2.astype(jnp.bfloat16)                                 # (512, 128)
    bfc2 = _pad_bias(params["fc2_b"], LANE)

    consts = (w1p, b1p, g2, w2p, b2p, g3, w3p, b3p, wfc1, bfc1, wfc2, bfc2)
    const_bytes = int(sum(int(np.prod(c.shape)) * c.dtype.itemsize for c in consts))

    per_step_flops = 2 * (m1 * k1 * LANE
                          + t2 * m2 * m1 * LANE + t2 * m2 * LANE * LANE
                          + t3 * m3 * m2 * LANE + t3 * m3 * LANE * LANE
                          + m3 * LANE * FC_HIDDEN + FC_HIDDEN * LANE)

    kernel = functools.partial(_fused_net_kernel, m2=m2, m3=m3, t2=t2, t3=t3)

    def forward(x_nchw):
        n = x_nchw.shape[0]
        x = jnp.transpose(x_nchw.astype(jnp.float32), (0, 2, 3, 1))   # NHWC
        # conv1 im2col on the raw input; column order (i, j, c) matches w1p.
        cols = [x[:, i:i + 4 * (oh1 - 1) + 1:4, j:j + 4 * (ow1 - 1) + 1:4, :]
                for i in range(kh1) for j in range(kw1)]
        patches = jnp.concatenate(cols, axis=-1).reshape(n, m1, k1)
        patches = patches.astype(jnp.bfloat16)

        cost = pl.CostEstimate(
            flops=int(n * per_step_flops), transcendentals=0,
            bytes_accessed=int(const_bytes + patches.size * 2 + n * LANE * 4))

        out = pl.pallas_call(
            kernel,
            out_shape=jax.ShapeDtypeStruct((n, 1, LANE), jnp.float32),
            grid=(n,),
            in_specs=[
                pl.BlockSpec((1, m1, k1), lambda i: (i, 0, 0)),       # patches
                pl.BlockSpec(w1p.shape, lambda i: (0, 0)),
                pl.BlockSpec(b1p.shape, lambda i: (0, 0)),
                pl.BlockSpec(g2.shape, lambda i: (0, 0)),
                pl.BlockSpec(w2p.shape, lambda i: (0, 0, 0)),
                pl.BlockSpec(b2p.shape, lambda i: (0, 0)),
                pl.BlockSpec(g3.shape, lambda i: (0, 0)),
                pl.BlockSpec(w3p.shape, lambda i: (0, 0, 0)),
                pl.BlockSpec(b3p.shape, lambda i: (0, 0)),
                pl.BlockSpec(wfc1.shape, lambda i: (0, 0, 0)),
                pl.BlockSpec(bfc1.shape, lambda i: (0, 0)),
                pl.BlockSpec(wfc2.shape, lambda i: (0, 0)),
                pl.BlockSpec(bfc2.shape, lambda i: (0, 0)),
            ],
            out_specs=pl.BlockSpec((1, 1, LANE), lambda i: (i, 0, 0)),
            compiler_params=pltpu.CompilerParams(
                dimension_semantics=("parallel",)),
            cost_estimate=cost,
        )(patches, *consts)
        return out.reshape(n, LANE)[:, :n_actions]

    return forward


# ----------------------------------------------------------------------------
# Pure-JAX reference (lax.conv, f32) for correctness checking
# ----------------------------------------------------------------------------
def reference_forward(x_nchw, p):
    fx = x_nchw.astype(jnp.float32) / 256.0

    def conv(x, w, b, stride, padding):
        y = jax.lax.conv_general_dilated(
            x, w, (stride, stride),
            [(padding, padding), (padding, padding)],
            dimension_numbers=("NCHW", "OIHW", "NCHW"))
        return jax.nn.relu(y + b[None, :, None, None])

    h = conv(fx, p["w1"], p["b1"], 4, 0)
    h = conv(h, p["w2"], p["b2"], 2, 2)
    h = conv(h, p["w3"], p["b3"], 1, 1)
    h = h.reshape(h.shape[0], -1)
    h = jax.nn.relu(h @ p["fc1_w"].T + p["fc1_b"])
    return h @ p["fc2_w"].T + p["fc2_b"]


def init_params(key, in_channels, conv_out_size, n_actions):
    ks = jax.random.split(key, 10)
    s = 0.05
    return {
        "w1": jax.random.normal(ks[0], (32, in_channels, 8, 8), jnp.float32) * s,
        "b1": jax.random.normal(ks[1], (32,), jnp.float32) * s,
        "w2": jax.random.normal(ks[2], (64, 32, 4, 4), jnp.float32) * s,
        "b2": jax.random.normal(ks[3], (64,), jnp.float32) * s,
        "w3": jax.random.normal(ks[4], (64, 64, 3, 3), jnp.float32) * s,
        "b3": jax.random.normal(ks[5], (64,), jnp.float32) * s,
        "fc1_w": jax.random.normal(ks[6], (512, conv_out_size), jnp.float32) * s,
        "fc1_b": jax.random.normal(ks[7], (512,), jnp.float32) * s,
        "fc2_w": jax.random.normal(ks[8], (n_actions, 512), jnp.float32) * s,
        "fc2_b": jax.random.normal(ks[9], (n_actions,), jnp.float32) * s,
    }


if __name__ == "__main__":
    key = jax.random.PRNGKey(0)
    k_x, k_p = jax.random.split(key)

    batch, in_channels, H, W = 2, 4, 32, 32
    n_actions = 6

    # conv output sizes: 32 -(k8,s4)-> 7 -(k4,p2,s2)-> 4 -(k3,p1,s1)-> 4
    oh1, ow1 = _conv_out_hw(H, W, 8, 8, 4, 0)
    oh2, ow2 = _conv_out_hw(oh1, ow1, 4, 4, 2, 2)
    oh3, ow3 = _conv_out_hw(oh2, ow2, 3, 3, 1, 1)
    conv_out_size = 64 * oh3 * ow3            # = 1024, matches _get_conv_out

    params = init_params(k_p, in_channels, conv_out_size, n_actions)

    # Simulated uint8 image frames, as typical for this DQN net.
    x = jax.random.randint(k_x, (batch, in_channels, H, W), 0, 256).astype(jnp.float32)

    forward = jax.jit(build_net_forward(params, in_channels, H, W, n_actions))
    out = jax.block_until_ready(forward(x))
    assert out.shape == (batch, n_actions), out.shape

    ref = jax.block_until_ready(reference_forward(x, params))
    max_err = float(jnp.max(jnp.abs(out - ref)))
    # bf16 matmul inputs with f32 accumulation -> loosened tolerance.
    assert jnp.allclose(out, ref, rtol=5e-2, atol=5e-2), max_err

    print("KERNEL_OK")
</pallas_src>

<mosaic_0001>
module attributes {stable_mosaic.version = 11 : i64} {
  func.func @_fused_net_kernel(%arg0: i32, %arg1: memref<1x49x256xbf16, #tpu.memory_space<vmem>>, %arg2: memref<256x128xbf16, #tpu.memory_space<vmem>>, %arg3: memref<1x128xf32, #tpu.memory_space<vmem>>, %arg4: memref<256x49xbf16, #tpu.memory_space<vmem>>, %arg5: memref<16x128x128xbf16, #tpu.memory_space<vmem>>, %arg6: memref<1x128xf32, #tpu.memory_space<vmem>>, %arg7: memref<144x16xbf16, #tpu.memory_space<vmem>>, %arg8: memref<9x128x128xbf16, #tpu.memory_space<vmem>>, %arg9: memref<1x128xf32, #tpu.memory_space<vmem>>, %arg10: memref<16x128x512xbf16, #tpu.memory_space<vmem>>, %arg11: memref<1x512xf32, #tpu.memory_space<vmem>>, %arg12: memref<512x128xbf16, #tpu.memory_space<vmem>>, %arg13: memref<1x128xf32, #tpu.memory_space<vmem>>, %arg14: memref<1x1x128xf32, #tpu.memory_space<vmem>>) attributes {dimension_semantics = [#tpu.dimension_semantics<parallel>], iteration_bounds = array<i64: 2>, scalar_prefetch = 0 : i64, scratch_operands = 0 : i64, tpu.core_type = #tpu.core_type<tc>, window_params = [{transform_indices = @transform_0, window_bounds = array<i64: 1, 49, 256>}, {pipeline_mode = #tpu.pipeline_mode<synchronous>, transform_indices = @transform_1, window_bounds = array<i64: 256, 128>}, {pipeline_mode = #tpu.pipeline_mode<synchronous>, transform_indices = @transform_2, window_bounds = array<i64: 1, 128>}, {pipeline_mode = #tpu.pipeline_mode<synchronous>, transform_indices = @transform_3, window_bounds = array<i64: 256, 49>}, {pipeline_mode = #tpu.pipeline_mode<synchronous>, transform_indices = @transform_4, window_bounds = array<i64: 16, 128, 128>}, {pipeline_mode = #tpu.pipeline_mode<synchronous>, transform_indices = @transform_5, window_bounds = array<i64: 1, 128>}, {pipeline_mode = #tpu.pipeline_mode<synchronous>, transform_indices = @transform_6, window_bounds = array<i64: 144, 16>}, {pipeline_mode = #tpu.pipeline_mode<synchronous>, transform_indices = @transform_7, window_bounds = array<i64: 9, 128, 128>}, {pipeline_mode = #tpu.pipeline_mode<synchronous>, transform_indices = @transform_8, window_bounds = array<i64: 1, 128>}, {pipeline_mode = #tpu.pipeline_mode<synchronous>, transform_indices = @transform_9, window_bounds = array<i64: 16, 128, 512>}, {pipeline_mode = #tpu.pipeline_mode<synchronous>, transform_indices = @transform_10, window_bounds = array<i64: 1, 512>}, {pipeline_mode = #tpu.pipeline_mode<synchronous>, transform_indices = @transform_11, window_bounds = array<i64: 512, 128>}, {pipeline_mode = #tpu.pipeline_mode<synchronous>, transform_indices = @transform_12, window_bounds = array<i64: 1, 128>}, {transform_indices = @transform_13, window_bounds = array<i64: 1, 1, 128>}]} {
    %c0 = arith.constant 0 : index
    %c0_0 = arith.constant 0 : index
    %c0_1 = arith.constant 0 : index
    %0 = vector.load %arg1[%c0, %c0_0, %c0_1] : memref<1x49x256xbf16, #tpu.memory_space<vmem>>, vector<1x49x256xbf16>
    %1 = vector.shape_cast %0 : vector<1x49x256xbf16> to vector<49x256xbf16>
    %c0_2 = arith.constant 0 : index
    %c0_3 = arith.constant 0 : index
    %2 = vector.load %arg2[%c0_2, %c0_3] : memref<256x128xbf16, #tpu.memory_space<vmem>>, vector<256x128xbf16>
    %cst = arith.constant dense<0.000000e+00> : vector<49x128xf32>
    %3 = tpu.matmul %1, %2, %cst {dimension_numbers = #tpu.dot_dimension_numbers<[1], [0], [0], [1], [0, 0, 1, 1], [], []>} : vector<49x256xbf16>, vector<256x128xbf16>, vector<49x128xf32> -> vector<49x128xf32>
    %c0_4 = arith.constant 0 : index
    %c0_5 = arith.constant 0 : index
    %4 = vector.load %arg3[%c0_4, %c0_5] : memref<1x128xf32, #tpu.memory_space<vmem>>, vector<1x128xf32>
    %5 = vector.broadcast %4 : vector<1x128xf32> to vector<49x128xf32>
    %6 = arith.addf %3, %5 : vector<49x128xf32>
    %cst_6 = arith.constant 0.000000e+00 : f32
    %7 = vector.broadcast %cst_6 : f32 to vector<49x128xf32>
    %8 = arith.maximumf %6, %7 : vector<49x128xf32>
    %9 = arith.truncf %8 : vector<49x128xf32> to vector<49x128xbf16>
    %c0_7 = arith.constant 0 : index
    %c0_8 = arith.constant 0 : index
    %10 = vector.load %arg4[%c0_7, %c0_8] : memref<256x49xbf16, #tpu.memory_space<vmem>>, vector<256x49xbf16>
    %cst_9 = arith.constant dense<0.000000e+00> : vector<256x128xf32>
    %11 = tpu.matmul %10, %9, %cst_9 {dimension_numbers = #tpu.dot_dimension_numbers<[1], [0], [0], [1], [0, 0, 1, 1], [], []>} : vector<256x49xbf16>, vector<49x128xbf16>, vector<256x128xf32> -> vector<256x128xf32>
    %12 = arith.truncf %11 : vector<256x128xf32> to vector<256x128xbf16>
    %cst_10 = arith.constant 0.000000e+00 : f32
    %13 = vector.broadcast %cst_10 : f32 to vector<16x128xf32>
    %14 = vector.extract_strided_slice %12 {offsets = [0, 0], sizes = [16, 128], strides = [1, 1]} : vector<256x128xbf16> to vector<16x128xbf16>
    %c0_11 = arith.constant 0 : index
    %c0_12 = arith.constant 0 : index
    %c0_13 = arith.constant 0 : index
    %15 = vector.load %arg5[%c0_11, %c0_12, %c0_13] : memref<16x128x128xbf16, #tpu.memory_space<vmem>>, vector<1x128x128xbf16>
    %16 = vector.shape_cast %15 : vector<1x128x128xbf16> to vector<128x128xbf16>
    %cst_14 = arith.constant dense<0.000000e+00> : vector<16x128xf32>
    %17 = tpu.matmul %14, %16, %cst_14 {dimension_numbers = #tpu.dot_dimension_numbers<[1], [0], [0], [1], [0, 0, 1, 1], [], []>} : vector<16x128xbf16>, vector<128x128xbf16>, vector<16x128xf32> -> vector<16x128xf32>
    %18 = arith.addf %13, %17 : vector<16x128xf32>
    %19 = vector.extract_strided_slice %12 {offsets = [16, 0], sizes = [16, 128], strides = [1, 1]} : vector<256x128xbf16> to vector<16x128xbf16>
    %c1 = arith.constant 1 : index
    %c0_15 = arith.constant 0 : index
    %c0_16 = arith.constant 0 : index
    %20 = vector.load %arg5[%c1, %c0_15, %c0_16] : memref<16x128x128xbf16, #tpu.memory_space<vmem>>, vector<1x128x128xbf16>
    %21 = vector.shape_cast %20 : vector<1x128x128xbf16> to vector<128x128xbf16>
    %cst_17 = arith.constant dense<0.000000e+00> : vector<16x128xf32>
    %22 = tpu.matmul %19, %21, %cst_17 {dimension_numbers = #tpu.dot_dimension_numbers<[1], [0], [0], [1], [0, 0, 1, 1], [], []>} : vector<16x128xbf16>, vector<128x128xbf16>, vector<16x128xf32> -> vector<16x128xf32>
    %23 = arith.addf %18, %22 : vector<16x128xf32>
    %24 = vector.extract_strided_slice %12 {offsets = [32, 0], sizes = [16, 128], strides = [1, 1]} : vector<256x128xbf16> to vector<16x128xbf16>
    %c2 = arith.constant 2 : index
    %c0_18 = arith.constant 0 : index
    %c0_19 = arith.constant 0 : index
    %25 = vector.load %arg5[%c2, %c0_18, %c0_19] : memref<16x128x128xbf16, #tpu.memory_space<vmem>>, vector<1x128x128xbf16>
    %26 = vector.shape_cast %25 : vector<1x128x128xbf16> to vector<128x128xbf16>
    %cst_20 = arith.constant dense<0.000000e+00> : vector<16x128xf32>
    %27 = tpu.matmul %24, %26, %cst_20 {dimension_numbers = #tpu.dot_dimension_numbers<[1], [0], [0], [1], [0, 0, 1, 1], [], []>} : vector<16x128xbf16>, vector<128x128xbf16>, vector<16x128xf32> -> vector<16x128xf32>
    %28 = arith.addf %23, %27 : vector<16x128xf32>
    %29 = vector.extract_strided_slice %12 {offsets = [48, 0], sizes = [16, 128], strides = [1, 1]} : vector<256x128xbf16> to vector<16x128xbf16>
    %c3 = arith.constant 3 : index
    %c0_21 = arith.constant 0 : index
    %c0_22 = arith.constant 0 : index
    %30 = vector.load %arg5[%c3, %c0_21, %c0_22] : memref<16x128x128xbf16, #tpu.memory_space<vmem>>, vector<1x128x128xbf16>
    %31 = vector.shape_cast %30 : vector<1x128x128xbf16> to vector<128x128xbf16>
    %cst_23 = arith.constant dense<0.000000e+00> : vector<16x128xf32>
    %32 = tpu.matmul %29, %31, %cst_23 {dimension_numbers = #tpu.dot_dimension_numbers<[1], [0], [0], [1], [0, 0, 1, 1], [], []>} : vector<16x128xbf16>, vector<128x128xbf16>, vector<16x128xf32> -> vector<16x128xf32>
    %33 = arith.addf %28, %32 : vector<16x128xf32>
    %34 = vector.extract_strided_slice %12 {offsets = [64, 0], sizes = [16, 128], strides = [1, 1]} : vector<256x128xbf16> to vector<16x128xbf16>
    %c4 = arith.constant 4 : index
    %c0_24 = arith.constant 0 : index
    %c0_25 = arith.constant 0 : index
    %35 = vector.load %arg5[%c4, %c0_24, %c0_25] : memref<16x128x128xbf16, #tpu.memory_space<vmem>>, vector<1x128x128xbf16>
    %36 = vector.shape_cast %35 : vector<1x128x128xbf16> to vector<128x128xbf16>
    %cst_26 = arith.constant dense<0.000000e+00> : vector<16x128xf32>
    %37 = tpu.matmul %34, %36, %cst_26 {dimension_numbers = #tpu.dot_dimension_numbers<[1], [0], [0], [1], [0, 0, 1, 1], [], []>} : vector<16x128xbf16>, vector<128x128xbf16>, vector<16x128xf32> -> vector<16x128xf32>
    %38 = arith.addf %33, %37 : vector<16x128xf32>
    %39 = vector.extract_strided_slice %12 {offsets = [80, 0], sizes = [16, 128], strides = [1, 1]} : vector<256x128xbf16> to vector<16x128xbf16>
    %c5 = arith.constant 5 : index
    %c0_27 = arith.constant 0 : index
    %c0_28 = arith.constant 0 : index
    %40 = vector.load %arg5[%c5, %c0_27, %c0_28] : memref<16x128x128xbf16, #tpu.memory_space<vmem>>, vector<1x128x128xbf16>
    %41 = vector.shape_cast %40 : vector<1x128x128xbf16> to vector<128x128xbf16>
    %cst_29 = arith.constant dense<0.000000e+00> : vector<16x128xf32>
    %42 = tpu.matmul %39, %41, %cst_29 {dimension_numbers = #tpu.dot_dimension_numbers<[1], [0], [0], [1], [0, 0, 1, 1], [], []>} : vector<16x128xbf16>, vector<128x128xbf16>, vector<16x128xf32> -> vector<16x128xf32>
    %43 = arith.addf %38, %42 : vector<16x128xf32>
    %44 = vector.extract_strided_slice %12 {offsets = [96, 0], sizes = [16, 128], strides = [1, 1]} : vector<256x128xbf16> to vector<16x128xbf16>
    %c6 = arith.constant 6 : index
    %c0_30 = arith.constant 0 : index
    %c0_31 = arith.constant 0 : index
    %45 = vector.load %arg5[%c6, %c0_30, %c0_31] : memref<16x128x128xbf16, #tpu.memory_space<vmem>>, vector<1x128x128xbf16>
    %46 = vector.shape_cast %45 : vector<1x128x128xbf16> to vector<128x128xbf16>
    %cst_32 = arith.constant dense<0.000000e+00> : vector<16x128xf32>
    %47 = tpu.matmul %44, %46, %cst_32 {dimension_numbers = #tpu.dot_dimension_numbers<[1], [0], [0], [1], [0, 0, 1, 1], [], []>} : vector<16x128xbf16>, vector<128x128xbf16>, vector<16x128xf32> -> vector<16x128xf32>
    %48 = arith.addf %43, %47 : vector<16x128xf32>
    %49 = vector.extract_strided_slice %12 {offsets = [112, 0], sizes = [16, 128], strides = [1, 1]} : vector<256x128xbf16> to vector<16x128xbf16>
    %c7 = arith.constant 7 : index
    %c0_33 = arith.constant 0 : index
    %c0_34 = arith.constant 0 : index
    %50 = vector.load %arg5[%c7, %c0_33, %c0_34] : memref<16x128x128xbf16, #tpu.memory_space<vmem>>, vector<1x128x128xbf16>
    %51 = vector.shape_cast %50 : vector<1x128x128xbf16> to vector<128x128xbf16>
    %cst_35 = arith.constant dense<0.000000e+00> : vector<16x128xf32>
    %52 = tpu.matmul %49, %51, %cst_35 {dimension_numbers = #tpu.dot_dimension_numbers<[1], [0], [0], [1], [0, 0, 1, 1], [], []>} : vector<16x128xbf16>, vector<128x128xbf16>, vector<16x128xf32> -> vector<16x128xf32>
    %53 = arith.addf %48, %52 : vector<16x128xf32>
    %54 = vector.extract_strided_slice %12 {offsets = [128, 0], sizes = [16, 128], strides = [1, 1]} : vector<256x128xbf16> to vector<16x128xbf16>
    %c8 = arith.constant 8 : index
    %c0_36 = arith.constant 0 : index
    %c0_37 = arith.constant 0 : index
    %55 = vector.load %arg5[%c8, %c0_36, %c0_37] : memref<16x128x128xbf16, #tpu.memory_space<vmem>>, vector<1x128x128xbf16>
    %56 = vector.shape_cast %55 : vector<1x128x128xbf16> to vector<128x128xbf16>
    %cst_38 = arith.constant dense<0.000000e+00> : vector<16x128xf32>
    %57 = tpu.matmul %54, %56, %cst_38 {dimension_numbers = #tpu.dot_dimension_numbers<[1], [0], [0], [1], [0, 0, 1, 1], [], []>} : vector<16x128xbf16>, vector<128x128xbf16>, vector<16x128xf32> -> vector<16x128xf32>
    %58 = arith.addf %53, %57 : vector<16x128xf32>
    %59 = vector.extract_strided_slice %12 {offsets = [144, 0], sizes = [16, 128], strides = [1, 1]} : vector<256x128xbf16> to vector<16x128xbf16>
    %c9 = arith.constant 9 : index
    %c0_39 = arith.constant 0 : index
    %c0_40 = arith.constant 0 : index
    %60 = vector.load %arg5[%c9, %c0_39, %c0_40] : memref<16x128x128xbf16, #tpu.memory_space<vmem>>, vector<1x128x128xbf16>
    %61 = vector.shape_cast %60 : vector<1x128x128xbf16> to vector<128x128xbf16>
    %cst_41 = arith.constant dense<0.000000e+00> : vector<16x128xf32>
    %62 = tpu.matmul %59, %61, %cst_41 {dimension_numbers = #tpu.dot_dimension_numbers<[1], [0], [0], [1], [0, 0, 1, 1], [], []>} : vector<16x128xbf16>, vector<128x128xbf16>, vector<16x128xf32> -> vector<16x128xf32>
    %63 = arith.addf %58, %62 : vector<16x128xf32>
    %64 = vector.extract_strided_slice %12 {offsets = [160, 0], sizes = [16, 128], strides = [1, 1]} : vector<256x128xbf16> to vector<16x128xbf16>
    %c10 = arith.constant 10 : index
    %c0_42 = arith.constant 0 : index
    %c0_43 = arith.constant 0 : index
    %65 = vector.load %arg5[%c10, %c0_42, %c0_43] : memref<16x128x128xbf16, #tpu.memory_space<vmem>>, vector<1x128x128xbf16>
    %66 = vector.shape_cast %65 : vector<1x128x128xbf16> to vector<128x128xbf16>
    %cst_44 = arith.constant dense<0.000000e+00> : vector<16x128xf32>
    %67 = tpu.matmul %64, %66, %cst_44 {dimension_numbers = #tpu.dot_dimension_numbers<[1], [0], [0], [1], [0, 0, 1, 1], [], []>} : vector<16x128xbf16>, vector<128x128xbf16>, vector<16x128xf32> -> vector<16x128xf32>
    %68 = arith.addf %63, %67 : vector<16x128xf32>
    %69 = vector.extract_strided_slice %12 {offsets = [176, 0], sizes = [16, 128], strides = [1, 1]} : vector<256x128xbf16> to vector<16x128xbf16>
    %c11 = arith.constant 11 : index
    %c0_45 = arith.constant 0 : index
    %c0_46 = arith.constant 0 : index
    %70 = vector.load %arg5[%c11, %c0_45, %c0_46] : memref<16x128x128xbf16, #tpu.memory_space<vmem>>, vector<1x128x128xbf16>
    %71 = vector.shape_cast %70 : vector<1x128x128xbf16> to vector<128x128xbf16>
    %cst_47 = arith.constant dense<0.000000e+00> : vector<16x128xf32>
    %72 = tpu.matmul %69, %71, %cst_47 {dimension_numbers = #tpu.dot_dimension_numbers<[1], [0], [0], [1], [0, 0, 1, 1], [], []>} : vector<16x128xbf16>, vector<128x128xbf16>, vector<16x128xf32> -> vector<16x128xf32>
    %73 = arith.addf %68, %72 : vector<16x128xf32>
    %74 = vector.extract_strided_slice %12 {offsets = [192, 0], sizes = [16, 128], strides = [1, 1]} : vector<256x128xbf16> to vector<16x128xbf16>
    %c12 = arith.constant 12 : index
    %c0_48 = arith.constant 0 : index
    %c0_49 = arith.constant 0 : index
    %75 = vector.load %arg5[%c12, %c0_48, %c0_49] : memref<16x128x128xbf16, #tpu.memory_space<vmem>>, vector<1x128x128xbf16>
    %76 = vector.shape_cast %75 : vector<1x128x128xbf16> to vector<128x128xbf16>
    %cst_50 = arith.constant dense<0.000000e+00> : vector<16x128xf32>
    %77 = tpu.matmul %74, %76, %cst_50 {dimension_numbers = #tpu.dot_dimension_numbers<[1], [0], [0], [1], [0, 0, 1, 1], [], []>} : vector<16x128xbf16>, vector<128x128xbf16>, vector<16x128xf32> -> vector<16x128xf32>
    %78 = arith.addf %73, %77 : vector<16x128xf32>
    %79 = vector.extract_strided_slice %12 {offsets = [208, 0], sizes = [16, 128], strides = [1, 1]} : vector<256x128xbf16> to vector<16x128xbf16>
    %c13 = arith.constant 13 : index
    %c0_51 = arith.constant 0 : index
    %c0_52 = arith.constant 0 : index
    %80 = vector.load %arg5[%c13, %c0_51, %c0_52] : memref<16x128x128xbf16, #tpu.memory_space<vmem>>, vector<1x128x128xbf16>
    %81 = vector.shape_cast %80 : vector<1x128x128xbf16> to vector<128x128xbf16>
    %cst_53 = arith.constant dense<0.000000e+00> : vector<16x128xf32>
    %82 = tpu.matmul %79, %81, %cst_53 {dimension_numbers = #tpu.dot_dimension_numbers<[1], [0], [0], [1], [0, 0, 1, 1], [], []>} : vector<16x128xbf16>, vector<128x128xbf16>, vector<16x128xf32> -> vector<16x128xf32>
    %83 = arith.addf %78, %82 : vector<16x128xf32>
    %84 = vector.extract_strided_slice %12 {offsets = [224, 0], sizes = [16, 128], strides = [1, 1]} : vector<256x128xbf16> to vector<16x128xbf16>
    %c14 = arith.constant 14 : index
    %c0_54 = arith.constant 0 : index
    %c0_55 = arith.constant 0 : index
    %85 = vector.load %arg5[%c14, %c0_54, %c0_55] : memref<16x128x128xbf16, #tpu.memory_space<vmem>>, vector<1x128x128xbf16>
    %86 = vector.shape_cast %85 : vector<1x128x128xbf16> to vector<128x128xbf16>
    %cst_56 = arith.constant dense<0.000000e+00> : vector<16x128xf32>
    %87 = tpu.matmul %84, %86, %cst_56 {dimension_numbers = #tpu.dot_dimension_numbers<[1], [0], [0], [1], [0, 0, 1, 1], [], []>} : vector<16x128xbf16>, vector<128x128xbf16>, vector<16x128xf32> -> vector<16x128xf32>
    %88 = arith.addf %83, %87 : vector<16x128xf32>
    %89 = vector.extract_strided_slice %12 {offsets = [240, 0], sizes = [16, 128], strides = [1, 1]} : vector<256x128xbf16> to vector<16x128xbf16>
    %c15 = arith.constant 15 : index
    %c0_57 = arith.constant 0 : index
    %c0_58 = arith.constant 0 : index
    %90 = vector.load %arg5[%c15, %c0_57, %c0_58] : memref<16x128x128xbf16, #tpu.memory_space<vmem>>, vector<1x128x128xbf16>
    %91 = vector.shape_cast %90 : vector<1x128x128xbf16> to vector<128x128xbf16>
    %cst_59 = arith.constant dense<0.000000e+00> : vector<16x128xf32>
    %92 = tpu.matmul %89, %91, %cst_59 {dimension_numbers = #tpu.dot_dimension_numbers<[1], [0], [0], [1], [0, 0, 1, 1], [], []>} : vector<16x128xbf16>, vector<128x128xbf16>, vector<16x128xf32> -> vector<16x128xf32>
    %93 = arith.addf %88, %92 : vector<16x128xf32>
    %c0_60 = arith.constant 0 : index
    %c0_61 = arith.constant 0 : index
    %94 = vector.load %arg6[%c0_60, %c0_61] : memref<1x128xf32, #tpu.memory_space<vmem>>, vector<1x128xf32>
    %95 = vector.broadcast %94 : vector<1x128xf32> to vector<16x128xf32>
    %96 = arith.addf %93, %95 : vector<16x128xf32>
    %cst_62 = arith.constant 0.000000e+00 : f32
    %97 = vector.broadcast %cst_62 : f32 to vector<16x128xf32>
    %98 = arith.maximumf %96, %97 : vector<16x128xf32>
    %99 = arith.truncf %98 : vector<16x128xf32> to vector<16x128xbf16>
    %c0_63 = arith.constant 0 : index
    %c0_64 = arith.constant 0 : index
    %100 = vector.load %arg7[%c0_63, %c0_64] : memref<144x16xbf16, #tpu.memory_space<vmem>>, vector<144x16xbf16>
    %cst_65 = arith.constant dense<0.000000e+00> : vector<144x128xf32>
    %101 = tpu.matmul %100, %99, %cst_65 {dimension_numbers = #tpu.dot_dimension_numbers<[1], [0], [0], [1], [0, 0, 1, 1], [], []>} : vector<144x16xbf16>, vector<16x128xbf16>, vector<144x128xf32> -> vector<144x128xf32>
    %102 = arith.truncf %101 : vector<144x128xf32> to vector<144x128xbf16>
    %cst_66 = arith.constant 0.000000e+00 : f32
    %103 = vector.broadcast %cst_66 : f32 to vector<16x128xf32>
    %104 = vector.extract_strided_slice %102 {offsets = [0, 0], sizes = [16, 128], strides = [1, 1]} : vector<144x128xbf16> to vector<16x128xbf16>
    %c0_67 = arith.constant 0 : index
    %c0_68 = arith.constant 0 : index
    %c0_69 = arith.constant 0 : index
    %105 = vector.load %arg8[%c0_67, %c0_68, %c0_69] : memref<9x128x128xbf16, #tpu.memory_space<vmem>>, vector<1x128x128xbf16>
    %106 = vector.shape_cast %105 : vector<1x128x128xbf16> to vector<128x128xbf16>
    %cst_70 = arith.constant dense<0.000000e+00> : vector<16x128xf32>
    %107 = tpu.matmul %104, %106, %cst_70 {dimension_numbers = #tpu.dot_dimension_numbers<[1], [0], [0], [1], [0, 0, 1, 1], [], []>} : vector<16x128xbf16>, vector<128x128xbf16>, vector<16x128xf32> -> vector<16x128xf32>
    %108 = arith.addf %103, %107 : vector<16x128xf32>
    %109 = vector.extract_strided_slice %102 {offsets = [16, 0], sizes = [16, 128], strides = [1, 1]} : vector<144x128xbf16> to vector<16x128xbf16>
    %c1_71 = arith.constant 1 : index
    %c0_72 = arith.constant 0 : index
    %c0_73 = arith.constant 0 : index
    %110 = vector.load %arg8[%c1_71, %c0_72, %c0_73] : memref<9x128x128xbf16, #tpu.memory_space<vmem>>, vector<1x128x128xbf16>
    %111 = vector.shape_cast %110 : vector<1x128x128xbf16> to vector<128x128xbf16>
    %cst_74 = arith.constant dense<0.000000e+00> : vector<16x128xf32>
    %112 = tpu.matmul %109, %111, %cst_74 {dimension_numbers = #tpu.dot_dimension_numbers<[1], [0], [0], [1], [0, 0, 1, 1], [], []>} : vector<16x128xbf16>, vector<128x128xbf16>, vector<16x128xf32> -> vector<16x128xf32>
    %113 = arith.addf %108, %112 : vector<16x128xf32>
    %114 = vector.extract_strided_slice %102 {offsets = [32, 0], sizes = [16, 128], strides = [1, 1]} : vector<144x128xbf16> to vector<16x128xbf16>
    %c2_75 = arith.constant 2 : index
    %c0_76 = arith.constant 0 : index
    %c0_77 = arith.constant 0 : index
    %115 = vector.load %arg8[%c2_75, %c0_76, %c0_77] : memref<9x128x128xbf16, #tpu.memory_space<vmem>>, vector<1x128x128xbf16>
    %116 = vector.shape_cast %115 : vector<1x128x128xbf16> to vector<128x128xbf16>
    %cst_78 = arith.constant dense<0.000000e+00> : vector<16x128xf32>
    %117 = tpu.matmul %114, %116, %cst_78 {dimension_numbers = #tpu.dot_dimension_numbers<[1], [0], [0], [1], [0, 0, 1, 1], [], []>} : vector<16x128xbf16>, vector<128x128xbf16>, vector<16x128xf32> -> vector<16x128xf32>
    %118 = arith.addf %113, %117 : vector<16x128xf32>
    %119 = vector.extract_strided_slice %102 {offsets = [48, 0], sizes = [16, 128], strides = [1, 1]} : vector<144x128xbf16> to vector<16x128xbf16>
    %c3_79 = arith.constant 3 : index
    %c0_80 = arith.constant 0 : index
    %c0_81 = arith.constant 0 : index
    %120 = vector.load %arg8[%c3_79, %c0_80, %c0_81] : memref<9x128x128xbf16, #tpu.memory_space<vmem>>, vector<1x128x128xbf16>
    %121 = vector.shape_cast %120 : vector<1x128x128xbf16> to vector<128x128xbf16>
    %cst_82 = arith.constant dense<0.000000e+00> : vector<16x128xf32>
    %122 = tpu.matmul %119, %121, %cst_82 {dimension_numbers = #tpu.dot_dimension_numbers<[1], [0], [0], [1], [0, 0, 1, 1], [], []>} : vector<16x128xbf16>, vector<128x128xbf16>, vector<16x128xf32> -> vector<16x128xf32>
    %123 = arith.addf %118, %122 : vector<16x128xf32>
    %124 = vector.extract_strided_slice %102 {offsets = [64, 0], sizes = [16, 128], strides = [1, 1]} : vector<144x128xbf16> to vector<16x128xbf16>
    %c4_83 = arith.constant 4 : index
    %c0_84 = arith.constant 0 : index
    %c0_85 = arith.constant 0 : index
    %125 = vector.load %arg8[%c4_83, %c0_84, %c0_85] : memref<9x128x128xbf16, #tpu.memory_space<vmem>>, vector<1x128x128xbf16>
    %126 = vector.shape_cast %125 : vector<1x128x128xbf16> to vector<128x128xbf16>
    %cst_86 = arith.constant dense<0.000000e+00> : vector<16x128xf32>
    %127 = tpu.matmul %124, %126, %cst_86 {dimension_numbers = #tpu.dot_dimension_numbers<[1], [0], [0], [1], [0, 0, 1, 1], [], []>} : vector<16x128xbf16>, vector<128x128xbf16>, vector<16x128xf32> -> vector<16x128xf32>
    %128 = arith.addf %123, %127 : vector<16x128xf32>
    %129 = vector.extract_strided_slice %102 {offsets = [80, 0], sizes = [16, 128], strides = [1, 1]} : vector<144x128xbf16> to vector<16x128xbf16>
    %c5_87 = arith.constant 5 : index
    %c0_88 = arith.constant 0 : index
    %c0_89 = arith.constant 0 : index
    %130 = vector.load %arg8[%c5_87, %c0_88, %c0_89] : memref<9x128x128xbf16, #tpu.memory_space<vmem>>, vector<1x128x128xbf16>
    %131 = vector.shape_cast %130 : vector<1x128x128xbf16> to vector<128x128xbf16>
    %cst_90 = arith.constant dense<0.000000e+00> : vector<16x128xf32>
    %132 = tpu.matmul %129, %131, %cst_90 {dimension_numbers = #tpu.dot_dimension_numbers<[1], [0], [0], [1], [0, 0, 1, 1], [], []>} : vector<16x128xbf16>, vector<128x128xbf16>, vector<16x128xf32> -> vector<16x128xf32>
    %133 = arith.addf %128, %132 : vector<16x128xf32>
    %134 = vector.extract_strided_slice %102 {offsets = [96, 0], sizes = [16, 128], strides = [1, 1]} : vector<144x128xbf16> to vector<16x128xbf16>
    %c6_91 = arith.constant 6 : index
    %c0_92 = arith.constant 0 : index
    %c0_93 = arith.constant 0 : index
    %135 = vector.load %arg8[%c6_91, %c0_92, %c0_93] : memref<9x128x128xbf16, #tpu.memory_space<vmem>>, vector<1x128x128xbf16>
    %136 = vector.shape_cast %135 : vector<1x128x128xbf16> to vector<128x128xbf16>
    %cst_94 = arith.constant dense<0.000000e+00> : vector<16x128xf32>
    %137 = tpu.matmul %134, %136, %cst_94 {dimension_numbers = #tpu.dot_dimension_numbers<[1], [0], [0], [1], [0, 0, 1, 1], [], []>} : vector<16x128xbf16>, vector<128x128xbf16>, vector<16x128xf32> -> vector<16x128xf32>
    %138 = arith.addf %133, %137 : vector<16x128xf32>
    %139 = vector.extract_strided_slice %102 {offsets = [112, 0], sizes = [16, 128], strides = [1, 1]} : vector<144x128xbf16> to vector<16x128xbf16>
    %c7_95 = arith.constant 7 : index
    %c0_96 = arith.constant 0 : index
    %c0_97 = arith.constant 0 : index
    %140 = vector.load %arg8[%c7_95, %c0_96, %c0_97] : memref<9x128x128xbf16, #tpu.memory_space<vmem>>, vector<1x128x128xbf16>
    %141 = vector.shape_cast %140 : vector<1x128x128xbf16> to vector<128x128xbf16>
    %cst_98 = arith.constant dense<0.000000e+00> : vector<16x128xf32>
    %142 = tpu.matmul %139, %141, %cst_98 {dimension_numbers = #tpu.dot_dimension_numbers<[1], [0], [0], [1], [0, 0, 1, 1], [], []>} : vector<16x128xbf16>, vector<128x128xbf16>, vector<16x128xf32> -> vector<16x128xf32>
    %143 = arith.addf %138, %142 : vector<16x128xf32>
    %144 = vector.extract_strided_slice %102 {offsets = [128, 0], sizes = [16, 128], strides = [1, 1]} : vector<144x128xbf16> to vector<16x128xbf16>
    %c8_99 = arith.constant 8 : index
    %c0_100 = arith.constant 0 : index
    %c0_101 = arith.constant 0 : index
    %145 = vector.load %arg8[%c8_99, %c0_100, %c0_101] : memref<9x128x128xbf16, #tpu.memory_space<vmem>>, vector<1x128x128xbf16>
    %146 = vector.shape_cast %145 : vector<1x128x128xbf16> to vector<128x128xbf16>
    %cst_102 = arith.constant dense<0.000000e+00> : vector<16x128xf32>
    %147 = tpu.matmul %144, %146, %cst_102 {dimension_numbers = #tpu.dot_dimension_numbers<[1], [0], [0], [1], [0, 0, 1, 1], [], []>} : vector<16x128xbf16>, vector<128x128xbf16>, vector<16x128xf32> -> vector<16x128xf32>
    %148 = arith.addf %143, %147 : vector<16x128xf32>
    %c0_103 = arith.constant 0 : index
    %c0_104 = arith.constant 0 : index
    %149 = vector.load %arg9[%c0_103, %c0_104] : memref<1x128xf32, #tpu.memory_space<vmem>>, vector<1x128xf32>
    %150 = vector.broadcast %149 : vector<1x128xf32> to vector<16x128xf32>
    %151 = arith.addf %148, %150 : vector<16x128xf32>
    %cst_105 = arith.constant 0.000000e+00 : f32
    %152 = vector.broadcast %cst_105 : f32 to vector<16x128xf32>
    %153 = arith.maximumf %151, %152 : vector<16x128xf32>
    %154 = arith.truncf %153 : vector<16x128xf32> to vector<16x128xbf16>
    %cst_106 = arith.constant 0.000000e+00 : f32
    %155 = vector.broadcast %cst_106 : f32 to vector<1x512xf32>
    %156 = vector.extract_strided_slice %154 {offsets = [0, 0], sizes = [1, 128], strides = [1, 1]} : vector<16x128xbf16> to vector<1x128xbf16>
    %c0_107 = arith.constant 0 : index
    %c0_108 = arith.constant 0 : index
    %c0_109 = arith.constant 0 : index
    %157 = vector.load %arg10[%c0_107, %c0_108, %c0_109] : memref<16x128x512xbf16, #tpu.memory_space<vmem>>, vector<1x128x512xbf16>
    %158 = vector.shape_cast %157 : vector<1x128x512xbf16> to vector<128x512xbf16>
    %cst_110 = arith.constant dense<0.000000e+00> : vector<1x512xf32>
    %159 = tpu.matmul %156, %158, %cst_110 {dimension_numbers = #tpu.dot_dimension_numbers<[1], [0], [0], [1], [0, 0, 1, 1], [], []>} : vector<1x128xbf16>, vector<128x512xbf16>, vector<1x512xf32> -> vector<1x512xf32>
    %160 = arith.addf %155, %159 : vector<1x512xf32>
    %161 = vector.extract_strided_slice %154 {offsets = [1, 0], sizes = [1, 128], strides = [1, 1]} : vector<16x128xbf16> to vector<1x128xbf16>
    %c1_111 = arith.constant 1 : index
    %c0_112 = arith.constant 0 : index
    %c0_113 = arith.constant 0 : index
    %162 = vector.load %arg10[%c1_111, %c0_112, %c0_113] : memref<16x128x512xbf16, #tpu.memory_space<vmem>>, vector<1x128x512xbf16>
    %163 = vector.shape_cast %162 : vector<1x128x512xbf16> to vector<128x512xbf16>
    %cst_114 = arith.constant dense<0.000000e+00> : vector<1x512xf32>
    %164 = tpu.matmul %161, %163, %cst_114 {dimension_numbers = #tpu.dot_dimension_numbers<[1], [0], [0], [1], [0, 0, 1, 1], [], []>} : vector<1x128xbf16>, vector<128x512xbf16>, vector<1x512xf32> -> vector<1x512xf32>
    %165 = arith.addf %160, %164 : vector<1x512xf32>
    %166 = vector.extract_strided_slice %154 {offsets = [2, 0], sizes = [1, 128], strides = [1, 1]} : vector<16x128xbf16> to vector<1x128xbf16>
    %c2_115 = arith.constant 2 : index
    %c0_116 = arith.constant 0 : index
    %c0_117 = arith.constant 0 : index
    %167 = vector.load %arg10[%c2_115, %c0_116, %c0_117] : memref<16x128x512xbf16, #tpu.memory_space<vmem>>, vector<1x128x512xbf16>
    %168 = vector.shape_cast %167 : vector<1x128x512xbf16> to vector<128x512xbf16>
    %cst_118 = arith.constant dense<0.000000e+00> : vector<1x512xf32>
    %169 = tpu.matmul %166, %168, %cst_118 {dimension_numbers = #tpu.dot_dimension_numbers<[1], [0], [0], [1], [0, 0, 1, 1], [], []>} : vector<1x128xbf16>, vector<128x512xbf16>, vector<1x512xf32> -> vector<1x512xf32>
    %170 = arith.addf %165, %169 : vector<1x512xf32>
    %171 = vector.extract_strided_slice %154 {offsets = [3, 0], sizes = [1, 128], strides = [1, 1]} : vector<16x128xbf16> to vector<1x128xbf16>
    %c3_119 = arith.constant 3 : index
    %c0_120 = arith.constant 0 : index
    %c0_121 = arith.constant 0 : index
    %172 = vector.load %arg10[%c3_119, %c0_120, %c0_121] : memref<16x128x512xbf16, #tpu.memory_space<vmem>>, vector<1x128x512xbf16>
    %173 = vector.shape_cast %172 : vector<1x128x512xbf16> to vector<128x512xbf16>
    %cst_122 = arith.constant dense<0.000000e+00> : vector<1x512xf32>
    %174 = tpu.matmul %171, %173, %cst_122 {dimension_numbers = #tpu.dot_dimension_numbers<[1], [0], [0], [1], [0, 0, 1, 1], [], []>} : vector<1x128xbf16>, vector<128x512xbf16>, vector<1x512xf32> -> vector<1x512xf32>
    %175 = arith.addf %170, %174 : vector<1x512xf32>
    %176 = vector.extract_strided_slice %154 {offsets = [4, 0], sizes = [1, 128], strides = [1, 1]} : vector<16x128xbf16> to vector<1x128xbf16>
    %c4_123 = arith.constant 4 : index
    %c0_124 = arith.constant 0 : index
    %c0_125 = arith.constant 0 : index
    %177 = vector.load %arg10[%c4_123, %c0_124, %c0_125] : memref<16x128x512xbf16, #tpu.memory_space<vmem>>, vector<1x128x512xbf16>
    %178 = vector.shape_cast %177 : vector<1x128x512xbf16> to vector<128x512xbf16>
    %cst_126 = arith.constant dense<0.000000e+00> : vector<1x512xf32>
    %179 = tpu.matmul %176, %178, %cst_126 {dimension_numbers = #tpu.dot_dimension_numbers<[1], [0], [0], [1], [0, 0, 1, 1], [], []>} : vector<1x128xbf16>, vector<128x512xbf16>, vector<1x512xf32> -> vector<1x512xf32>
    %180 = arith.addf %175, %179 : vector<1x512xf32>
    %181 = vector.extract_strided_slice %154 {offsets = [5, 0], sizes = [1, 128], strides = [1, 1]} : vector<16x128xbf16> to vector<1x128xbf16>
    %c5_127 = arith.constant 5 : index
    %c0_128 = arith.constant 0 : index
    %c0_129 = arith.constant 0 : index
    %182 = vector.load %arg10[%c5_127, %c0_128, %c0_129] : memref<16x128x512xbf16, #tpu.memory_space<vmem>>, vector<1x128x512xbf16>
    %183 = vector.shape_cast %182 : vector<1x128x512xbf16> to vector<128x512xbf16>
    %cst_130 = arith.constant dense<0.000000e+00> : vector<1x512xf32>
    %184 = tpu.matmul %181, %183, %cst_130 {dimension_numbers = #tpu.dot_dimension_numbers<[1], [0], [0], [1], [0, 0, 1, 1], [], []>} : vector<1x128xbf16>, vector<128x512xbf16>, vector<1x512xf32> -> vector<1x512xf32>
    %185 = arith.addf %180, %184 : vector<1x512xf32>
    %186 = vector.extract_strided_slice %154 {offsets = [6, 0], sizes = [1, 128], strides = [1, 1]} : vector<16x128xbf16> to vector<1x128xbf16>
    %c6_131 = arith.constant 6 : index
    %c0_132 = arith.constant 0 : index
    %c0_133 = arith.constant 0 : index
    %187 = vector.load %arg10[%c6_131, %c0_132, %c0_133] : memref<16x128x512xbf16, #tpu.memory_space<vmem>>, vector<1x128x512xbf16>
    %188 = vector.shape_cast %187 : vector<1x128x512xbf16> to vector<128x512xbf16>
    %cst_134 = arith.constant dense<0.000000e+00> : vector<1x512xf32>
    %189 = tpu.matmul %186, %188, %cst_134 {dimension_numbers = #tpu.dot_dimension_numbers<[1], [0], [0], [1], [0, 0, 1, 1], [], []>} : vector<1x128xbf16>, vector<128x512xbf16>, vector<1x512xf32> -> vector<1x512xf32>
    %190 = arith.addf %185, %189 : vector<1x512xf32>
    %191 = vector.extract_strided_slice %154 {offsets = [7, 0], sizes = [1, 128], strides = [1, 1]} : vector<16x128xbf16> to vector<1x128xbf16>
    %c7_135 = arith.constant 7 : index
    %c0_136 = arith.constant 0 : index
    %c0_137 = arith.constant 0 : index
    %192 = vector.load %arg10[%c7_135, %c0_136, %c0_137] : memref<16x128x512xbf16, #tpu.memory_space<vmem>>, vector<1x128x512xbf16>
    %193 = vector.shape_cast %192 : vector<1x128x512xbf16> to vector<128x512xbf16>
    %cst_138 = arith.constant dense<0.000000e+00> : vector<1x512xf32>
    %194 = tpu.matmul %191, %193, %cst_138 {dimension_numbers = #tpu.dot_dimension_numbers<[1], [0], [0], [1], [0, 0, 1, 1], [], []>} : vector<1x128xbf16>, vector<128x512xbf16>, vector<1x512xf32> -> vector<1x512xf32>
    %195 = arith.addf %190, %194 : vector<1x512xf32>
    %196 = vector.extract_strided_slice %154 {offsets = [8, 0], sizes = [1, 128], strides = [1, 1]} : vector<16x128xbf16> to vector<1x128xbf16>
    %c8_139 = arith.constant 8 : index
    %c0_140 = arith.constant 0 : index
    %c0_141 = arith.constant 0 : index
    %197 = vector.load %arg10[%c8_139, %c0_140, %c0_141] : memref<16x128x512xbf16, #tpu.memory_space<vmem>>, vector<1x128x512xbf16>
    %198 = vector.shape_cast %197 : vector<1x128x512xbf16> to vector<128x512xbf16>
    %cst_142 = arith.constant dense<0.000000e+00> : vector<1x512xf32>
    %199 = tpu.matmul %196, %198, %cst_142 {dimension_numbers = #tpu.dot_dimension_numbers<[1], [0], [0], [1], [0, 0, 1, 1], [], []>} : vector<1x128xbf16>, vector<128x512xbf16>, vector<1x512xf32> -> vector<1x512xf32>
    %200 = arith.addf %195, %199 : vector<1x512xf32>
    %201 = vector.extract_strided_slice %154 {offsets = [9, 0], sizes = [1, 128], strides = [1, 1]} : vector<16x128xbf16> to vector<1x128xbf16>
    %c9_143 = arith.constant 9 : index
    %c0_144 = arith.constant 0 : index
    %c0_145 = arith.constant 0 : index
    %202 = vector.load %arg10[%c9_143, %c0_144, %c0_145] : memref<16x128x512xbf16, #tpu.memory_space<vmem>>, vector<1x128x512xbf16>
    %203 = vector.shape_cast %202 : vector<1x128x512xbf16> to vector<128x512xbf16>
    %cst_146 = arith.constant dense<0.000000e+00> : vector<1x512xf32>
    %204 = tpu.matmul %201, %203, %cst_146 {dimension_numbers = #tpu.dot_dimension_numbers<[1], [0], [0], [1], [0, 0, 1, 1], [], []>} : vector<1x128xbf16>, vector<128x512xbf16>, vector<1x512xf32> -> vector<1x512xf32>
    %205 = arith.addf %200, %204 : vector<1x512xf32>
    %206 = vector.extract_strided_slice %154 {offsets = [10, 0], sizes = [1, 128], strides = [1, 1]} : vector<16x128xbf16> to vector<1x128xbf16>
    %c10_147 = arith.constant 10 : index
    %c0_148 = arith.constant 0 : index
    %c0_149 = arith.constant 0 : index
    %207 = vector.load %arg10[%c10_147, %c0_148, %c0_149] : memref<16x128x512xbf16, #tpu.memory_space<vmem>>, vector<1x128x512xbf16>
    %208 = vector.shape_cast %207 : vector<1x128x512xbf16> to vector<128x512xbf16>
    %cst_150 = arith.constant dense<0.000000e+00> : vector<1x512xf32>
    %209 = tpu.matmul %206, %208, %cst_150 {dimension_numbers = #tpu.dot_dimension_numbers<[1], [0], [0], [1], [0, 0, 1, 1], [], []>} : vector<1x128xbf16>, vector<128x512xbf16>, vector<1x512xf32> -> vector<1x512xf32>
    %210 = arith.addf %205, %209 : vector<1x512xf32>
    %211 = vector.extract_strided_slice %154 {offsets = [11, 0], sizes = [1, 128], strides = [1, 1]} : vector<16x128xbf16> to vector<1x128xbf16>
    %c11_151 = arith.constant 11 : index
    %c0_152 = arith.constant 0 : index
    %c0_153 = arith.constant 0 : index
    %212 = vector.load %arg10[%c11_151, %c0_152, %c0_153] : memref<16x128x512xbf16, #tpu.memory_space<vmem>>, vector<1x128x512xbf16>
    %213 = vector.shape_cast %212 : vector<1x128x512xbf16> to vector<128x512xbf16>
    %cst_154 = arith.constant dense<0.000000e+00> : vector<1x512xf32>
    %214 = tpu.matmul %211, %213, %cst_154 {dimension_numbers = #tpu.dot_dimension_numbers<[1], [0], [0], [1], [0, 0, 1, 1], [], []>} : vector<1x128xbf16>, vector<128x512xbf16>, vector<1x512xf32> -> vector<1x512xf32>
    %215 = arith.addf %210, %214 : vector<1x512xf32>
    %216 = vector.extract_strided_slice %154 {offsets = [12, 0], sizes = [1, 128], strides = [1, 1]} : vector<16x128xbf16> to vector<1x128xbf16>
    %c12_155 = arith.constant 12 : index
    %c0_156 = arith.constant 0 : index
    %c0_157 = arith.constant 0 : index
    %217 = vector.load %arg10[%c12_155, %c0_156, %c0_157] : memref<16x128x512xbf16, #tpu.memory_space<vmem>>, vector<1x128x512xbf16>
    %218 = vector.shape_cast %217 : vector<1x128x512xbf16> to vector<128x512xbf16>
    %cst_158 = arith.constant dense<0.000000e+00> : vector<1x512xf32>
    %219 = tpu.matmul %216, %218, %cst_158 {dimension_numbers = #tpu.dot_dimension_numbers<[1], [0], [0], [1], [0, 0, 1, 1], [], []>} : vector<1x128xbf16>, vector<128x512xbf16>, vector<1x512xf32> -> vector<1x512xf32>
    %220 = arith.addf %215, %219 : vector<1x512xf32>
    %221 = vector.extract_strided_slice %154 {offsets = [13, 0], sizes = [1, 128], strides = [1, 1]} : vector<16x128xbf16> to vector<1x128xbf16>
    %c13_159 = arith.constant 13 : index
    %c0_160 = arith.constant 0 : index
    %c0_161 = arith.constant 0 : index
    %222 = vector.load %arg10[%c13_159, %c0_160, %c0_161] : memref<16x128x512xbf16, #tpu.memory_space<vmem>>, vector<1x128x512xbf16>
    %223 = vector.shape_cast %222 : vector<1x128x512xbf16> to vector<128x512xbf16>
    %cst_162 = arith.constant dense<0.000000e+00> : vector<1x512xf32>
    %224 = tpu.matmul %221, %223, %cst_162 {dimension_numbers = #tpu.dot_dimension_numbers<[1], [0], [0], [1], [0, 0, 1, 1], [], []>} : vector<1x128xbf16>, vector<128x512xbf16>, vector<1x512xf32> -> vector<1x512xf32>
    %225 = arith.addf %220, %224 : vector<1x512xf32>
    %226 = vector.extract_strided_slice %154 {offsets = [14, 0], sizes = [1, 128], strides = [1, 1]} : vector<16x128xbf16> to vector<1x128xbf16>
    %c14_163 = arith.constant 14 : index
    %c0_164 = arith.constant 0 : index
    %c0_165 = arith.constant 0 : index
    %227 = vector.load %arg10[%c14_163, %c0_164, %c0_165] : memref<16x128x512xbf16, #tpu.memory_space<vmem>>, vector<1x128x512xbf16>
    %228 = vector.shape_cast %227 : vector<1x128x512xbf16> to vector<128x512xbf16>
    %cst_166 = arith.constant dense<0.000000e+00> : vector<1x512xf32>
    %229 = tpu.matmul %226, %228, %cst_166 {dimension_numbers = #tpu.dot_dimension_numbers<[1], [0], [0], [1], [0, 0, 1, 1], [], []>} : vector<1x128xbf16>, vector<128x512xbf16>, vector<1x512xf32> -> vector<1x512xf32>
    %230 = arith.addf %225, %229 : vector<1x512xf32>
    %231 = vector.extract_strided_slice %154 {offsets = [15, 0], sizes = [1, 128], strides = [1, 1]} : vector<16x128xbf16> to vector<1x128xbf16>
    %c15_167 = arith.constant 15 : index
    %c0_168 = arith.constant 0 : index
    %c0_169 = arith.constant 0 : index
    %232 = vector.load %arg10[%c15_167, %c0_168, %c0_169] : memref<16x128x512xbf16, #tpu.memory_space<vmem>>, vector<1x128x512xbf16>
    %233 = vector.shape_cast %232 : vector<1x128x512xbf16> to vector<128x512xbf16>
    %cst_170 = arith.constant dense<0.000000e+00> : vector<1x512xf32>
    %234 = tpu.matmul %231, %233, %cst_170 {dimension_numbers = #tpu.dot_dimension_numbers<[1], [0], [0], [1], [0, 0, 1, 1], [], []>} : vector<1x128xbf16>, vector<128x512xbf16>, vector<1x512xf32> -> vector<1x512xf32>
    %235 = arith.addf %230, %234 : vector<1x512xf32>
    %c0_171 = arith.constant 0 : index
    %c0_172 = arith.constant 0 : index
    %236 = vector.load %arg11[%c0_171, %c0_172] : memref<1x512xf32, #tpu.memory_space<vmem>>, vector<1x512xf32>
    %237 = arith.addf %235, %236 : vector<1x512xf32>
    %cst_173 = arith.constant 0.000000e+00 : f32
    %238 = vector.broadcast %cst_173 : f32 to vector<1x512xf32>
    %239 = arith.maximumf %237, %238 : vector<1x512xf32>
    %240 = arith.truncf %239 : vector<1x512xf32> to vector<1x512xbf16>
    %c0_174 = arith.constant 0 : index
    %c0_175 = arith.constant 0 : index
    %241 = vector.load %arg12[%c0_174, %c0_175] : memref<512x128xbf16, #tpu.memory_space<vmem>>, vector<512x128xbf16>
    %cst_176 = arith.constant dense<0.000000e+00> : vector<1x128xf32>
    %242 = tpu.matmul %240, %241, %cst_176 {dimension_numbers = #tpu.dot_dimension_numbers<[1], [0], [0], [1], [0, 0, 1, 1], [], []>} : vector<1x512xbf16>, vector<512x128xbf16>, vector<1x128xf32> -> vector<1x128xf32>
    %c0_177 = arith.constant 0 : index
    %c0_178 = arith.constant 0 : index
    %243 = vector.load %arg13[%c0_177, %c0_178] : memref<1x128xf32, #tpu.memory_space<vmem>>, vector<1x128xf32>
    %244 = arith.addf %242, %243 : vector<1x128xf32>
    %c0_179 = arith.constant 0 : index
    %c0_180 = arith.constant 0 : index
    %c0_181 = arith.constant 0 : index
    %245 = vector.load %arg14[%c0_179, %c0_180, %c0_181] : memref<1x1x128xf32, #tpu.memory_space<vmem>>, vector<1x1x128xf32>
    %246 = vector.shape_cast %245 : vector<1x1x128xf32> to vector<1x128xf32>
    %247 = vector.shape_cast %244 : vector<1x128xf32> to vector<1x1x128xf32>
    tpu.vector_store %arg14[%c0_179, %c0_180, %c0_181], %247 {strides = array<i32>} : memref<1x1x128xf32, #tpu.memory_space<vmem>>, vector<1x1x128xf32>,
    return
  }
  func.func @transform_0(%arg0: i32) -> (i32, i32, i32) {
    %c0_i32 = arith.constant 0 : i32
    %c0_i32_0 = arith.constant 0 : i32
    %c0_i32_1 = arith.constant 0 : i32
    return %arg0, %c0_i32, %c0_i32_0 : i32, i32, i32
  }
  func.func @transform_1(%arg0: i32) -> (i32, i32) {
    %c0_i32 = arith.constant 0 : i32
    %c0_i32_0 = arith.constant 0 : i32
    %c0_i32_1 = arith.constant 0 : i32
    return %c0_i32, %c0_i32_0 : i32, i32
  }
  func.func @transform_2(%arg0: i32) -> (i32, i32) {
    %c0_i32 = arith.constant 0 : i32
    %c0_i32_0 = arith.constant 0 : i32
    %c0_i32_1 = arith.constant 0 : i32
    return %c0_i32, %c0_i32_0 : i32, i32
  }
  func.func @transform_3(%arg0: i32) -> (i32, i32) {
    %c0_i32 = arith.constant 0 : i32
    %c0_i32_0 = arith.constant 0 : i32
    %c0_i32_1 = arith.constant 0 : i32
    return %c0_i32, %c0_i32_0 : i32, i32
  }
  func.func @transform_4(%arg0: i32) -> (i32, i32, i32) {
    %c0_i32 = arith.constant 0 : i32
    %c0_i32_0 = arith.constant 0 : i32
    %c0_i32_1 = arith.constant 0 : i32
    %c0_i32_2 = arith.constant 0 : i32
    return %c0_i32, %c0_i32_0, %c0_i32_1 : i32, i32, i32
  }
  func.func @transform_5(%arg0: i32) -> (i32, i32) {
    %c0_i32 = arith.constant 0 : i32
    %c0_i32_0 = arith.constant 0 : i32
    %c0_i32_1 = arith.constant 0 : i32
    return %c0_i32, %c0_i32_0 : i32, i32
  }
  func.func @transform_6(%arg0: i32) -> (i32, i32) {
    %c0_i32 = arith.constant 0 : i32
    %c0_i32_0 = arith.constant 0 : i32
    %c0_i32_1 = arith.constant 0 : i32
    return %c0_i32, %c0_i32_0 : i32, i32
  }
  func.func @transform_7(%arg0: i32) -> (i32, i32, i32) {
    %c0_i32 = arith.constant 0 : i32
    %c0_i32_0 = arith.constant 0 : i32
    %c0_i32_1 = arith.constant 0 : i32
    %c0_i32_2 = arith.constant 0 : i32
    return %c0_i32, %c0_i32_0, %c0_i32_1 : i32, i32, i32
  }
  func.func @transform_8(%arg0: i32) -> (i32, i32) {
    %c0_i32 = arith.constant 0 : i32
    %c0_i32_0 = arith.constant 0 : i32
    %c0_i32_1 = arith.constant 0 : i32
    return %c0_i32, %c0_i32_0 : i32, i32
  }
  func.func @transform_9(%arg0: i32) -> (i32, i32, i32) {
    %c0_i32 = arith.constant 0 : i32
    %c0_i32_0 = arith.constant 0 : i32
    %c0_i32_1 = arith.constant 0 : i32
    %c0_i32_2 = arith.constant 0 : i32
    return %c0_i32, %c0_i32_0, %c0_i32_1 : i32, i32, i32
  }
  func.func @transform_10(%arg0: i32) -> (i32, i32) {
    %c0_i32 = arith.constant 0 : i32
    %c0_i32_0 = arith.constant 0 : i32
    %c0_i32_1 = arith.constant 0 : i32
    return %c0_i32, %c0_i32_0 : i32, i32
  }
  func.func @transform_11(%arg0: i32) -> (i32, i32) {
    %c0_i32 = arith.constant 0 : i32
    %c0_i32_0 = arith.constant 0 : i32
    %c0_i32_1 = arith.constant 0 : i32
    return %c0_i32, %c0_i32_0 : i32, i32
  }
  func.func @transform_12(%arg0: i32) -> (i32, i32) {
    %c0_i32 = arith.constant 0 : i32
    %c0_i32_0 = arith.constant 0 : i32
    %c0_i32_1 = arith.constant 0 : i32
    return %c0_i32, %c0_i32_0 : i32, i32
  }
  func.func @transform_13(%arg0: i32) -> (i32, i32, i32) {
    %c0_i32 = arith.constant 0 : i32
    %c0_i32_0 = arith.constant 0 : i32
    %c0_i32_1 = arith.constant 0 : i32
    return %arg0, %c0_i32, %c0_i32_0 : i32, i32, i32
  }
}

</mosaic_0001>

<bundles_post_ra>
// kernel: forward.1
= control target key start
LH: loop header
LB: loop body
LE: loop exit
PB: predicated region body
PF: predicated region fallthrough
CT: control target
= control target key end

     0   :  { %18 = vsyncpa [#allocation3], 0  ;;  %s15669_s0 = inlined_call_operand.vmem [shape: bf16[2,49,256], index: 0, kind: input, shape index: {}]   ;;  %s15670_s1 = inlined_call_operand.vmem [shape: bf16[256,128], index: 1, kind: input, shape index: {}]   ;;  %s15671_s2 = inlined_call_operand.vmem [shape: f32[1,128], index: 2, kind: input, shape index: {}]   ;;  %s15672_s3 = inlined_call_operand.vmem [shape: bf16[256,49], index: 3, kind: input, shape index: {}]   ;;  %s15673_s4 = inlined_call_operand.vmem [shape: bf16[16,128,128], index: 4, kind: input, shape index: {}]   ;;  %s15674_s5 = inlined_call_operand.vmem [shape: f32[1,128], index: 5, kind: input, shape index: {}]   ;;  %s15675_s6 = inlined_call_operand.vmem [shape: bf16[144,16], index: 6, kind: input, shape index: {}]   ;;  %s15676_s7 = inlined_call_operand.vmem [shape: bf16[9,128,128], index: 7, kind: input, shape index: {}]   ;;  %s15677_s8 = inlined_call_operand.vmem [shape: f32[1,128], index: 8, kind: input, shape index: {}]   ;;  %s15678_s9 = inlined_call_operand.vmem [shape: bf16[16,128,512], index: 9, kind: input, shape index: {}]   ;;  %s15679_s10 = inlined_call_operand.vmem [shape: f32[1,512], index: 10, kind: input, shape index: {}]   ;;  %s15680_s11 = inlined_call_operand.vmem [shape: bf16[512,128], index: 11, kind: input, shape index: {}]   ;;  %s15681_s12 = inlined_call_operand.vmem [shape: f32[1,128], index: 12, kind: input, shape index: {}]   ;;  %s15682_s13 = inlined_call_operand.hbm [shape: f32[2,1,128], index: 13, kind: output, shape index: {}]  }
   0x1   :  { %20 = vsyncpa [#allocation3 + $0x1], 0  ;;  %s12709_s25 = smov 0   ;;  %s12711_s26 = smov 0  }
   0x2   :  { %s12713_s27 = smov 0   ;;  %s12715_s28 = smov 0  }
   0x3 LB: > { %15688 = sst [smem:[#allocation5_spill]] %s12621_s25  ;;  %s12730_s29 = sadd.s32 4294967295, %s12633_s28   ;;  %s12633_s28 = sphi %s12715_s28, %s15697_s28   ;;  %s12629_s27 = sphi %s12713_s27, %s15699_s27   ;;  %s12625_s26 = sphi %s12711_s26, %s15701_s26   ;;  %s12621_s25 = sphi %s12709_s25, %s15700_s25  }
   0x4   : > { %15689 = sst [smem:[#allocation6_spill]] %s12629_s27  ;;  %s8884_s30 = sadd.s32 4294967294, %s12633_s28  }
   0x5   : > { %s12734_s14 = sadd.s32 1, %s12633_s28   ;;  %s311_s15 = sadd.s32 1, %s12629_s27 }
   0x6   : > { %15690 = sst [smem:[#allocation7_spill]] %s12734_s14  ;;  %s308_s16 = ssub.s32 %s12633_s28, %s12734_s14 }
   0x7   : > { %p321_p0 = scmp.ne.s32.totalorder %s12629_s27, %s12625_s26  ;;  %p309_p1 = scmp.eq.s32.totalorder %s308_s16, 0 }
   0x8   : > { %p322_p2 = scmp.eq.s32.totalorder %s12730_s29, 1  ;;  %p327_p3 = scmp.ne.s32.totalorder %s12625_s26, %s12621_s25 }
   0x9   : > { %p328_p4 = scmp.eq.s32.totalorder %s8884_s30, 1  ;;  %p8887_p7 = scmp.ge.s32.totalorder %s12633_s28, 1 }
   0xa   : > { %s12745_s17 = scalar_select %p309_p1, %s12629_s27, %s311_s15  }
   0xb   : > { %p12747_p5 = por %p322_p2, %p321_p0  ;;  %p12751_p6 = por %p328_p4, %p327_p3 }
   0xc   : > { %15691 = sst [smem:[#allocation8_spill]] %s12745_s17  ;;  %p390_p8 = scmp.lt.s32.totalorder %s12633_s28, 3 }
   0xd   : > { %s15693_s19 = scalar_select %p12751_p6, 1, 0 }
   0xe   : > { %p391_p9 = pnand %p8887_p7, %p390_p8 }
   0xf   : > { %15694 = sst [smem:[#allocation9_spill]] %s15693_s19  ;;  %p433_p10 = scmp.lt.s32.totalorder (!%p391_p9), %s12730_s29, 1 }
  0x10   : > { %394 = sbr.rel (%p391_p9) target bundleno = 2372 (0x944), region = 72  ;;  %s431_s23 = sand.u32 (!%p391_p9), 1, %s12625_s26  }
  0x11   : > { %s10558_s30 = sshll.u32 (!%p391_p9), %s12730_s29, 4  ;;  %s432_s15 = scalar_lea.vmem (!%p391_p9), [#allocation2], %s431_s23 }
  0x12   : > { %s8827_s19 = scalar_lea.hbm (!%p391_p9), %s15682_s13, %s10558_s30  ;;  %s8817_s25 = scalar_lea.sflag (!%p391_p9), [#allocation3], %s431_s23 }
  0x15   : > { %v11521_v0 = vld [vmem:[%s15670_s1 + $0x78] sm:$0xff]   ;;  %v11523_v2 = vld [vmem:[%s15670_s1 + $0x70] sm:$0xff]   ;;  %v11525_v4 = vld [vmem:[%s15670_s1 + $0x68] sm:$0xff]   ;;  %s434_s17 = scalar_select %p433_p10, %s12730_s29, 1  ;;  %vm805_vm0 = vcmask 400384   ;;  %v12635_v26 = vmov 0.0  }
  0x16   : > { %v11522_v1 = vld [vmem:[%s15670_s1 + $0x38] sm:$0xff]   ;;  %10561 = vmatprep.subr.bf16.mxu0 %v11521_v0  ;;  %v11524_v3 = vld [vmem:[%s15670_s1 + $0x30] sm:$0xff]   ;;  %v11526_v5 = vld [vmem:[%s15670_s1 + $0x28] sm:$0xff]   ;;  %vm854_vm1 = vcmask 1040384   ;;  %v12636_v60 = vmov 0   ;;  %vm12637_vm2 = vmmov 0  }
  0x17   : > { %10562 = vmatpush3.bf16.msra.mxu0 %v11522_v1  ;;  %v11527_v6 = vld [vmem:[%s15670_s1 + $0x60] sm:$0xff]   ;;  %s11478_s27 = smul.u32 56, %s434_s17  ;;  %v11529_v8 = vld [vmem:[%s15670_s1 + $0x58] sm:$0xff]   ;;  %v11531_v10 = vld [vmem:[%s15670_s1 + $0x50] sm:$0xff]   ;;  %v856_v61 = vsel %vm854_vm1, 65535, %v12636_v60  ;;  %vm2835_vm3 = vcmask 130048  }
  0x18   : > { %10563 = vmatprep.subr.bf16.mxu0 %v11523_v2  ;;  %v11528_v7 = vld [vmem:[%s15670_s1 + $0x20] sm:$0xff]   ;;  %v11530_v9 = vld [vmem:[%s15670_s1 + $0x18] sm:$0xff]   ;;  %v11532_v12 = vld [vmem:[%s15670_s1 + $0x10] sm:$0xff]   ;;  %s12638_s29 = smov [#allocation2]  }
  0x19   : > { %s437_s22 = scalar_lea.vmem %s15669_s0, %s11478_s27  ;;  %v11533_v13 = vld [vmem:[%s15670_s1 + $0x48] sm:$0xff]   ;;  %v11535_v15 = vld [vmem:[%s15670_s1 + $0x40] sm:$0xff]   ;;  %v11564_v27 = vld [vmem:[%s15673_s4 + $0x78] sm:$0xff]   ;;  %s12577_s20 = sshll.u32 %s12638_s29, 4  ;;  %s12578_s20 = int_to_ptr.vmem [resolvable:$false] %s12577_s20 }
  0x1a   : > { %v11539_v11 = vld [vmem:[%s437_s22 + $0x4] ss:$8 sps:$4 sm:$0xff]   ;;  %v11537_v17 = vld [vmem:[%s437_s22] ss:$8 sps:$4 sm:$0xff]   ;;  %v11540_v18 = vld [vmem:[%s437_s22 + $0x14] ss:$8 sps:$4 sm:$0xff]  }
  0x1b   : > { %10564 = vmatpush3.bf16.msra.mxu0 %v11524_v3  ;;  %650 = vmatprep.mubr.bf16.mxu0 %v11539_v11  ;;  %v11534_v14 = vld [vmem:[%s15670_s1 + $0x8] sm:$0xff]   ;;  %v11536_v16 = vld [vmem:[%s15670_s1] sm:$0xff]   ;;  %v11542_v19 = vld [vmem:[%s437_s22 + $0x10] ss:$8 sps:$4 sm:$0xff]   ;;  %s12579_s21 = scalar_lea.vmem %s12578_s20, 32 }
  0x1c   : > { %10565 = vmatprep.subr.bf16.mxu0 %v11525_v4  ;;  %v11543_v20 = vld [vmem:[%s437_s22 + $0x24] ss:$8 sps:$4 sm:$0xff]   ;;  %v445_v21 = vld [vmem:[%s437_s22 + $0x30] sm:$0x11]  ;;  %v11545_v22 = vld [vmem:[%s437_s22 + $0x20] ss:$8 sps:$4 sm:$0xff]  }
  0x1d   : > { %v8897_v23 = vcombine.high %v445_v21, %v445_v21  ;;  %v8896_v24 = vcombine.low %v445_v21, %v445_v21  ;;  %v11548_v25 = vld [vmem:[%s15672_s3] sm:$0xff]   ;;  %v11565_v28 = vld [vmem:[%s15673_s4 + $0x70] sm:$0xff]   ;;  %v11567_v29 = vld [vmem:[%s15673_s4 + $0x68] sm:$0xff]   ;;  %s8829_s22 = sshll.u32 %s432_s15, 4  ;;  %s8830_s22 = int_to_ptr.vmem [resolvable:$true] %s8829_s22 }
  0x1e   : > { %10908 = vmatprep.mubr.msk.bf16.mxu1 %vm805_vm0, %v11548_v25  ;;  %v11570_v30 = vld [vmem:[%s15673_s4 + $0x60] sm:$0xff]   ;;  %v11572_v31 = vld [vmem:[%s15673_s4 + $0x58] sm:$0xff]   ;;  %v11575_v32 = vld [vmem:[%s15673_s4 + $0x50] sm:$0xff]   ;;  %s12573_s16 = scalar_lea.vmem %s8830_s22, 16  ;;  %p12580_p0 = scmp.lt.s32.totalorder %s8830_s22, %s12578_s20 }
  0x1f   : > { %10566 = vmatpush3.bf16.msra.mxu0 %v11526_v5  ;;  %v11577_v33 = vld [vmem:[%s15673_s4 + $0x48] sm:$0xff]   ;;  %v8889_v48 = vld [vmem:[%s15671_s2] ss:$0 sm:$0xff]  ;;  %v11566_v25 = vld [vmem:[%s15673_s4 + $0x18] sm:$0xff]   ;;  %p12574_p11 = scmp.ne.s32.totalorder %s8830_s22, %s12573_s16  ;;  %p12581_p1 = scmp.lt.s32.totalorder %s12579_s21, %s12573_s16 }
  0x20   : > { %10567 = vmatprep.subr.bf16.mxu0 %v11527_v6  ;;  %v11562_v21 = vld [vmem:[%s15673_s4 + $0x28] sm:$0xff]  }
  0x21   : > { %p12575_p12 = pnand %p12574_p11, %p12747_p5  ;;  %p12582_p2 = por %p12581_p1, %p12580_p0 }
  0x23   : > { %10568 = vmatpush3.bf16.msra.mxu0 %v11528_v7  ;;  %p12576_p13 = pneg %p12575_p12 }
  0x24   : > { %10569 = vmatprep.subr.bf16.mxu0 %v11529_v8 }
  0x25   : > { %p12583_p3 = pnand %p12582_p2, %p12576_p13 }
  0x27   : > { %10570 = vmatpush3.bf16.msra.mxu0 %v11530_v9 }
  0x28   : > { %10571 = vmatprep.subr.bf16.mxu0 %v11531_v10 }
  0x2b   : > { %10572 = vmatpush3.bf16.msra.mxu0 %v11532_v12 }
  0x2c   : > { %10573 = vmatprep.subr.bf16.mxu0 %v11533_v13 }
  0x2f   : > { %10574 = vmatpush3.bf16.msra.mxu0 %v11534_v14 }
  0x30   : > { %10575 = vmatprep.subr.bf16.mxu0 %v11535_v15  ;;  %v11549_v15 = vld [vmem:[%s15672_s3 + $0x8] sm:$0xff]  }
  0x33   : > { %10576 = vmatpush3.bf16.msra.mxu0 %v11536_v16  ;;  %v11550_v16 = vld [vmem:[%s15672_s3 + $0x10] sm:$0xff]  }
  0x34   : > { %10940 = vmatprep.subr.bf16.mxu0 %v12635_v26 }
  0x36   : > { %651 = vmatmul.mubr.bf16.vlgmr.msra.gmra.mxu0 %v11537_v17  ;;  %v11558_v17 = vld [vmem:[%s15673_s4 + $0x38] sm:$0xff]  }
  0x37   : > { %658 = vmatprep.mubr.bf16.mxu0 %v11540_v18  ;;  %10941 = vmatpush3.bf16.msra.mxu0 %v11564_v27  ;;  %v11559_v18 = vld [vmem:[%s15673_s4 + $0x30] sm:$0xff]  }
  0x38   : > { %10942 = vmatprep.subr.bf16.mxu0 %v12635_v26  ;;  %v11571_v27 = vld [vmem:[%s15673_s4 + $0x10] sm:$0xff]  }
  0x3b   : > { %10943 = vmatpush3.bf16.msra.mxu0 %v11565_v28  ;;  %v11555_v28 = vld [vmem:[%s15672_s3 + $0x38] sm:$0xff]  }
  0x3c   : > { %10944 = vmatprep.subr.bf16.mxu0 %v12635_v26 }
  0x3e   : > { %659 = vmatmul.mubr.bf16.gmra.mxu0 %v11542_v19  ;;  %v11551_v19 = vld [vmem:[%s15672_s3 + $0x18] sm:$0xff]  }
  0x3f   : > { %666 = vmatprep.mubr.bf16.mxu0 %v11543_v20  ;;  %10945 = vmatpush3.bf16.msra.mxu0 %v11567_v29  ;;  %v11552_v20 = vld [vmem:[%s15672_s3 + $0x20] sm:$0xff]  }
  0x40   : > { %10946 = vmatprep.subr.bf16.mxu0 %v12635_v26  ;;  %v11556_v29 = vld [vmem:[%s15672_s3 + $0x40] sm:$0xff]  }
  0x43   : > { %10947 = vmatpush3.bf16.msra.mxu0 %v11570_v30  ;;  %v11576_v30 = vld [vmem:[%s15673_s4 + $0x8] sm:$0xff]  }
  0x44   : > { %10948 = vmatprep.subr.bf16.mxu0 %v12635_v26 }
  0x46   : > { %667 = vmatmul.mubr.bf16.gmra.mxu0 %v11545_v22  ;;  %v11563_v22 = vld [vmem:[%s15673_s4 + $0x20] sm:$0xff]  }
  0x47   : > { %674 = vmatprep.mubr.bf16.mxu0 %v8897_v23  ;;  %10949 = vmatpush3.bf16.msra.mxu0 %v11572_v31  ;;  %v11553_v23 = vld [vmem:[%s15672_s3 + $0x28] sm:$0xff]  }
  0x48   : > { %10950 = vmatprep.subr.bf16.mxu0 %v12635_v26  ;;  %v11557_v31 = vld [vmem:[%s15672_s3 + $0x48] sm:$0xff]  }
  0x4b   : > { %10951 = vmatpush3.bf16.msra.mxu0 %v11575_v32  ;;  %v11560_v32 = vld [vmem:[%s15672_s3 + $0x50] sm:$0xff]  }
  0x4c   : > { %10952 = vmatprep.subr.bf16.mxu0 %v12635_v26 }
  0x4e   : > { %675 = vmatmul.mubr.bf16.gmra.mxu0 %v8896_v24  ;;  %v11554_v24 = vld [vmem:[%s15672_s3 + $0x30] sm:$0xff]  }
  0x4f   : > { %10953 = vmatpush3.bf16.msra.mxu0 %v11577_v33  ;;  %v11561_v33 = vld [vmem:[%s15672_s3 + $0x58] sm:$0xff]   ;;  %10956 = vmatprep.mubr.msk.bf16.mxu0 %vm12637_vm2, %v12635_v26 }
  0x50   : > { %10954 = vmatprep.subr.bf16.mxu0 %v12635_v26 }
  0xf6   : > { %v10577_v34 = vpop.f32.mrf.mxu0 }
  0xf8   : > { %v10578_v35 = vpop.f32.mrf.mxu0 }
  0xf9   : > { %v10579_v2 = vadd.f32 %v10578_v35, %v10577_v34  ;;  %v11568_v34 = vld [vmem:[%s15672_s3 + $0x60] sm:$0xff]   ;;  %v11569_v35 = vld [vmem:[%s15672_s3 + $0x68] sm:$0xff]  }
  0xfa   : > { %v10580_v36 = vpop.f32.mrf.mxu0 }
  0xfb   : > { %v653_v9 = vadd.f32 %v10579_v2, %v8889_v48  ;;  %v11595_v2 = vld [vmem:[%s15673_s4 + $0xc0] sm:$0xff]  }
  0xfc   : > { %v10581_v37 = vpop.f32.mrf.mxu0 }
  0xfd   : > { %v10582_v62 = vadd.f32 %v10581_v37, %v10580_v36  ;;  %v682_v13 = vmax.f32 %v653_v9, 0.0  ;;  %v11573_v36 = vld [vmem:[%s15672_s3 + $0x70] sm:$0xff]   ;;  %v11574_v37 = vld [vmem:[%s15672_s3 + $0x78] sm:$0xff]   ;;  %v11600_v9 = vld [vmem:[%s15673_s4 + $0x128] sm:$0xff]  }
  0xfe   : > { %v10583_v38 = vpop.f32.mrf.mxu0 }
  0xff   : > { %v656_v6 = vadd.f32 %v10582_v62, %v8889_v48 }
 0x100   : > { %v10584_v39 = vpop.f32.mrf.mxu0 }
 0x101   : > { %v10585_v57 = vadd.f32 %v10584_v39, %v10583_v38  ;;  %v683_v11 = vmax.f32 %v656_v6, 0.0  ;;  %v11578_v38 = vld [vmem:[%s15673_s4 + $0x40] sm:$0xff]  }
 0x102   : > { %v10586_v40 = vpop.f32.mrf.mxu0  ;;  %10955 = vmatpush3.bf16.msra.mxu0 %v11578_v38  ;;  %v11579_v39 = vld [vmem:[%s15673_s4] sm:$0xff]   ;;  %v11621_v38 = vld [vmem:[%s15673_s4 + $0x1d8] sm:$0xff]  }
 0x103   : > { %v661_v3 = vadd.f32 %v10585_v57, %v8889_v48  ;;  %v689_v14 = vpack.c.bf16 %v683_v11, %v682_v13  ;;  %10980 = vmatprep.subr.bf16.mxu0 %v12635_v26  ;;  %v11590_v57 = vld [vmem:[%s15673_s4 + $0x90] sm:$0xff]   ;;  %v11602_v11 = vld [vmem:[%s15673_s4 + $0x120] sm:$0xff]   ;;  %v11604_v13 = vld [vmem:[%s15673_s4 + $0x118] sm:$0xff]  }
 0x104   : > { %v10587_v41 = vpop.f32.mrf.mxu0 }
 0x105   : > { %v10588_v53 = vadd.f32 %v10587_v41, %v10586_v40  ;;  %v684_v10 = vmax.f32 %v661_v3, 0.0  ;;  %v11596_v3 = vld [vmem:[%s15673_s4 + $0x138] sm:$0xff]  }
 0x106   : > { %v10589_v42 = vpop.f32.mrf.mxu0 }
 0x107   : > { %v664_v63 = vadd.f32 %v10588_v53, %v8889_v48  ;;  %v11587_v53 = vld [vmem:[%s15673_s4 + $0xe0] sm:$0xff]  }
 0x108   : > { %v10590_v43 = vpop.f32.mrf.mxu0 }
 0x109   : > { %v10591_v50 = vadd.f32 %v10590_v43, %v10589_v42  ;;  %v685_v7 = vmax.f32 %v664_v63, 0.0  ;;  %v11580_v43 = vld [vmem:[%s15673_s4 + $0xb8] sm:$0xff]   ;;  %v11593_v63 = vld [vmem:[%s15673_s4 + $0xc8] sm:$0xff]  }
 0x10a   : > { %v10592_v44 = vpop.f32.mrf.mxu0 }
 0x10b   : > { %v669_v58 = vadd.f32 %v10591_v50, %v8889_v48  ;;  %v690_v12 = vpack.c.bf16 %v685_v7, %v684_v10  ;;  %v11584_v50 = vld [vmem:[%s15673_s4 + $0xa8] sm:$0xff]   ;;  %v11598_v7 = vld [vmem:[%s15673_s4 + $0x130] sm:$0xff]  }
 0x10c   : > { %v10593_v45 = vpop.f32.mrf.mxu0  ;;  %v11601_v10 = vld [vmem:[%s15673_s4 + $0x168] sm:$0xff]  }
 0x10d   : > { %v10594_v47 = vadd.f32 %v10593_v45, %v10592_v44  ;;  %v686_v4 = vmax.f32 %v669_v58, 0.0 }
 0x10e   : > { %v10595_v46 = vpop.f32.mrf.mxu0 }
 0x10f   : > { %v672_v54 = vadd.f32 %v10594_v47, %v8889_v48 }
 0x110   : > { %v10596_v49 = vpop.f32.mrf.mxu0 }
 0x111   : > { %v10597_v51 = vadd.f32 %v10596_v49, %v10595_v46  ;;  %v687_v0 = vmax.f32 %v672_v54, 0.0  ;;  %v11581_v46 = vld [vmem:[%s15673_s4 + $0xf8] sm:$0xff]   ;;  %v11583_v49 = vld [vmem:[%s15673_s4 + $0xf0] sm:$0xff]  }
 0x112   : > { %v10598_v52 = vpop.f32.mrf.mxu0  ;;  %v11588_v54 = vld [vmem:[%s15673_s4 + $0x98] sm:$0xff]  }
 0x113   : > { %v677_v55 = vadd.f32 %v10597_v51, %v8889_v48  ;;  %v691_v8 = vpack.c.bf16 %v687_v0, %v686_v4  ;;  %v11582_v48 = vld [vmem:[%s15673_s4 + $0xb0] sm:$0xff]   ;;  %v11585_v51 = vld [vmem:[%s15673_s4 + $0xe8] sm:$0xff]   ;;  %v11586_v52 = vld [vmem:[%s15673_s4 + $0xa0] sm:$0xff]  }
 0x114   : > { %v10599_v56 = vpop.f32.mrf.mxu0  ;;  %v11594_v0 = vld [vmem:[%s15673_s4 + $0x80] sm:$0xff]  }
 0x115   : > { %v688_v59 = vmax.f32 %v677_v55, 0.0  ;;  %v11589_v56 = vld [vmem:[%s15673_s4 + $0xd8] sm:$0xff]  }
 0x117   : > { %v692_v1 = vpack.c.bf16 %v688_v59, %v688_v59  ;;  %v11591_v59 = vld [vmem:[%s15673_s4 + $0xd0] sm:$0xff]  }
 0x119   : > { %v858_v5 = vand.u32 %v856_v61, %v692_v1  ;;  %v11592_v61 = vld [vmem:[%s15673_s4 + $0x88] sm:$0xff]  }
 0x11b   : > { %10900 = vmatprep.subr.bf16.mxu1 %v858_v5 }
 0x11c   : > { %10901 = vmatpush3.bf16.msra.mxu1 %v858_v5  ;;  %v11597_v5 = vld [vmem:[%s15673_s4 + $0x178] sm:$0xff]  }
 0x11d   : > { %10902 = vmatprep.subr.bf16.mxu1 %v691_v8 }
 0x120   : > { %10903 = vmatpush3.bf16.msra.mxu1 %v691_v8  ;;  %v11599_v8 = vld [vmem:[%s15673_s4 + $0x170] sm:$0xff]  }
 0x121   : > { %10904 = vmatprep.subr.bf16.mxu1 %v690_v12 }
 0x124   : > { %10905 = vmatpush3.bf16.msra.mxu1 %v690_v12  ;;  %v11603_v12 = vld [vmem:[%s15673_s4 + $0x160] sm:$0xff]  }
 0x125   : > { %10906 = vmatprep.subr.bf16.mxu1 %v689_v14 }
 0x128   : > { %10907 = vmatpush3.bf16.msra.mxu1 %v689_v14 }
 0x129   : > { %10960 = vmatprep.subr.bf16.mxu1 %v12635_v26 }
 0x12b   : > { %10909 = vmatmul.mubr.msk.bf16.vlgmr.msra.gmra.mxu1 %vm805_vm0, %v11549_v15  ;;  %v11605_v15 = vld [vmem:[%s15673_s4 + $0x158] sm:$0xff]  }
 0x12c   : > { %10912 = vmatprep.mubr.msk.bf16.mxu1 %vm805_vm0, %v11550_v16  ;;  %10961 = vmatpush3.bf16.msra.mxu1 %v11558_v17  ;;  %v11606_v16 = vld [vmem:[%s15673_s4 + $0x110] sm:$0xff]  }
 0x12d   : > { %10962 = vmatprep.subr.bf16.mxu1 %v12635_v26 }
 0x130   : > { %10963 = vmatpush3.bf16.msra.mxu1 %v11559_v18  ;;  %v11607_v18 = vld [vmem:[%s15673_s4 + $0x150] sm:$0xff]  }
 0x131   : > { %10964 = vmatprep.subr.bf16.mxu1 %v12635_v26 }
 0x133   : > { %10913 = vmatmul.mubr.msk.bf16.gmra.mxu1 %vm805_vm0, %v11551_v19  ;;  %v11608_v19 = vld [vmem:[%s15673_s4 + $0x108] sm:$0xff]  }
 0x134   : > { %10916 = vmatprep.mubr.msk.bf16.mxu1 %vm805_vm0, %v11552_v20  ;;  %10965 = vmatpush3.bf16.msra.mxu1 %v11562_v21  ;;  %v11609_v21 = vld [vmem:[%s15673_s4 + $0x148] sm:$0xff]  }
 0x135   : > { %10966 = vmatprep.subr.bf16.mxu1 %v12635_v26 }
 0x138   : > { %10967 = vmatpush3.bf16.msra.mxu1 %v11563_v22  ;;  %v11610_v22 = vld [vmem:[%s15673_s4 + $0x100] sm:$0xff]  }
 0x139   : > { %10968 = vmatprep.subr.bf16.mxu1 %v12635_v26 }
 0x13b   : > { %10917 = vmatmul.mubr.msk.bf16.gmra.mxu1 %vm805_vm0, %v11553_v23 }
 0x13c   : > { %10920 = vmatprep.mubr.msk.bf16.mxu1 %vm805_vm0, %v11554_v24  ;;  %10969 = vmatpush3.bf16.msra.mxu1 %v11566_v25  ;;  %v11611_v24 = vld [vmem:[%s15673_s4 + $0x140] sm:$0xff]   ;;  %v11612_v25 = vld [vmem:[%s15673_s4 + $0x1b8] sm:$0xff]  }
 0x13d   : > { %10970 = vmatprep.subr.bf16.mxu1 %v12635_v26 }
 0x140   : > { %10971 = vmatpush3.bf16.msra.mxu1 %v11571_v27 }
 0x141   : > { %10972 = vmatprep.subr.bf16.mxu1 %v12635_v26 }
 0x143   : > { %10921 = vmatmul.mubr.msk.bf16.gmra.mxu1 %vm805_vm0, %v11555_v28  ;;  %v11613_v28 = vld [vmem:[%s15673_s4 + $0x1f8] sm:$0xff]  }
 0x144   : > { %10924 = vmatprep.mubr.msk.bf16.mxu1 %vm805_vm0, %v11556_v29  ;;  %10973 = vmatpush3.bf16.msra.mxu1 %v11576_v30  ;;  %v11614_v30 = vld [vmem:[%s15673_s4 + $0x1b0] sm:$0xff]  }
 0x145   : > { %10974 = vmatprep.subr.bf16.mxu1 %v12635_v26 }
 0x148   : > { %10975 = vmatpush3.bf16.msra.mxu1 %v11579_v39  ;;  %v11622_v39 = vld [vmem:[%s15673_s4 + $0x190] sm:$0xff]  }
 0x149   : > { %11000 = vmatprep.subr.bf16.mxu1 %v12635_v26 }
 0x14b   : > { %10925 = vmatmul.mubr.msk.bf16.gmra.mxu1 %vm805_vm0, %v11557_v31  ;;  %v11615_v31 = vld [vmem:[%s15673_s4 + $0x1f0] sm:$0xff]  }
 0x14c   : > { %10928 = vmatprep.mubr.msk.bf16.mxu1 %vm805_vm0, %v11560_v32  ;;  %v11616_v32 = vld [vmem:[%s15673_s4 + $0x1a8] sm:$0xff]  }
 0x153   : > { %10929 = vmatmul.mubr.msk.bf16.gmra.mxu1 %vm805_vm0, %v11561_v33  ;;  %v11617_v33 = vld [vmem:[%s15673_s4 + $0x1e8] sm:$0xff]  }
 0x154   : > { %10932 = vmatprep.mubr.msk.bf16.mxu1 %vm805_vm0, %v11568_v34  ;;  %v11618_v34 = vld [vmem:[%s15673_s4 + $0x1a0] sm:$0xff]  }
 0x15b   : > { %10933 = vmatmul.mubr.msk.bf16.gmra.mxu1 %vm805_vm0, %v11569_v35  ;;  %v11619_v35 = vld [vmem:[%s15673_s4 + $0x1e0] sm:$0xff]  }
 0x15c   : > { %10936 = vmatprep.mubr.msk.bf16.mxu1 %vm805_vm0, %v11573_v36  ;;  %v11620_v36 = vld [vmem:[%s15673_s4 + $0x198] sm:$0xff]  }
 0x163   : > { %10937 = vmatmul.mubr.msk.bf16.gmra.mxu1 %vm805_vm0, %v11574_v37 }
 0x164   : > { %10976 = vmatprep.mubr.msk.bf16.mxu1 %vm12637_vm2, %v12635_v26 }
 0x1eb   : > { %v10910_v40 = vpop.f32.mrf.mxu1 }
 0x1ed   : > { %v894_v41 = vpop.f32.mrf.mxu1 }
 0x1ef   : > { %v10911_v42 = vpop.f32.mrf.mxu1 }
 0x1f0   : > { %v1022_v44 = vpack.c.bf16 %v10911_v42, %v10910_v40  ;;  %v11624_v42 = vld [vmem:[%s15673_s4 + $0x188] sm:$0xff]  }
 0x1f1   : > { %v897_v45 = vpop.f32.mrf.mxu1 }
 0x1f2   : > { %v1021_v47 = vpack.c.bf16 %v897_v45, %v894_v41  ;;  %10957 = vmatmul.mubr.bf16.vlgmr.msra.gmra.mxu0 %v1022_v44  ;;  %v11623_v41 = vld [vmem:[%s15673_s4 + $0x1d0] sm:$0xff]   ;;  %v11625_v44 = vld [vmem:[%s15673_s4 + $0x1c8] sm:$0xff]   ;;  %v11626_v45 = vld [vmem:[%s15673_s4 + $0x180] sm:$0xff]  }
 0x1f3   : > { %10981 = vmatpush3.bf16.msra.mxu0 %v11580_v43  ;;  %10996 = vmatprep.mubr.msk.bf16.mxu0 %vm12637_vm2, %v12635_v26  ;;  %v10914_v55 = vpop.f32.mrf.mxu1 }
 0x1f4   : > { %10977 = vmatmul.mubr.bf16.vlgmr.msra.gmra.mxu1 %v1021_v47  ;;  %10982 = vmatprep.subr.bf16.mxu0 %v12635_v26  ;;  %v11627_v47 = vld [vmem:[%s15673_s4 + $0x1c0] sm:$0xff]  }
 0x1f5   : > { %11001 = vmatpush3.bf16.msra.mxu1 %v11581_v46  ;;  %11016 = vmatprep.mubr.msk.bf16.mxu1 %vm12637_vm2, %v12635_v26  ;;  %v910_v58 = vpop.f32.mrf.mxu1 }
 0x1f6   : > { %11002 = vmatprep.subr.bf16.mxu1 %v12635_v26 }
 0x1f7   : > { %10983 = vmatpush3.bf16.msra.mxu0 %v11582_v48  ;;  %v10915_v62 = vpop.f32.mrf.mxu1  ;;  %v11628_v48 = vld [vmem:[%s15673_s4 + $0x238] sm:$0xff]  }
 0x1f8   : > { %10984 = vmatprep.subr.bf16.mxu0 %v12635_v26  ;;  %v1024_v6 = vpack.c.bf16 %v10915_v62, %v10914_v55  ;;  %v11633_v55 = vld [vmem:[%s15673_s4 + $0x268] sm:$0xff]   ;;  %v11638_v62 = vld [vmem:[%s15673_s4 + $0x210] sm:$0xff]  }
 0x1f9   : > { %11003 = vmatpush3.bf16.msra.mxu1 %v11583_v49  ;;  %v913_v1 = vpop.f32.mrf.mxu1 }
 0x1fa   : > { %11004 = vmatprep.subr.bf16.mxu1 %v12635_v26  ;;  %v1023_v4 = vpack.c.bf16 %v913_v1, %v910_v58  ;;  %v11636_v58 = vld [vmem:[%s15673_s4 + $0x218] sm:$0xff]   ;;  %v11640_v1 = vld [vmem:[%s15673_s4 + $0x208] sm:$0xff]  }
 0x1fb   : > { %10985 = vmatpush3.bf16.msra.mxu0 %v11584_v50  ;;  %v10918_v14 = vpop.f32.mrf.mxu1  ;;  %v11629_v50 = vld [vmem:[%s15673_s4 + $0x278] sm:$0xff]  }
 0x1fc   : > { %10986 = vmatprep.subr.bf16.mxu0 %v12635_v26 }
 0x1fd   : > { %11005 = vmatpush3.bf16.msra.mxu1 %v11585_v51  ;;  %v926_v17 = vpop.f32.mrf.mxu1 }
 0x1fe   : > { %11006 = vmatprep.subr.bf16.mxu1 %v12635_v26 }
 0x1ff   : > { %10987 = vmatpush3.bf16.msra.mxu0 %v11586_v52  ;;  %v10919_v20 = vpop.f32.mrf.mxu1  ;;  %v11630_v52 = vld [vmem:[%s15673_s4 + $0x230] sm:$0xff]  }
 0x200   : > { %10988 = vmatprep.subr.bf16.mxu0 %v12635_v26  ;;  %v1026_v29 = vpack.c.bf16 %v10919_v20, %v10918_v14  ;;  %v11649_v14 = vld [vmem:[%s15673_s4 + $0x2e8] sm:$0xff]   ;;  %v11654_v20 = vld [vmem:[%s15673_s4 + $0x290] sm:$0xff]  }
 0x201   : > { %11007 = vmatpush3.bf16.msra.mxu1 %v11587_v53  ;;  %v929_v23 = vpop.f32.mrf.mxu1  ;;  %v11631_v53 = vld [vmem:[%s15673_s4 + $0x270] sm:$0xff]  }
 0x202   : > { %11008 = vmatprep.subr.bf16.mxu1 %v12635_v26  ;;  %v1025_v27 = vpack.c.bf16 %v929_v23, %v926_v17  ;;  %v11652_v17 = vld [vmem:[%s15673_s4 + $0x298] sm:$0xff]   ;;  %v11656_v23 = vld [vmem:[%s15673_s4 + $0x288] sm:$0xff]  }
 0x203   : > { %10989 = vmatpush3.bf16.msra.mxu0 %v11588_v54  ;;  %v10922_v37 = vpop.f32.mrf.mxu1  ;;  %v11632_v54 = vld [vmem:[%s15673_s4 + $0x228] sm:$0xff]  }
 0x204   : > { %10990 = vmatprep.subr.bf16.mxu0 %v12635_v26 }
 0x205   : > { %11009 = vmatpush3.bf16.msra.mxu1 %v11589_v56  ;;  %v942_v40 = vpop.f32.mrf.mxu1  ;;  %v11634_v56 = vld [vmem:[%s15673_s4 + $0x220] sm:$0xff]  }
 0x206   : > { %11010 = vmatprep.subr.bf16.mxu1 %v12635_v26 }
 0x207   : > { %10991 = vmatpush3.bf16.msra.mxu0 %v11590_v57  ;;  %v10923_v43 = vpop.f32.mrf.mxu1  ;;  %v11635_v57 = vld [vmem:[%s15673_s4 + $0x260] sm:$0xff]  }
 0x208   : > { %10992 = vmatprep.subr.bf16.mxu0 %v12635_v26  ;;  %v1028_v51 = vpack.c.bf16 %v10923_v43, %v10922_v37  ;;  %v11664_v37 = vld [vmem:[%s15673_s4 + $0x328] sm:$0xff]   ;;  %v11668_v43 = vld [vmem:[%s15673_s4 + $0x318] sm:$0xff]  }
 0x209   : > { %11011 = vmatpush3.bf16.msra.mxu1 %v11591_v59  ;;  %v945_v46 = vpop.f32.mrf.mxu1 }
 0x20a   : > { %11012 = vmatprep.subr.bf16.mxu1 %v12635_v26  ;;  %v1027_v49 = vpack.c.bf16 %v945_v46, %v942_v40  ;;  %v11666_v40 = vld [vmem:[%s15673_s4 + $0x320] sm:$0xff]   ;;  %v11670_v46 = vld [vmem:[%s15673_s4 + $0x310] sm:$0xff]  }
 0x20b   : > { %10993 = vmatpush3.bf16.msra.mxu0 %v11592_v61  ;;  %v10926_v59 = vpop.f32.mrf.mxu1  ;;  %v11637_v61 = vld [vmem:[%s15673_s4 + $0x258] sm:$0xff]  }
 0x20c   : > { %10994 = vmatprep.subr.bf16.mxu0 %v12635_v26 }
 0x20d   : > { %11013 = vmatpush3.bf16.msra.mxu1 %v11593_v63  ;;  %v958_v63 = vpop.f32.mrf.mxu1 }
 0x20e   : > { %11014 = vmatprep.subr.bf16.mxu1 %v12635_v26 }
 0x20f   : > { %10995 = vmatpush3.bf16.msra.mxu0 %v11594_v0  ;;  %v11639_v0 = vld [vmem:[%s15673_s4 + $0x250] sm:$0xff]  }
 0x210   : > { %11020 = vmatprep.subr.bf16.mxu0 %v12635_v26 }
 0x211   : > { %11015 = vmatpush3.bf16.msra.mxu1 %v11595_v2  ;;  %v10927_v2 = vpop.f32.mrf.mxu1 }
 0x212   : > { %10997 = vmatmul.mubr.bf16.vlgmr.msra.gmra.mxu0 %v1023_v4  ;;  %11040 = vmatprep.subr.bf16.mxu1 %v12635_v26  ;;  %v11642_v4 = vld [vmem:[%s15673_s4 + $0x200] sm:$0xff]  }
 0x213   : > { %11021 = vmatpush3.bf16.msra.mxu0 %v11596_v3  ;;  %11036 = vmatprep.mubr.msk.bf16.mxu0 %vm12637_vm2, %v12635_v26  ;;  %v11641_v3 = vld [vmem:[%s15673_s4 + $0x248] sm:$0xff]  }
 0x214   : > { %11017 = vmatmul.mubr.bf16.vlgmr.msra.gmra.mxu1 %v1024_v6  ;;  %11022 = vmatprep.subr.bf16.mxu0 %v12635_v26  ;;  %v11643_v6 = vld [vmem:[%s15673_s4 + $0x240] sm:$0xff]  }
 0x215   : > { %11041 = vmatpush3.bf16.msra.mxu1 %v11597_v5  ;;  %11056 = vmatprep.mubr.msk.bf16.mxu1 %vm12637_vm2, %v12635_v26  ;;  %v961_v5 = vpop.f32.mrf.mxu1 }
 0x216   : > { %11042 = vmatprep.subr.bf16.mxu1 %v12635_v26 }
 0x217   : > { %11023 = vmatpush3.bf16.msra.mxu0 %v11598_v7  ;;  %v11644_v7 = vld [vmem:[%s15673_s4 + $0x2b8] sm:$0xff]  }
 0x218   : > { %11024 = vmatprep.subr.bf16.mxu0 %v12635_v26 }
 0x219   : > { %11043 = vmatpush3.bf16.msra.mxu1 %v11599_v8  ;;  %v1029_v8 = vpack.c.bf16 %v961_v5, %v958_v63  ;;  %v11680_v5 = vld [vmem:[%s15673_s4 + $0x3a8] sm:$0xff]  }
 0x21a   : > { %11044 = vmatprep.subr.bf16.mxu1 %v12635_v26 }
 0x21b   : > { %11025 = vmatpush3.bf16.msra.mxu0 %v11600_v9  ;;  %v11645_v9 = vld [vmem:[%s15673_s4 + $0x2f8] sm:$0xff]  }
 0x21c   : > { %11026 = vmatprep.subr.bf16.mxu0 %v12635_v26 }
 0x21d   : > { %11045 = vmatpush3.bf16.msra.mxu1 %v11601_v10  ;;  %v1030_v10 = vpack.c.bf16 %v10927_v2, %v10926_v59  ;;  %v11679_v2 = vld [vmem:[%s15673_s4 + $0x3f0] sm:$0xff]  }
 0x21e   : > { %11046 = vmatprep.subr.bf16.mxu1 %v12635_v26 }
 0x21f   : > { %11027 = vmatpush3.bf16.msra.mxu0 %v11602_v11  ;;  %v11646_v11 = vld [vmem:[%s15673_s4 + $0x2b0] sm:$0xff]  }
 0x220   : > { %11028 = vmatprep.subr.bf16.mxu0 %v12635_v26 }
 0x221   : > { %11047 = vmatpush3.bf16.msra.mxu1 %v11603_v12  ;;  %v11647_v12 = vld [vmem:[%s15673_s4 + $0x2f0] sm:$0xff]  }
 0x222   : > { %11048 = vmatprep.subr.bf16.mxu1 %v12635_v26 }
 0x223   : > { %11029 = vmatpush3.bf16.msra.mxu0 %v11604_v13  ;;  %v11648_v13 = vld [vmem:[%s15673_s4 + $0x2a8] sm:$0xff]  }
 0x224   : > { %11030 = vmatprep.subr.bf16.mxu0 %v12635_v26 }
 0x225   : > { %11049 = vmatpush3.bf16.msra.mxu1 %v11605_v15  ;;  %v11650_v15 = vld [vmem:[%s15673_s4 + $0x2a0] sm:$0xff]  }
 0x226   : > { %11050 = vmatprep.subr.bf16.mxu1 %v12635_v26 }
 0x227   : > { %11031 = vmatpush3.bf16.msra.mxu0 %v11606_v16  ;;  %v11651_v16 = vld [vmem:[%s15673_s4 + $0x2e0] sm:$0xff]  }
 0x228   : > { %11032 = vmatprep.subr.bf16.mxu0 %v12635_v26 }
 0x229   : > { %11051 = vmatpush3.bf16.msra.mxu1 %v11607_v18  ;;  %v10930_v18 = vpop.f32.mrf.mxu1 }
 0x22a   : > { %11052 = vmatprep.subr.bf16.mxu1 %v12635_v26 }
 0x22b   : > { %11033 = vmatpush3.bf16.msra.mxu0 %v11608_v19  ;;  %v11653_v19 = vld [vmem:[%s15673_s4 + $0x2d8] sm:$0xff]  }
 0x22c   : > { %11034 = vmatprep.subr.bf16.mxu0 %v12635_v26 }
 0x22d   : > { %11053 = vmatpush3.bf16.msra.mxu1 %v11609_v21  ;;  %v974_v21 = vpop.f32.mrf.mxu1 }
 0x22e   : > { %11054 = vmatprep.subr.bf16.mxu1 %v12635_v26 }
 0x22f   : > { %11035 = vmatpush3.bf16.msra.mxu0 %v11610_v22  ;;  %v11655_v22 = vld [vmem:[%s15673_s4 + $0x2d0] sm:$0xff]  }
 0x230   : > { %11060 = vmatprep.subr.bf16.mxu0 %v12635_v26 }
 0x231   : > { %11055 = vmatpush3.bf16.msra.mxu1 %v11611_v24  ;;  %v10931_v24 = vpop.f32.mrf.mxu1 }
 0x232   : > { %11037 = vmatmul.mubr.bf16.vlgmr.msra.gmra.mxu0 %v1025_v27  ;;  %11080 = vmatprep.subr.bf16.mxu1 %v12635_v26  ;;  %v11658_v27 = vld [vmem:[%s15673_s4 + $0x280] sm:$0xff]  }
 0x233   : > { %11061 = vmatpush3.bf16.msra.mxu0 %v11612_v25  ;;  %11076 = vmatprep.mubr.msk.bf16.mxu0 %vm12637_vm2, %v12635_v26  ;;  %v11657_v25 = vld [vmem:[%s15673_s4 + $0x2c8] sm:$0xff]  }
 0x234   : > { %11057 = vmatmul.mubr.bf16.vlgmr.msra.gmra.mxu1 %v1026_v29  ;;  %11062 = vmatprep.subr.bf16.mxu0 %v12635_v26  ;;  %v11659_v29 = vld [vmem:[%s15673_s4 + $0x2c0] sm:$0xff]  }
 0x235   : > { %11081 = vmatpush3.bf16.msra.mxu1 %v11613_v28  ;;  %11096 = vmatprep.mubr.msk.bf16.mxu1 %vm12637_vm2, %v12635_v26  ;;  %v977_v28 = vpop.f32.mrf.mxu1 }
 0x236   : > { %11082 = vmatprep.subr.bf16.mxu1 %v12635_v26 }
 0x237   : > { %11063 = vmatpush3.bf16.msra.mxu0 %v11614_v30  ;;  %v11660_v30 = vld [vmem:[%s15673_s4 + $0x338] sm:$0xff]  }
 0x238   : > { %11064 = vmatprep.subr.bf16.mxu0 %v12635_v26 }
 0x239   : > { %11083 = vmatpush3.bf16.msra.mxu1 %v11615_v31  ;;  %v1031_v31 = vpack.c.bf16 %v977_v28, %v974_v21 }
 0x23a   : > { %11084 = vmatprep.subr.bf16.mxu1 %v12635_v26 }
 0x23b   : > { %11065 = vmatpush3.bf16.msra.mxu0 %v11616_v32  ;;  %v11661_v32 = vld [vmem:[%s15673_s4 + $0x378] sm:$0xff]  }
 0x23c   : > { %11066 = vmatprep.subr.bf16.mxu0 %v12635_v26 }
 0x23d   : > { %11085 = vmatpush3.bf16.msra.mxu1 %v11617_v33  ;;  %v1032_v33 = vpack.c.bf16 %v10931_v24, %v10930_v18  ;;  %v11689_v18 = vld [vmem:[%s15673_s4 + $0x3c8] sm:$0xff]  }
 0x23e   : > { %11086 = vmatprep.subr.bf16.mxu1 %v12635_v26 }
 0x23f   : > { %11067 = vmatpush3.bf16.msra.mxu0 %v11618_v34  ;;  %v11662_v34 = vld [vmem:[%s15673_s4 + $0x330] sm:$0xff]  }
 0x240   : > { %11068 = vmatprep.subr.bf16.mxu0 %v12635_v26 }
 0x241   : > { %11087 = vmatpush3.bf16.msra.mxu1 %v11619_v35  ;;  %v11663_v35 = vld [vmem:[%s15673_s4 + $0x370] sm:$0xff]  }
 0x242   : > { %11088 = vmatprep.subr.bf16.mxu1 %v12635_v26 }
 0x243   : > { %11069 = vmatpush3.bf16.msra.mxu0 %v11620_v36  ;;  %v10934_v36 = vpop.f32.mrf.mxu1 }
 0x244   : > { %11070 = vmatprep.subr.bf16.mxu0 %v12635_v26 }
 0x245   : > { %11089 = vmatpush3.bf16.msra.mxu1 %v11621_v38  ;;  %v11665_v38 = vld [vmem:[%s15673_s4 + $0x368] sm:$0xff]  }
 0x246   : > { %11090 = vmatprep.subr.bf16.mxu1 %v12635_v26 }
 0x247   : > { %11071 = vmatpush3.bf16.msra.mxu0 %v11622_v39  ;;  %v990_v39 = vpop.f32.mrf.mxu1 }
 0x248   : > { %11072 = vmatprep.subr.bf16.mxu0 %v12635_v26 }
 0x249   : > { %11091 = vmatpush3.bf16.msra.mxu1 %v11623_v41  ;;  %v11667_v41 = vld [vmem:[%s15673_s4 + $0x360] sm:$0xff]  }
 0x24a   : > { %11092 = vmatprep.subr.bf16.mxu1 %v12635_v26 }
 0x24b   : > { %11073 = vmatpush3.bf16.msra.mxu0 %v11624_v42  ;;  %v10935_v42 = vpop.f32.mrf.mxu1 }
 0x24c   : > { %11074 = vmatprep.subr.bf16.mxu0 %v12635_v26 }
 0x24d   : > { %11093 = vmatpush3.bf16.msra.mxu1 %v11625_v44  ;;  %v11669_v44 = vld [vmem:[%s15673_s4 + $0x358] sm:$0xff]  }
 0x24e   : > { %11094 = vmatprep.subr.bf16.mxu1 %v12635_v26 }
 0x24f   : > { %11075 = vmatpush3.bf16.msra.mxu0 %v11626_v45  ;;  %v993_v45 = vpop.f32.mrf.mxu1 }
 0x250   : > { %11100 = vmatprep.subr.bf16.mxu0 %v12635_v26 }
 0x251   : > { %11095 = vmatpush3.bf16.msra.mxu1 %v11627_v47  ;;  %v11671_v47 = vld [vmem:[%s15673_s4 + $0x350] sm:$0xff]  }
 0x252   : > { %11077 = vmatmul.mubr.bf16.vlgmr.msra.gmra.mxu0 %v1027_v49  ;;  %11120 = vmatprep.subr.bf16.mxu1 %v12635_v26  ;;  %v11672_v49 = vld [vmem:[%s15673_s4 + $0x308] sm:$0xff]  }
 0x253   : > { %11101 = vmatpush3.bf16.msra.mxu0 %v11628_v48  ;;  %11116 = vmatprep.mubr.msk.bf16.mxu0 %vm12637_vm2, %v12635_v26  ;;  %v13337_v48 = vpop.f32.mrf.mxu1 }
 0x254   : > { %11097 = vmatmul.mubr.bf16.vlgmr.msra.gmra.mxu1 %v1028_v51  ;;  %11102 = vmatprep.subr.bf16.mxu0 %v12635_v26 }
 0x255   : > { %11121 = vmatpush3.bf16.msra.mxu1 %v11629_v50  ;;  %11136 = vmatprep.mubr.msk.bf16.mxu1 %vm12637_vm2, %v12635_v26  ;;  %v11673_v50 = vld [vmem:[%s15673_s4 + $0x348] sm:$0xff]   ;;  %v13347_v51 = vpop.f32.mrf.mxu1 }
 0x256   : > { %11122 = vmatprep.subr.bf16.mxu1 %v12635_v26 }
 0x257   : > { %11103 = vmatpush3.bf16.msra.mxu0 %v11630_v52  ;;  %v11674_v52 = vld [vmem:[%s15673_s4 + $0x300] sm:$0xff]  }
 0x258   : > { %11104 = vmatprep.subr.bf16.mxu0 %v12635_v26 }
 0x259   : > { %11123 = vmatpush3.bf16.msra.mxu1 %v11631_v53  ;;  %v11675_v53 = vld [vmem:[%s15673_s4 + $0x340] sm:$0xff]  }
 0x25a   : > { %11124 = vmatprep.subr.bf16.mxu1 %v12635_v26 }
 0x25b   : > { %11105 = vmatpush3.bf16.msra.mxu0 %v11632_v54  ;;  %v13357_v54 = vpop.f32.mrf.mxu1 }
 0x25c   : > { %11106 = vmatprep.subr.bf16.mxu0 %v12635_v26 }
 0x25d   : > { %11125 = vmatpush3.bf16.msra.mxu1 %v11633_v55  ;;  %v11676_v55 = vld [vmem:[%s15673_s4 + $0x3b8] sm:$0xff]   ;;  %v13367_v59 = vpop.f32.mrf.mxu1 }
 0x25e   : > { %11126 = vmatprep.subr.bf16.mxu1 %v12635_v26  ;;  %v1035_v21 = vpack.c.bf16 %v13367_v59, %v13347_v51 }
 0x25f   : > { %11107 = vmatpush3.bf16.msra.mxu0 %v11634_v56  ;;  %v1033_v56 = vpack.c.bf16 %v993_v45, %v990_v39 }
 0x260   : > { %11108 = vmatprep.subr.bf16.mxu0 %v12635_v26 }
 0x261   : > { %11127 = vmatpush3.bf16.msra.mxu1 %v11635_v57  ;;  %v11677_v57 = vld [vmem:[%s15673_s4 + $0x3f8] sm:$0xff]  }
 0x262   : > { %11128 = vmatprep.subr.bf16.mxu1 %v12635_v26 }
 0x263   : > { %11109 = vmatpush3.bf16.msra.mxu0 %v11636_v58  ;;  %v1034_v58 = vpack.c.bf16 %v10935_v42, %v10934_v36 }
 0x264   : > { %11110 = vmatprep.subr.bf16.mxu0 %v12635_v26 }
 0x265   : > { %11129 = vmatpush3.bf16.msra.mxu1 %v11637_v61 }
 0x266   : > { %11130 = vmatprep.subr.bf16.mxu1 %v12635_v26 }
 0x267   : > { %11111 = vmatpush3.bf16.msra.mxu0 %v11638_v62  ;;  %v11678_v62 = vld [vmem:[%s15673_s4 + $0x3b0] sm:$0xff]  }
 0x268   : > { %11112 = vmatprep.subr.bf16.mxu0 %v12635_v26 }
 0x269   : > { %11131 = vmatpush3.bf16.msra.mxu1 %v11639_v0 }
 0x26a   : > { %11132 = vmatprep.subr.bf16.mxu1 %v12635_v26 }
 0x26b   : > { %11113 = vmatpush3.bf16.msra.mxu0 %v11640_v1 }
 0x26c   : > { %11114 = vmatprep.subr.bf16.mxu0 %v12635_v26 }
 0x26d   : > { %11133 = vmatpush3.bf16.msra.mxu1 %v11641_v3 }
 0x26e   : > { %11134 = vmatprep.subr.bf16.mxu1 %v12635_v26 }
 0x26f   : > { %11115 = vmatpush3.bf16.msra.mxu0 %v11642_v4 }
 0x270   : > { %11140 = vmatprep.subr.bf16.mxu0 %v12635_v26 }
 0x271   : > { %11135 = vmatpush3.bf16.msra.mxu1 %v11643_v6 }
 0x272   : > { %11117 = vmatmul.mubr.bf16.vlgmr.msra.gmra.mxu0 %v1029_v8  ;;  %11160 = vmatprep.subr.bf16.mxu1 %v12635_v26 }
 0x273   : > { %11141 = vmatpush3.bf16.msra.mxu0 %v11644_v7  ;;  %11156 = vmatprep.mubr.msk.bf16.mxu0 %vm12637_vm2, %v12635_v26 }
 0x274   : > { %11137 = vmatmul.mubr.bf16.vlgmr.msra.gmra.mxu1 %v1030_v10  ;;  %11142 = vmatprep.subr.bf16.mxu0 %v12635_v26 }
 0x275   : > { %11161 = vmatpush3.bf16.msra.mxu1 %v11645_v9  ;;  %11176 = vmatprep.mubr.msk.bf16.mxu1 %vm12637_vm2, %v12635_v26  ;;  %v11681_v9 = vld [vmem:[%s15673_s4 + $0x3e8] sm:$0xff]  }
 0x276   : > { %11162 = vmatprep.subr.bf16.mxu1 %v12635_v26 }
 0x277   : > { %11143 = vmatpush3.bf16.msra.mxu0 %v11646_v11  ;;  %v11682_v11 = vld [vmem:[%s15673_s4 + $0x3a0] sm:$0xff]  }
 0x278   : > { %11144 = vmatprep.subr.bf16.mxu0 %v12635_v26 }
 0x279   : > { %11163 = vmatpush3.bf16.msra.mxu1 %v11647_v12  ;;  %v11683_v12 = vld [vmem:[%s15673_s4 + $0x3e0] sm:$0xff]  }
 0x27a   : > { %11164 = vmatprep.subr.bf16.mxu1 %v12635_v26 }
 0x27b   : > { %11145 = vmatpush3.bf16.msra.mxu0 %v11648_v13  ;;  %v11684_v13 = vld [vmem:[%s15673_s4 + $0x398] sm:$0xff]  }
 0x27c   : > { %11146 = vmatprep.subr.bf16.mxu0 %v12635_v26 }
 0x27d   : > { %11165 = vmatpush3.bf16.msra.mxu1 %v11649_v14  ;;  %v11685_v14 = vld [vmem:[%s15673_s4 + $0x3d8] sm:$0xff]  }
 0x27e   : > { %11166 = vmatprep.subr.bf16.mxu1 %v12635_v26 }
 0x27f   : > { %11147 = vmatpush3.bf16.msra.mxu0 %v11650_v15  ;;  %v11686_v15 = vld [vmem:[%s15673_s4 + $0x390] sm:$0xff]  }
 0x280   : > { %11148 = vmatprep.subr.bf16.mxu0 %v12635_v26 }
 0x281   : > { %11167 = vmatpush3.bf16.msra.mxu1 %v11651_v16  ;;  %v11687_v16 = vld [vmem:[%s15673_s4 + $0x3d0] sm:$0xff]  }
 0x282   : > { %11168 = vmatprep.subr.bf16.mxu1 %v12635_v26 }
 0x283   : > { %11149 = vmatpush3.bf16.msra.mxu0 %v11652_v17  ;;  %v11688_v17 = vld [vmem:[%s15673_s4 + $0x388] sm:$0xff]  }
 0x284   : > { %11150 = vmatprep.subr.bf16.mxu0 %v12635_v26 }
 0x285   : > { %11169 = vmatpush3.bf16.msra.mxu1 %v11653_v19  ;;  %v11690_v19 = vld [vmem:[%s15673_s4 + $0x380] sm:$0xff]  }
 0x286   : > { %11170 = vmatprep.subr.bf16.mxu1 %v12635_v26 }
 0x287   : > { %11151 = vmatpush3.bf16.msra.mxu0 %v11654_v20  ;;  %v11691_v20 = vld [vmem:[%s15673_s4 + $0x3c0] sm:$0xff]  }
 0x288   : > { %11152 = vmatprep.subr.bf16.mxu0 %v12635_v26 }
 0x289   : > { %11171 = vmatpush3.bf16.msra.mxu1 %v11655_v22  ;;  %v1036_v22 = vpack.c.bf16 %v13357_v54, %v13337_v48 }
 0x28a   : > { %11172 = vmatprep.subr.bf16.mxu1 %v12635_v26 }
 0x28b   : > { %11153 = vmatpush3.bf16.msra.mxu0 %v11656_v23 }
 0x28c   : > { %11154 = vmatprep.subr.bf16.mxu0 %v12635_v26 }
 0x28d   : > { %11173 = vmatpush3.bf16.msra.mxu1 %v11657_v25 }
 0x28e   : > { %11174 = vmatprep.subr.bf16.mxu1 %v12635_v26 }
 0x28f   : > { %11155 = vmatpush3.bf16.msra.mxu0 %v11658_v27 }
 0x290   : > { %11180 = vmatprep.subr.bf16.mxu0 %v12635_v26 }
 0x291   : > { %11175 = vmatpush3.bf16.msra.mxu1 %v11659_v29 }
 0x292   : > { %11157 = vmatmul.mubr.bf16.vlgmr.msra.gmra.mxu0 %v1031_v31  ;;  %11200 = vmatprep.subr.bf16.mxu1 %v12635_v26 }
 0x293   : > { %11181 = vmatpush3.bf16.msra.mxu0 %v11660_v30  ;;  %11196 = vmatprep.mubr.msk.bf16.mxu0 %vm12637_vm2, %v12635_v26 }
 0x294   : > { %11177 = vmatmul.mubr.bf16.vlgmr.msra.gmra.mxu1 %v1032_v33  ;;  %11182 = vmatprep.subr.bf16.mxu0 %v12635_v26 }
 0x295   : > { %11201 = vmatpush3.bf16.msra.mxu1 %v11661_v32  ;;  %11216 = vmatprep.mubr.msk.bf16.mxu1 %vm12637_vm2, %v12635_v26 }
 0x296   : > { %11202 = vmatprep.subr.bf16.mxu1 %v12635_v26 }
 0x297   : > { %11183 = vmatpush3.bf16.msra.mxu0 %v11662_v34 }
 0x298   : > { %11184 = vmatprep.subr.bf16.mxu0 %v12635_v26 }
 0x299   : > { %11203 = vmatpush3.bf16.msra.mxu1 %v11663_v35 }
 0x29a   : > { %11204 = vmatprep.subr.bf16.mxu1 %v12635_v26 }
 0x29b   : > { %11185 = vmatpush3.bf16.msra.mxu0 %v11664_v37 }
 0x29c   : > { %11186 = vmatprep.subr.bf16.mxu0 %v12635_v26 }
 0x29d   : > { %11205 = vmatpush3.bf16.msra.mxu1 %v11665_v38 }
 0x29e   : > { %11206 = vmatprep.subr.bf16.mxu1 %v12635_v26 }
 0x29f   : > { %11187 = vmatpush3.bf16.msra.mxu0 %v11666_v40 }
 0x2a0   : > { %11188 = vmatprep.subr.bf16.mxu0 %v12635_v26 }
 0x2a1   : > { %11207 = vmatpush3.bf16.msra.mxu1 %v11667_v41 }
 0x2a2   : > { %11208 = vmatprep.subr.bf16.mxu1 %v12635_v26 }
 0x2a3   : > { %11189 = vmatpush3.bf16.msra.mxu0 %v11668_v43 }
 0x2a4   : > { %11190 = vmatprep.subr.bf16.mxu0 %v12635_v26 }
 0x2a5   : > { %11209 = vmatpush3.bf16.msra.mxu1 %v11669_v44 }
 0x2a6   : > { %11210 = vmatprep.subr.bf16.mxu1 %v12635_v26 }
 0x2a7   : > { %11191 = vmatpush3.bf16.msra.mxu0 %v11670_v46 }
 0x2a8   : > { %11192 = vmatprep.subr.bf16.mxu0 %v12635_v26 }
 0x2a9   : > { %11211 = vmatpush3.bf16.msra.mxu1 %v11671_v47 }
 0x2aa   : > { %11212 = vmatprep.subr.bf16.mxu1 %v12635_v26 }
 0x2ab   : > { %11193 = vmatpush3.bf16.msra.mxu0 %v11672_v49 }
 0x2ac   : > { %11194 = vmatprep.subr.bf16.mxu0 %v12635_v26 }
 0x2ad   : > { %11213 = vmatpush3.bf16.msra.mxu1 %v11673_v50 }
 0x2ae   : > { %11214 = vmatprep.subr.bf16.mxu1 %v12635_v26 }
 0x2af   : > { %11195 = vmatpush3.bf16.msra.mxu0 %v11674_v52 }
 0x2b0   : > { %11220 = vmatprep.subr.bf16.mxu0 %v12635_v26 }
 0x2b1   : > { %11215 = vmatpush3.bf16.msra.mxu1 %v11675_v53 }
 0x2b2   : > { %11197 = vmatmul.mubr.bf16.vlgmr.msra.gmra.mxu0 %v1033_v56  ;;  %v1152_v61 = vpop.f32.mrf.mxu0  ;;  %11240 = vmatprep.subr.bf16.mxu1 %v12635_v26 }
 0x2b3   : > { %11221 = vmatpush3.bf16.msra.mxu0 %v11676_v55  ;;  %11236 = vmatprep.mubr.msk.bf16.mxu0 %vm12637_vm2, %v12635_v26 }
 0x2b4   : > { %11217 = vmatmul.mubr.bf16.vlgmr.msra.gmra.mxu1 %v1034_v58  ;;  %v10958_v63 = vpop.f32.mrf.mxu0  ;;  %v1241_v0 = vpop.f32.mrf.mxu1  ;;  %11222 = vmatprep.subr.bf16.mxu0 %v12635_v26 }
 0x2b5   : > { %v1242_v1 = vadd.f32 %v1241_v0, %v1152_v61  ;;  %11241 = vmatpush3.bf16.msra.mxu1 %v11677_v57  ;;  %11256 = vmatprep.mubr.msk.bf16.mxu1 %vm12637_vm2, %v12635_v26 }
 0x2b6   : > { %v1155_v3 = vpop.f32.mrf.mxu0  ;;  %v10978_v4 = vpop.f32.mrf.mxu1  ;;  %11242 = vmatprep.subr.bf16.mxu1 %v12635_v26 }
 0x2b7   : > { %11223 = vmatpush3.bf16.msra.mxu0 %v11678_v62 }
 0x2b8   : > { %v10959_v6 = vpop.f32.mrf.mxu0  ;;  %v1244_v7 = vpop.f32.mrf.mxu1  ;;  %11224 = vmatprep.subr.bf16.mxu0 %v12635_v26 }
 0x2b9   : > { %v1245_v8 = vadd.f32 %v1244_v7, %v1155_v3  ;;  %11243 = vmatpush3.bf16.msra.mxu1 %v11679_v2 }
 0x2ba   : > { %v10979_v10 = vpop.f32.mrf.mxu1  ;;  %11244 = vmatprep.subr.bf16.mxu1 %v12635_v26 }
 0x2bb   : > { %11225 = vmatpush3.bf16.msra.mxu0 %v11680_v5 }
 0x2bc   : > { %11226 = vmatprep.subr.bf16.mxu0 %v12635_v26 }
 0x2bd   : > { %11245 = vmatpush3.bf16.msra.mxu1 %v11681_v9 }
 0x2be   : > { %11246 = vmatprep.subr.bf16.mxu1 %v12635_v26 }
 0x2bf   : > { %11227 = vmatpush3.bf16.msra.mxu0 %v11682_v11 }
 0x2c0   : > { %11228 = vmatprep.subr.bf16.mxu0 %v12635_v26 }
 0x2c1   : > { %11247 = vmatpush3.bf16.msra.mxu1 %v11683_v12 }
 0x2c2   : > { %11248 = vmatprep.subr.bf16.mxu1 %v12635_v26 }
 0x2c3   : > { %11229 = vmatpush3.bf16.msra.mxu0 %v11684_v13 }
 0x2c4   : > { %11230 = vmatprep.subr.bf16.mxu0 %v12635_v26 }
 0x2c5   : > { %11249 = vmatpush3.bf16.msra.mxu1 %v11685_v14 }
 0x2c6   : > { %11250 = vmatprep.subr.bf16.mxu1 %v12635_v26 }
 0x2c7   : > { %11231 = vmatpush3.bf16.msra.mxu0 %v11686_v15 }
 0x2c8   : > { %11232 = vmatprep.subr.bf16.mxu0 %v12635_v26 }
 0x2c9   : > { %11251 = vmatpush3.bf16.msra.mxu1 %v11687_v16 }
 0x2ca   : > { %11252 = vmatprep.subr.bf16.mxu1 %v12635_v26 }
 0x2cb   : > { %11233 = vmatpush3.bf16.msra.mxu0 %v11688_v17  ;;  %v11703_v17 = vld [vmem:[%s15676_s7 + $0x78] sm:$0xff]  }
 0x2cc   : > { %11234 = vmatprep.subr.bf16.mxu0 %v12635_v26 }
 0x2cd   : > { %11253 = vmatpush3.bf16.msra.mxu1 %v11689_v18  ;;  %v11705_v18 = vld [vmem:[%s15676_s7 + $0x70] sm:$0xff]  }
 0x2ce   : > { %11254 = vmatprep.subr.bf16.mxu1 %v12635_v26 }
 0x2cf   : > { %11235 = vmatpush3.bf16.msra.mxu0 %v11690_v19  ;;  %v11707_v19 = vld [vmem:[%s15676_s7 + $0x68] sm:$0xff]  }
 0x2d0   : > { %11260 = vmatprep.subr.bf16.mxu0 %v12635_v26 }
 0x2d1   : > { %11255 = vmatpush3.bf16.msra.mxu1 %v11691_v20  ;;  %v11709_v20 = vld [vmem:[%s15676_s7 + $0x60] sm:$0xff]  }
 0x2d2   : > { %v1347_v23 = vpop.f32.mrf.mxu0  ;;  %11237 = vmatmul.mubr.bf16.vlgmr.msra.gmra.mxu0 %v1035_v21  ;;  %11298 = vmatprep.subr.bf16.mxu1 %v12635_v26 }
 0x2d3   : > { %v1354_v24 = vadd.f32 %v1347_v23, %v1242_v1  ;;  %11262 = vmatprep.mubr.msk.bf16.mxu0 %vm12637_vm2, %v12635_v26 }
 0x2d4   : > { %v10998_v25 = vpop.f32.mrf.mxu0  ;;  %v1455_v27 = vpop.f32.mrf.mxu1  ;;  %11257 = vmatmul.mubr.bf16.vlgmr.msra.gmra.mxu1 %v1036_v22  ;;  %v11711_v22 = vld [vmem:[%s15676_s7 + $0x58] sm:$0xff]  }
 0x2d5   : > { %v1462_v28 = vadd.f32 %v1455_v27, %v1354_v24  ;;  %11314 = vmatprep.mubr.msk.bf16.mxu1 %vm12637_vm2, %v12635_v26  ;;  %11299 = vmatpush3.bf16.msra.mxu1 %v11703_v17  ;;  %v11718_v17 = vld [vmem:[%s15676_s7 + $0xf8] sm:$0xff]  }
 0x2d6   : > { %v1350_v29 = vpop.f32.mrf.mxu0  ;;  %v11018_v30 = vpop.f32.mrf.mxu1  ;;  %11300 = vmatprep.subr.bf16.mxu1 %v12635_v26 }
 0x2d7   : > { %v1355_v31 = vadd.f32 %v1350_v29, %v1245_v8 }
 0x2d8   : > { %v10999_v32 = vpop.f32.mrf.mxu0  ;;  %v1458_v33 = vpop.f32.mrf.mxu1 }
 0x2d9   : > { %v1463_v34 = vadd.f32 %v1458_v33, %v1355_v31  ;;  %11301 = vmatpush3.bf16.msra.mxu1 %v11705_v18 }
 0x2da   : > { %v11019_v35 = vpop.f32.mrf.mxu1  ;;  %11302 = vmatprep.subr.bf16.mxu1 %v12635_v26 }
 0x2dd   : > { %11303 = vmatpush3.bf16.msra.mxu1 %v11707_v19 }
 0x2de   : > { %11304 = vmatprep.subr.bf16.mxu1 %v12635_v26 }
 0x2e1   : > { %11305 = vmatpush3.bf16.msra.mxu1 %v11709_v20 }
 0x2e2   : > { %11306 = vmatprep.subr.bf16.mxu1 %v12635_v26 }
 0x2e5   : > { %11307 = vmatpush3.bf16.msra.mxu1 %v11711_v22 }
 0x2e6   : > { %11308 = vmatprep.subr.bf16.mxu1 %v12635_v26 }
 0x2f2   : > { %v1563_v36 = vpop.f32.mrf.mxu0 }
 0x2f3   : > { %v1570_v37 = vadd.f32 %v1563_v36, %v1462_v28 }
 0x2f4   : > { %v11038_v38 = vpop.f32.mrf.mxu0  ;;  %v1671_v39 = vpop.f32.mrf.mxu1 }
 0x2f5   : > { %v1678_v40 = vadd.f32 %v1671_v39, %v1570_v37 }
 0x2f6   : > { %v1566_v41 = vpop.f32.mrf.mxu0  ;;  %v11058_v42 = vpop.f32.mrf.mxu1 }
 0x2f7   : > { %v1571_v43 = vadd.f32 %v1566_v41, %v1463_v34 }
 0x2f8   : > { %v11039_v44 = vpop.f32.mrf.mxu0  ;;  %v1674_v45 = vpop.f32.mrf.mxu1 }
 0x2f9   : > { %v1679_v46 = vadd.f32 %v1674_v45, %v1571_v43  ;;  %v9314_v44 = vld [vmem:[%s15674_s5] ss:$0 sm:$0xff] }
 0x2fa   : > { %v11059_v47 = vpop.f32.mrf.mxu1 }
 0x312   : > { %v1779_v48 = vpop.f32.mrf.mxu0 }
 0x313   : > { %v1786_v49 = vadd.f32 %v1779_v48, %v1678_v40 }
 0x314   : > { %v11078_v50 = vpop.f32.mrf.mxu0  ;;  %v1887_v51 = vpop.f32.mrf.mxu1 }
 0x315   : > { %v1894_v52 = vadd.f32 %v1887_v51, %v1786_v49 }
 0x316   : > { %v1782_v53 = vpop.f32.mrf.mxu0  ;;  %v11098_v54 = vpop.f32.mrf.mxu1 }
 0x317   : > { %v1787_v55 = vadd.f32 %v1782_v53, %v1679_v46 }
 0x318   : > { %v11079_v56 = vpop.f32.mrf.mxu0  ;;  %v1890_v57 = vpop.f32.mrf.mxu1 }
 0x319   : > { %v1895_v58 = vadd.f32 %v1890_v57, %v1787_v55  ;;  %v11692_v57 = vld [vmem:[%s15675_s6] sm:$0xff]  }
 0x31a   : > { %v11099_v59 = vpop.f32.mrf.mxu1 }
 0x31b   : > { %v11702_v59 = vld [vmem:[%s15676_s7 + $0x30] sm:$0xff]  }
 0x332   : > { %v1995_v61 = vpop.f32.mrf.mxu0 }
 0x333   : > { %v2002_v62 = vadd.f32 %v1995_v61, %v1894_v52  ;;  %v11693_v61 = vld [vmem:[%s15675_s6 + $0x8] sm:$0xff]  }
 0x334   : > { %v11118_v63 = vpop.f32.mrf.mxu0  ;;  %v2103_v0 = vpop.f32.mrf.mxu1 }
 0x335   : > { %v2110_v1 = vadd.f32 %v2103_v0, %v2002_v62  ;;  %v11704_v62 = vld [vmem:[%s15676_s7 + $0x28] sm:$0xff]   ;;  %v11706_v63 = vld [vmem:[%s15676_s7 + $0x20] sm:$0xff]   ;;  %v11694_v0 = vld [vmem:[%s15675_s6 + $0x10] sm:$0xff]  }
 0x336   : > { %v1998_v2 = vpop.f32.mrf.mxu0  ;;  %v11138_v3 = vpop.f32.mrf.mxu1 }
 0x337   : > { %v2003_v4 = vadd.f32 %v1998_v2, %v1895_v58  ;;  %v11701_v58 = vld [vmem:[%s15676_s7 + $0x38] sm:$0xff]   ;;  %v11710_v2 = vld [vmem:[%s15676_s7 + $0x10] sm:$0xff]  }
 0x338   : > { %v11119_v5 = vpop.f32.mrf.mxu0  ;;  %v2106_v6 = vpop.f32.mrf.mxu1  ;;  %v11695_v3 = vld [vmem:[%s15675_s6 + $0x18] sm:$0xff]  }
 0x339   : > { %v2111_v7 = vadd.f32 %v2106_v6, %v2003_v4  ;;  %v11696_v4 = vld [vmem:[%s15675_s6 + $0x20] sm:$0xff]   ;;  %v11697_v5 = vld [vmem:[%s15675_s6 + $0x28] sm:$0xff]   ;;  %v11698_v6 = vld [vmem:[%s15675_s6 + $0x30] sm:$0xff]  }
 0x33a   : > { %v11139_v8 = vpop.f32.mrf.mxu1 }
 0x33b   : > { %v11700_v8 = vld [vmem:[%s15675_s6 + $0x40] sm:$0xff]  }
 0x352   : > { %v2211_v9 = vpop.f32.mrf.mxu0 }
 0x353   : > { %v2218_v31 = vadd.f32 %v2211_v9, %v2110_v1  ;;  %v11708_v1 = vld [vmem:[%s15676_s7 + $0x18] sm:$0xff]   ;;  %v11712_v9 = vld [vmem:[%s15676_s7 + $0x8] sm:$0xff]  }
 0x354   : > { %v11158_v10 = vpop.f32.mrf.mxu0  ;;  %v2319_v11 = vpop.f32.mrf.mxu1 }
 0x355   : > { %v2326_v32 = vadd.f32 %v2319_v11, %v2218_v31  ;;  %v11713_v10 = vld [vmem:[%s15676_s7 + $0x50] sm:$0xff]   ;;  %v11714_v11 = vld [vmem:[%s15676_s7] sm:$0xff]  }
 0x356   : > { %v2214_v12 = vpop.f32.mrf.mxu0  ;;  %v11178_v13 = vpop.f32.mrf.mxu1  ;;  %11309 = vmatpush3.bf16.msra.mxu1 %v11713_v10 }
 0x357   : > { %v2219_v33 = vadd.f32 %v2214_v12, %v2111_v7  ;;  %v11699_v7 = vld [vmem:[%s15675_s6 + $0x38] sm:$0xff]   ;;  %11310 = vmatprep.subr.bf16.mxu1 %v12635_v26  ;;  %v11715_v12 = vld [vmem:[%s15676_s7 + $0x48] sm:$0xff]   ;;  %v11716_v13 = vld [vmem:[%s15676_s7 + $0x40] sm:$0xff]  }
 0x358   : > { %v11159_v14 = vpop.f32.mrf.mxu0  ;;  %v2322_v15 = vpop.f32.mrf.mxu1 }
 0x359   : > { %v2327_v35 = vadd.f32 %v2322_v15, %v2219_v33  ;;  %v11721_v33 = vld [vmem:[%s15676_s7 + $0xa8] sm:$0xff]  }
 0x35a   : > { %v11179_v16 = vpop.f32.mrf.mxu1  ;;  %11311 = vmatpush3.bf16.msra.mxu1 %v11715_v12  ;;  %v11741_v12 = vld [vmem:[%s15676_s7 + $0x118] sm:$0xff]  }
 0x35b   : > { %11312 = vmatprep.subr.bf16.mxu1 %v12635_v26 }
 0x35e   : > { %11313 = vmatpush3.bf16.msra.mxu1 %v11716_v13  ;;  %v11746_v13 = vld [vmem:[%s15676_s7 + $0x148] sm:$0xff]  }
 0x35f   : > { %11338 = vmatprep.subr.bf16.mxu1 %v12635_v26 }
 0x372   : > { %v2427_v21 = vpop.f32.mrf.mxu0 }
 0x373   : > { %v2434_v34 = vadd.f32 %v2427_v21, %v2326_v32  ;;  %v11720_v21 = vld [vmem:[%s15676_s7 + $0xf0] sm:$0xff]  }
 0x374   : > { %v11198_v23 = vpop.f32.mrf.mxu0  ;;  %v2535_v24 = vpop.f32.mrf.mxu1 }
 0x375   : > { %v2542_v36 = vadd.f32 %v2535_v24, %v2434_v34  ;;  %v11717_v24 = vld [vmem:[%s15676_s7 + $0xb8] sm:$0xff]  }
 0x376   : > { %v2430_v25 = vpop.f32.mrf.mxu0  ;;  %v11218_v27 = vpop.f32.mrf.mxu1  ;;  %v11726_v34 = vld [vmem:[%s15676_s7 + $0xd8] sm:$0xff]  }
 0x377   : > { %v2435_v37 = vadd.f32 %v2430_v25, %v2327_v35  ;;  %v11722_v25 = vld [vmem:[%s15676_s7 + $0xe8] sm:$0xff]  }
 0x378   : > { %v11199_v28 = vpop.f32.mrf.mxu0  ;;  %v2538_v29 = vpop.f32.mrf.mxu1 }
 0x379   : > { %v2543_v42 = vadd.f32 %v2538_v29, %v2435_v37  ;;  %v11719_v29 = vld [vmem:[%s15676_s7 + $0xb0] sm:$0xff]   ;;  %v11723_v37 = vld [vmem:[%s15676_s7 + $0xa0] sm:$0xff]  }
 0x37a   : > { %v11219_v30 = vpop.f32.mrf.mxu1 }
 0x37b   : > { %v11724_v30 = vld [vmem:[%s15676_s7 + $0xe0] sm:$0xff]  }
 0x392   : > { %v2643_v38 = vpop.f32.mrf.mxu0 }
 0x393   : > { %v2650_v39 = vadd.f32 %v2643_v38, %v2542_v36  ;;  %v11728_v38 = vld [vmem:[%s15676_s7 + $0xd0] sm:$0xff]  }
 0x394   : > { %v11238_v40 = vpop.f32.mrf.mxu0  ;;  %v2751_v41 = vpop.f32.mrf.mxu1 }
 0x395   : > { %v2758_v43 = vadd.f32 %v2751_v41, %v2650_v39  ;;  %v11725_v41 = vld [vmem:[%s15676_s7 + $0x98] sm:$0xff]  }
 0x396   : > { %v2646_v45 = vpop.f32.mrf.mxu0  ;;  %v11258_v46 = vpop.f32.mrf.mxu1 }
 0x397   : > { %v2651_v47 = vadd.f32 %v2646_v45, %v2543_v42  ;;  %v2767_v50 = vadd.f32 %v9314_v44, %v2758_v43  ;;  %v11730_v42 = vld [vmem:[%s15676_s7 + $0xc8] sm:$0xff]   ;;  %v11727_v45 = vld [vmem:[%s15676_s7 + $0x90] sm:$0xff]   ;;  %v11732_v46 = vld [vmem:[%s15676_s7 + $0xc0] sm:$0xff]  }
 0x398   : > { %v11239_v48 = vpop.f32.mrf.mxu0  ;;  %v2754_v49 = vpop.f32.mrf.mxu1 }
 0x399   : > { %v2759_v51 = vadd.f32 %v2754_v49, %v2651_v47  ;;  %v2769_v54 = vmax.f32 %v2767_v50, 0.0  ;;  %v11729_v50 = vld [vmem:[%s15676_s7 + $0x88] sm:$0xff]  }
 0x39a   : > { %v11259_v52 = vpop.f32.mrf.mxu1 }
 0x39b   : > { %v2768_v53 = vadd.f32 %v9314_v44, %v2759_v51  ;;  %v11734_v51 = vld [vmem:[%s15676_s7 + $0x178] sm:$0xff]  }
 0x39d   : > { %v2770_v55 = vmax.f32 %v2768_v53, 0.0 }
 0x39f   : > { %v2771_v56 = vpack.c.bf16 %v2770_v55, %v2769_v54  ;;  %v11731_v54 = vld [vmem:[%s15676_s7 + $0x80] sm:$0xff]   ;;  %v11736_v55 = vld [vmem:[%s15676_s7 + $0x170] sm:$0xff]  }
 0x3a1   : > { %11261 = vmatpush3.bf16.msra.mxu0 %v2771_v56 }
 0x3a2   : > { %11318 = vmatprep.subr.bf16.mxu0 %v12635_v26 }
 0x3a4   : > { %11263 = vmatmul.mubr.msk.bf16.vlgmr.msra.gmra.mxu0 %vm2835_vm3, %v11692_v57 }
 0x3a5   : > { %11266 = vmatprep.mubr.msk.bf16.mxu0 %vm12637_vm2, %v12635_v26  ;;  %11319 = vmatpush3.bf16.msra.mxu0 %v11701_v58  ;;  %v11733_v58 = vld [vmem:[%s15676_s7 + $0x138] sm:$0xff]  }
 0x3a6   : > { %11320 = vmatprep.subr.bf16.mxu0 %v12635_v26 }
 0x3a9   : > { %11321 = vmatpush3.bf16.msra.mxu0 %v11702_v59  ;;  %v11738_v59 = vld [vmem:[%s15676_s7 + $0x168] sm:$0xff]  }
 0x3aa   : > { %11322 = vmatprep.subr.bf16.mxu0 %v12635_v26 }
 0x3ac   : > { %11267 = vmatmul.mubr.msk.bf16.gmra.mxu0 %vm2835_vm3, %v11693_v61 }
 0x3ad   : > { %11270 = vmatprep.mubr.msk.bf16.mxu0 %vm12637_vm2, %v12635_v26  ;;  %11323 = vmatpush3.bf16.msra.mxu0 %v11704_v62 }
 0x3ae   : > { %11324 = vmatprep.subr.bf16.mxu0 %v12635_v26 }
 0x3b1   : > { %11325 = vmatpush3.bf16.msra.mxu0 %v11706_v63 }
 0x3b2   : > { %11326 = vmatprep.subr.bf16.mxu0 %v12635_v26 }
 0x3b4   : > { %11271 = vmatmul.mubr.msk.bf16.gmra.mxu0 %vm2835_vm3, %v11694_v0  ;;  %v11735_v0 = vld [vmem:[%s15676_s7 + $0x130] sm:$0xff]  }
 0x3b5   : > { %11274 = vmatprep.mubr.msk.bf16.mxu0 %vm12637_vm2, %v12635_v26  ;;  %11327 = vmatpush3.bf16.msra.mxu0 %v11708_v1  ;;  %v11740_v1 = vld [vmem:[%s15676_s7 + $0x160] sm:$0xff]  }
 0x3b6   : > { %11328 = vmatprep.subr.bf16.mxu0 %v12635_v26 }
 0x3b9   : > { %11329 = vmatpush3.bf16.msra.mxu0 %v11710_v2 }
 0x3ba   : > { %11330 = vmatprep.subr.bf16.mxu0 %v12635_v26 }
 0x3bc   : > { %11275 = vmatmul.mubr.msk.bf16.gmra.mxu0 %vm2835_vm3, %v11695_v3 }
 0x3bd   : > { %11278 = vmatprep.mubr.msk.bf16.mxu0 %vm12637_vm2, %v12635_v26  ;;  %11331 = vmatpush3.bf16.msra.mxu0 %v11712_v9  ;;  %v11744_v9 = vld [vmem:[%s15676_s7 + $0x150] sm:$0xff]  }
 0x3be   : > { %11332 = vmatprep.subr.bf16.mxu0 %v12635_v26 }
 0x3c1   : > { %11333 = vmatpush3.bf16.msra.mxu0 %v11714_v11 }
 0x3c2   : > { %11358 = vmatprep.subr.bf16.mxu0 %v12635_v26 }
 0x3c4   : > { %11279 = vmatmul.mubr.msk.bf16.gmra.mxu0 %vm2835_vm3, %v11696_v4  ;;  %v11737_v4 = vld [vmem:[%s15676_s7 + $0x128] sm:$0xff]  }
 0x3c5   : > { %11282 = vmatprep.mubr.msk.bf16.mxu0 %vm12637_vm2, %v12635_v26 }
 0x3cc   : > { %11283 = vmatmul.mubr.msk.bf16.gmra.mxu0 %vm2835_vm3, %v11697_v5  ;;  %v11742_v5 = vld [vmem:[%s15676_s7 + $0x158] sm:$0xff]  }
 0x3cd   : > { %11286 = vmatprep.mubr.msk.bf16.mxu0 %vm12637_vm2, %v12635_v26 }
 0x3d4   : > { %11287 = vmatmul.mubr.msk.bf16.gmra.mxu0 %vm2835_vm3, %v11698_v6 }
 0x3d5   : > { %11290 = vmatprep.mubr.msk.bf16.mxu0 %vm12637_vm2, %v12635_v26 }
 0x3dc   : > { %11291 = vmatmul.mubr.msk.bf16.gmra.mxu0 %vm2835_vm3, %v11699_v7 }
 0x3dd   : > { %11294 = vmatprep.mubr.msk.bf16.mxu0 %vm12637_vm2, %v12635_v26 }
 0x3e4   : > { %11295 = vmatmul.mubr.msk.bf16.gmra.mxu0 %vm2835_vm3, %v11700_v8  ;;  %v11739_v8 = vld [vmem:[%s15676_s7 + $0x120] sm:$0xff]  }
 0x3e5   : > { %11334 = vmatprep.mubr.msk.bf16.mxu0 %vm12637_vm2, %v12635_v26 }
 0x464   : > { %v2897_v14 = vpop.f32.mrf.mxu0 }
 0x466   : > { %v11264_v15 = vpop.f32.mrf.mxu0 }
 0x468   : > { %v2900_v16 = vpop.f32.mrf.mxu0 }
 0x469   : > { %v2968_v18 = vpack.c.bf16 %v2900_v16, %v2897_v14  ;;  %v11743_v16 = vld [vmem:[%s15676_s7 + $0x110] sm:$0xff]  }
 0x46a   : > { %v11265_v19 = vpop.f32.mrf.mxu0 }
 0x46b   : > { %11335 = vmatmul.mubr.bf16.vlgmr.msra.gmra.mxu0 %v2968_v18 }
 0x46c   : > { %v2905_v20 = vpop.f32.mrf.mxu0  ;;  %11359 = vmatpush3.bf16.msra.mxu0 %v11718_v17  ;;  %11374 = vmatprep.mubr.msk.bf16.mxu0 %vm12637_vm2, %v12635_v26  ;;  %v11748_v17 = vld [vmem:[%s15676_s7 + $0x140] sm:$0xff]  }
 0x46d   : > { %11360 = vmatprep.subr.bf16.mxu0 %v12635_v26 }
 0x46e   : > { %v11268_v22 = vpop.f32.mrf.mxu0 }
 0x46f   : > { %v11750_v22 = vld [vmem:[%s15676_s7 + $0x1f8] sm:$0xff]  }
 0x470   : > { %v2908_v23 = vpop.f32.mrf.mxu0  ;;  %11361 = vmatpush3.bf16.msra.mxu0 %v11720_v21  ;;  %v11745_v21 = vld [vmem:[%s15676_s7 + $0x108] sm:$0xff]  }
 0x471   : > { %v2969_v27 = vpack.c.bf16 %v2908_v23, %v2905_v20  ;;  %11362 = vmatprep.subr.bf16.mxu0 %v12635_v26 }
 0x472   : > { %v11269_v28 = vpop.f32.mrf.mxu0 }
 0x473   : > { %11315 = vmatmul.mubr.bf16.vlgmr.msra.gmra.mxu1 %v2969_v27  ;;  %v11747_v27 = vld [vmem:[%s15676_s7 + $0x100] sm:$0xff]   ;;  %v11752_v28 = vld [vmem:[%s15676_s7 + $0x1f0] sm:$0xff]  }
 0x474   : > { %11339 = vmatpush3.bf16.msra.mxu1 %v11717_v24  ;;  %11363 = vmatpush3.bf16.msra.mxu0 %v11722_v25  ;;  %v13584_v31 = vpop.f32.mrf.mxu0 }
 0x475   : > { %11340 = vmatprep.subr.bf16.mxu1 %v12635_v26  ;;  %11364 = vmatprep.subr.bf16.mxu0 %v12635_v26 }
 0x476   : > { %v11272_v32 = vpop.f32.mrf.mxu0  ;;  %11354 = vmatprep.mubr.msk.bf16.mxu1 %vm12637_vm2, %v12635_v26 }
 0x477   : > { %v11751_v32 = vld [vmem:[%s15676_s7 + $0x1b0] sm:$0xff]  }
 0x478   : > { %11341 = vmatpush3.bf16.msra.mxu1 %v11719_v29  ;;  %11365 = vmatpush3.bf16.msra.mxu0 %v11724_v30  ;;  %v2916_v35 = vpop.f32.mrf.mxu0  ;;  %v11749_v29 = vld [vmem:[%s15676_s7 + $0x1b8] sm:$0xff]   ;;  %v11754_v30 = vld [vmem:[%s15676_s7 + $0x1e8] sm:$0xff]  }
 0x479   : > { %11342 = vmatprep.subr.bf16.mxu1 %v12635_v26  ;;  %11366 = vmatprep.subr.bf16.mxu0 %v12635_v26  ;;  %v2970_v62 = vpack.c.bf16 %v2916_v35, %v13584_v31  ;;  %v11758_v35 = vld [vmem:[%s15676_s7 + $0x1d8] sm:$0xff]  }
 0x47a   : > { %v11273_v36 = vpop.f32.mrf.mxu0 }
 0x47b   : > { %v11755_v36 = vld [vmem:[%s15676_s7 + $0x1a0] sm:$0xff]  }
 0x47c   : > { %11343 = vmatpush3.bf16.msra.mxu1 %v11721_v33  ;;  %11367 = vmatpush3.bf16.msra.mxu0 %v11726_v34  ;;  %v2921_v39 = vpop.f32.mrf.mxu0  ;;  %v11756_v33 = vld [vmem:[%s15676_s7 + $0x1e0] sm:$0xff]   ;;  %v11753_v34 = vld [vmem:[%s15676_s7 + $0x1a8] sm:$0xff]  }
 0x47d   : > { %11344 = vmatprep.subr.bf16.mxu1 %v12635_v26  ;;  %11368 = vmatprep.subr.bf16.mxu0 %v12635_v26 }
 0x47e   : > { %v11276_v40 = vpop.f32.mrf.mxu0 }
 0x47f   : > { %v11759_v40 = vld [vmem:[%s15676_s7 + $0x190] sm:$0xff]  }
 0x480   : > { %11345 = vmatpush3.bf16.msra.mxu1 %v11723_v37  ;;  %11369 = vmatpush3.bf16.msra.mxu0 %v11728_v38  ;;  %v2924_v43 = vpop.f32.mrf.mxu0  ;;  %v11760_v37 = vld [vmem:[%s15676_s7 + $0x1d0] sm:$0xff]   ;;  %v11757_v38 = vld [vmem:[%s15676_s7 + $0x198] sm:$0xff]  }
 0x481   : > { %11346 = vmatprep.subr.bf16.mxu1 %v12635_v26  ;;  %11370 = vmatprep.subr.bf16.mxu0 %v12635_v26  ;;  %v2971_v49 = vpack.c.bf16 %v2924_v43, %v2921_v39  ;;  %v11762_v39 = vld [vmem:[%s15676_s7 + $0x1c8] sm:$0xff]  }
 0x482   : > { %v11277_v44 = vpop.f32.mrf.mxu0  ;;  %v11761_v43 = vld [vmem:[%s15676_s7 + $0x188] sm:$0xff]  }
 0x483   : > { %v11763_v44 = vld [vmem:[%s15676_s7 + $0x180] sm:$0xff]  }
 0x484   : > { %11347 = vmatpush3.bf16.msra.mxu1 %v11725_v41  ;;  %11371 = vmatpush3.bf16.msra.mxu0 %v11730_v42  ;;  %v13620_v47 = vpop.f32.mrf.mxu0  ;;  %v11764_v41 = vld [vmem:[%s15676_s7 + $0x1c0] sm:$0xff]  }
 0x485   : > { %11348 = vmatprep.subr.bf16.mxu1 %v12635_v26  ;;  %11372 = vmatprep.subr.bf16.mxu0 %v12635_v26 }
 0x486   : > { %v11280_v48 = vpop.f32.mrf.mxu0 }
 0x487   : > { %v11767_v48 = vld [vmem:[%s15676_s7 + $0x228] sm:$0xff]  }
 0x488   : > { %11349 = vmatpush3.bf16.msra.mxu1 %v11727_v45  ;;  %11373 = vmatpush3.bf16.msra.mxu0 %v11732_v46  ;;  %v13630_v52 = vpop.f32.mrf.mxu0  ;;  %v11765_v45 = vld [vmem:[%s15676_s7 + $0x238] sm:$0xff]  }
 0x489   : > { %11350 = vmatprep.subr.bf16.mxu1 %v12635_v26  ;;  %11398 = vmatprep.subr.bf16.mxu0 %v12635_v26  ;;  %v2972_v31 = vpack.c.bf16 %v13630_v52, %v13620_v47  ;;  %v11766_v47 = vld [vmem:[%s15676_s7 + $0x230] sm:$0xff]   ;;  %v11771_v52 = vld [vmem:[%s15676_s7 + $0x208] sm:$0xff]  }
 0x48a   : > { %v11281_v53 = vpop.f32.mrf.mxu0 }
 0x48b   : > { %11375 = vmatmul.mubr.bf16.vlgmr.msra.gmra.mxu0 %v2971_v49  ;;  %v11768_v49 = vld [vmem:[%s15676_s7 + $0x220] sm:$0xff]  }
 0x48c   : > { %11351 = vmatpush3.bf16.msra.mxu1 %v11729_v50  ;;  %11399 = vmatpush3.bf16.msra.mxu0 %v11734_v51  ;;  %v13640_v56 = vpop.f32.mrf.mxu0  ;;  %v11769_v50 = vld [vmem:[%s15676_s7 + $0x218] sm:$0xff]   ;;  %v11770_v51 = vld [vmem:[%s15676_s7 + $0x210] sm:$0xff]   ;;  %v11772_v53 = vld [vmem:[%s15676_s7 + $0x200] sm:$0xff]  }
 0x48d   : > { %11352 = vmatprep.subr.bf16.mxu1 %v12635_v26  ;;  %11400 = vmatprep.subr.bf16.mxu0 %v12635_v26 }
 0x48e   : > { %v11284_v57 = vpop.f32.mrf.mxu0  ;;  %11414 = vmatprep.mubr.msk.bf16.mxu0 %vm12637_vm2, %v12635_v26 }
 0x48f   : > { %v11781_v57 = vld [vmem:[%s15678_s9 + $0x1c4] ss:$16 sps:$4 sm:$0xff]  }
 0x490   : > { %11353 = vmatpush3.bf16.msra.mxu1 %v11731_v54  ;;  %11401 = vmatpush3.bf16.msra.mxu0 %v11736_v55  ;;  %v2940_v61 = vpop.f32.mrf.mxu0  ;;  %v11773_v54 = vld [vmem:[%s15678_s9 + $0x1e0] ss:$16 sps:$4 sm:$0xff]   ;;  %v11775_v55 = vld [vmem:[%s15678_s9 + $0x1e4] ss:$16 sps:$4 sm:$0xff]  }
 0x491   : > { %11378 = vmatprep.subr.bf16.mxu1 %v12635_v26  ;;  %11402 = vmatprep.subr.bf16.mxu0 %v12635_v26  ;;  %v2973_v20 = vpack.c.bf16 %v2940_v61, %v13640_v56  ;;  %v11776_v56 = vld [vmem:[%s15678_s9 + $0x1e8] ss:$16 sps:$4 sm:$0xff]  }
 0x492   : > { %v11285_v63 = vpop.f32.mrf.mxu0  ;;  %v11782_v61 = vld [vmem:[%s15678_s9 + $0x1c8] ss:$16 sps:$4 sm:$0xff]  }
 0x493   : > { %11355 = vmatmul.mubr.bf16.vlgmr.msra.gmra.mxu1 %v2970_v62  ;;  %v11787_v62 = vld [vmem:[%s15678_s9 + $0x1a4] ss:$16 sps:$4 sm:$0xff]   ;;  %v11790_v63 = vld [vmem:[%s15678_s9 + $0x1ac] ss:$16 sps:$4 sm:$0xff]  }
 0x494   : > { %11379 = vmatpush3.bf16.msra.mxu1 %v11733_v58  ;;  %11403 = vmatpush3.bf16.msra.mxu0 %v11738_v59  ;;  %v13661_v2 = vpop.f32.mrf.mxu0  ;;  %v11784_v58 = vld [vmem:[%s15678_s9 + $0x1cc] ss:$16 sps:$4 sm:$0xff]   ;;  %v11779_v59 = vld [vmem:[%s15678_s9 + $0x1c0] ss:$16 sps:$4 sm:$0xff]  }
 0x495   : > { %11380 = vmatprep.subr.bf16.mxu1 %v12635_v26  ;;  %11404 = vmatprep.subr.bf16.mxu0 %v12635_v26 }
 0x496   : > { %11394 = vmatprep.mubr.msk.bf16.mxu1 %vm12637_vm2, %v12635_v26  ;;  %v11288_v3 = vpop.f32.mrf.mxu0 }
 0x497   : > { %v11796_v3 = vld [vmem:[%s15678_s9 + $0x18c] ss:$16 sps:$4 sm:$0xff]  }
 0x498   : > { %11381 = vmatpush3.bf16.msra.mxu1 %v11735_v0  ;;  %11405 = vmatpush3.bf16.msra.mxu0 %v11740_v1  ;;  %v13673_v6 = vpop.f32.mrf.mxu0  ;;  %v11785_v0 = vld [vmem:[%s15678_s9 + $0x1a0] ss:$16 sps:$4 sm:$0xff]   ;;  %v11788_v1 = vld [vmem:[%s15678_s9 + $0x1a8] ss:$16 sps:$4 sm:$0xff]  }
 0x499   : > { %11382 = vmatprep.subr.bf16.mxu1 %v12635_v26  ;;  %11406 = vmatprep.subr.bf16.mxu0 %v12635_v26  ;;  %v2974_v46 = vpack.c.bf16 %v13673_v6, %v13661_v2  ;;  %v11793_v2 = vld [vmem:[%s15678_s9 + $0x184] ss:$16 sps:$4 sm:$0xff]  }
 0x49a   : > { %v11289_v7 = vpop.f32.mrf.mxu0  ;;  %v11799_v6 = vld [vmem:[%s15678_s9 + $0x164] ss:$16 sps:$4 sm:$0xff]  }
 0x49b   : > { %v11802_v7 = vld [vmem:[%s15678_s9 + $0x16c] ss:$16 sps:$4 sm:$0xff]  }
 0x49c   : > { %11383 = vmatpush3.bf16.msra.mxu1 %v11737_v4  ;;  %11407 = vmatpush3.bf16.msra.mxu0 %v11742_v5  ;;  %v13683_v10 = vpop.f32.mrf.mxu0  ;;  %v11791_v4 = vld [vmem:[%s15678_s9 + $0x180] ss:$16 sps:$4 sm:$0xff]   ;;  %v11794_v5 = vld [vmem:[%s15678_s9 + $0x188] ss:$16 sps:$4 sm:$0xff]  }
 0x49d   : > { %11384 = vmatprep.subr.bf16.mxu1 %v12635_v26  ;;  %11408 = vmatprep.subr.bf16.mxu0 %v12635_v26 }
 0x49e   : > { %v11292_v11 = vpop.f32.mrf.mxu0 }
 0x4a0   : > { %11385 = vmatpush3.bf16.msra.mxu1 %v11739_v8  ;;  %11409 = vmatpush3.bf16.msra.mxu0 %v11744_v9  ;;  %v13693_v14 = vpop.f32.mrf.mxu0  ;;  %v11797_v8 = vld [vmem:[%s15678_s9 + $0x160] ss:$16 sps:$4 sm:$0xff]   ;;  %v11800_v9 = vld [vmem:[%s15678_s9 + $0x168] ss:$16 sps:$4 sm:$0xff]  }
 0x4a1   : > { %11386 = vmatprep.subr.bf16.mxu1 %v12635_v26  ;;  %11410 = vmatprep.subr.bf16.mxu0 %v12635_v26  ;;  %v2975_v42 = vpack.c.bf16 %v13693_v14, %v13683_v10 }
 0x4a2   : > { %v11293_v15 = vpop.f32.mrf.mxu0 }
 0x4a3   : > { %v11805_v15 = vld [vmem:[%s15678_s9 + $0x144] ss:$16 sps:$4 sm:$0xff]  }
 0x4a4   : > { %11387 = vmatpush3.bf16.msra.mxu1 %v11741_v12  ;;  %11411 = vmatpush3.bf16.msra.mxu0 %v11746_v13  ;;  %v13703_v18 = vpop.f32.mrf.mxu0 }
 0x4a5   : > { %11388 = vmatprep.subr.bf16.mxu1 %v12635_v26  ;;  %11412 = vmatprep.subr.bf16.mxu0 %v12635_v26 }
 0x4a6   : > { %v11296_v19 = vpop.f32.mrf.mxu0 }
 0x4a7   : > { %v11806_v19 = vld [vmem:[%s15678_s9 + $0x148] ss:$16 sps:$4 sm:$0xff]  }
 0x4a8   : > { %11389 = vmatpush3.bf16.msra.mxu1 %v11743_v16  ;;  %11413 = vmatpush3.bf16.msra.mxu0 %v11748_v17  ;;  %v13714_v23 = vpop.f32.mrf.mxu0  ;;  %v11808_v16 = vld [vmem:[%s15678_s9 + $0x14c] ss:$16 sps:$4 sm:$0xff]  }
 0x4a9   : > { %11390 = vmatprep.subr.bf16.mxu1 %v12635_v26  ;;  %11438 = vmatprep.subr.bf16.mxu0 %v12635_v26  ;;  %v2976_v24 = vpack.c.bf16 %v13714_v23, %v13703_v18  ;;  %v11803_v18 = vld [vmem:[%s15678_s9 + $0x140] ss:$16 sps:$4 sm:$0xff]   ;;  %v11814_v23 = vld [vmem:[%s15678_s9 + $0x12c] ss:$16 sps:$4 sm:$0xff]  }
 0x4aa   : > { %v11297_v25 = vpop.f32.mrf.mxu0 }
 0x4ab   : > { %11415 = vmatmul.mubr.bf16.vlgmr.msra.gmra.mxu0 %v2973_v20  ;;  %v11809_v25 = vld [vmem:[%s15678_s9 + $0x120] ss:$16 sps:$4 sm:$0xff]  }
 0x4ac   : > { %11391 = vmatpush3.bf16.msra.mxu1 %v11745_v21  ;;  %11439 = vmatpush3.bf16.msra.mxu0 %v11750_v22  ;;  %v11811_v22 = vld [vmem:[%s15678_s9 + $0x124] ss:$16 sps:$4 sm:$0xff]  }
 0x4ad   : > { %11392 = vmatprep.subr.bf16.mxu1 %v12635_v26  ;;  %11440 = vmatprep.subr.bf16.mxu0 %v12635_v26 }
 0x4ae   : > { %11454 = vmatprep.mubr.msk.bf16.mxu0 %vm12637_vm2, %v12635_v26 }
 0x4b0   : > { %11393 = vmatpush3.bf16.msra.mxu1 %v11747_v27  ;;  %11441 = vmatpush3.bf16.msra.mxu0 %v11752_v28  ;;  %v11812_v27 = vld [vmem:[%s15678_s9 + $0x128] ss:$16 sps:$4 sm:$0xff]  }
 0x4b1   : > { %11418 = vmatprep.subr.bf16.mxu1 %v12635_v26  ;;  %11442 = vmatprep.subr.bf16.mxu0 %v12635_v26 }
 0x4b3   : > { %11395 = vmatmul.mubr.bf16.vlgmr.msra.gmra.mxu1 %v2972_v31  ;;  %v11815_v31 = vld [vmem:[%s15678_s9 + $0x100] ss:$16 sps:$4 sm:$0xff]  }
 0x4b4   : > { %11419 = vmatpush3.bf16.msra.mxu1 %v11749_v29  ;;  %11443 = vmatpush3.bf16.msra.mxu0 %v11754_v30  ;;  %v11817_v29 = vld [vmem:[%s15678_s9 + $0x104] ss:$16 sps:$4 sm:$0xff]   ;;  %v11820_v30 = vld [vmem:[%s15678_s9 + $0x10c] ss:$16 sps:$4 sm:$0xff]  }
 0x4b5   : > { %11420 = vmatprep.subr.bf16.mxu1 %v12635_v26  ;;  %11444 = vmatprep.subr.bf16.mxu0 %v12635_v26 }
 0x4b6   : > { %11434 = vmatprep.mubr.msk.bf16.mxu1 %vm12637_vm2, %v12635_v26 }
 0x4b8   : > { %11421 = vmatpush3.bf16.msra.mxu1 %v11751_v32  ;;  %11445 = vmatpush3.bf16.msra.mxu0 %v11756_v33  ;;  %v11818_v32 = vld [vmem:[%s15678_s9 + $0x108] ss:$16 sps:$4 sm:$0xff]   ;;  %v11823_v33 = vld [vmem:[%s15678_s9 + $0xe4] ss:$16 sps:$4 sm:$0xff]  }
 0x4b9   : > { %11422 = vmatprep.subr.bf16.mxu1 %v12635_v26  ;;  %11446 = vmatprep.subr.bf16.mxu0 %v12635_v26 }
 0x4bc   : > { %11423 = vmatpush3.bf16.msra.mxu1 %v11753_v34  ;;  %11447 = vmatpush3.bf16.msra.mxu0 %v11758_v35  ;;  %v11826_v34 = vld [vmem:[%s15678_s9 + $0xec] ss:$16 sps:$4 sm:$0xff]  }
 0x4bd   : > { %11424 = vmatprep.subr.bf16.mxu1 %v12635_v26  ;;  %11448 = vmatprep.subr.bf16.mxu0 %v12635_v26 }
 0x4c0   : > { %11425 = vmatpush3.bf16.msra.mxu1 %v11755_v36  ;;  %11449 = vmatpush3.bf16.msra.mxu0 %v11760_v37 }
 0x4c1   : > { %11426 = vmatprep.subr.bf16.mxu1 %v12635_v26  ;;  %11450 = vmatprep.subr.bf16.mxu0 %v12635_v26 }
 0x4c4   : > { %11427 = vmatpush3.bf16.msra.mxu1 %v11757_v38  ;;  %11451 = vmatpush3.bf16.msra.mxu0 %v11762_v39 }
 0x4c5   : > { %11428 = vmatprep.subr.bf16.mxu1 %v12635_v26  ;;  %11452 = vmatprep.subr.bf16.mxu0 %v12635_v26 }
 0x4c8   : > { %11429 = vmatpush3.bf16.msra.mxu1 %v11759_v40  ;;  %11453 = vmatpush3.bf16.msra.mxu0 %v11764_v41 }
 0x4c9   : > { %11430 = vmatprep.subr.bf16.mxu1 %v12635_v26  ;;  %4185 = vmatprep.subr.bf16.mxu0 %v11775_v55 }
 0x4cb   : > { %11455 = vmatmul.mubr.bf16.vlgmr.msra.gmra.mxu0 %v2975_v42 }
 0x4cc   : > { %11431 = vmatpush3.bf16.msra.mxu1 %v11761_v43  ;;  %4217 = vmatprep.mubr.bf16.mxu0 %v12636_v60 }
 0x4cd   : > { %11432 = vmatprep.subr.bf16.mxu1 %v12635_v26  ;;  %4186 = vmatpush1.bf16.msra.mxu0 %v11773_v54 }
 0x4ce   : > { %4187 = vmatprep.subr.bf16.mxu0 %v11781_v57 }
 0x4d0   : > { %11433 = vmatpush3.bf16.msra.mxu1 %v11763_v44 }
 0x4d1   : > { %11458 = vmatprep.subr.bf16.mxu1 %v12635_v26  ;;  %4188 = vmatpush1.bf16.msra.mxu0 %v11779_v59 }
 0x4d2   : > { %4189 = vmatprep.subr.bf16.mxu0 %v11787_v62 }
 0x4d3   : > { %11435 = vmatmul.mubr.bf16.vlgmr.msra.gmra.mxu1 %v2974_v46 }
 0x4d4   : > { %11459 = vmatpush3.bf16.msra.mxu1 %v11765_v45  ;;  %11474 = vmatprep.mubr.msk.bf16.mxu1 %vm12637_vm2, %v12635_v26 }
 0x4d5   : > { %11460 = vmatprep.subr.bf16.mxu1 %v12635_v26  ;;  %4190 = vmatpush1.bf16.msra.mxu0 %v11785_v0 }
 0x4d6   : > { %4191 = vmatprep.subr.bf16.mxu0 %v11793_v2 }
 0x4d8   : > { %11461 = vmatpush3.bf16.msra.mxu1 %v11766_v47 }
 0x4d9   : > { %11462 = vmatprep.subr.bf16.mxu1 %v12635_v26  ;;  %4192 = vmatpush1.bf16.msra.mxu0 %v11791_v4 }
 0x4da   : > { %4193 = vmatprep.subr.bf16.mxu0 %v11799_v6 }
 0x4dc   : > { %11463 = vmatpush3.bf16.msra.mxu1 %v11767_v48 }
 0x4dd   : > { %11464 = vmatprep.subr.bf16.mxu1 %v12635_v26  ;;  %4194 = vmatpush1.bf16.msra.mxu0 %v11797_v8  ;;  %v9533_v8 = vld [vmem:[%s15677_s8] ss:$0 sm:$0xff] }
 0x4de   : > { %4195 = vmatprep.subr.bf16.mxu0 %v11805_v15 }
 0x4e0   : > { %11465 = vmatpush3.bf16.msra.mxu1 %v11768_v49 }
 0x4e1   : > { %11466 = vmatprep.subr.bf16.mxu1 %v12635_v26  ;;  %4196 = vmatpush1.bf16.msra.mxu0 %v11803_v18 }
 0x4e2   : > { %4197 = vmatprep.subr.bf16.mxu0 %v11811_v22  ;;  %v11829_v22 = vld [vmem:[%s15678_s9 + $0xc4] ss:$16 sps:$4 sm:$0xff]  }
 0x4e4   : > { %11467 = vmatpush3.bf16.msra.mxu1 %v11769_v50 }
 0x4e5   : > { %11468 = vmatprep.subr.bf16.mxu1 %v12635_v26  ;;  %4198 = vmatpush1.bf16.msra.mxu0 %v11809_v25  ;;  %v11830_v25 = vld [vmem:[%s15678_s9 + $0xc8] ss:$16 sps:$4 sm:$0xff]  }
 0x4e6   : > { %4199 = vmatprep.subr.bf16.mxu0 %v11817_v29  ;;  %v11833_v29 = vld [vmem:[%s15678_s9 + $0xa0] ss:$16 sps:$4 sm:$0xff]  }
 0x4e8   : > { %11469 = vmatpush3.bf16.msra.mxu1 %v11770_v51 }
 0x4e9   : > { %11470 = vmatprep.subr.bf16.mxu1 %v12635_v26  ;;  %4200 = vmatpush1.bf16.msra.mxu0 %v11815_v31  ;;  %v11841_v31 = vld [vmem:[%s15678_s9 + $0x84] ss:$16 sps:$4 sm:$0xff]  }
 0x4ea   : > { %4427 = vmatprep.subr.bf16.mxu0 %v11823_v33  ;;  %v11839_v33 = vld [vmem:[%s15678_s9 + $0x80] ss:$16 sps:$4 sm:$0xff]  }
 0x4ec   : > { %11471 = vmatpush3.bf16.msra.mxu1 %v11771_v52 }
 0x4ed   : > { %11472 = vmatprep.subr.bf16.mxu1 %v12635_v26  ;;  %v11778_v26 = vld [vmem:[%s15678_s9 + $0x1ec] ss:$16 sps:$4 sm:$0xff]  }
 0x4f0   : > { %11473 = vmatpush3.bf16.msra.mxu1 %v11772_v53 }
 0x4f1   : > { %4226 = vmatprep.subr.bf16.mxu1 %v11778_v26 }
 0x4f3   : > { %11475 = vmatmul.mubr.bf16.vlgmr.msra.gmra.mxu1 %v2976_v24 }
 0x4f4   : > { %4258 = vmatprep.mubr.bf16.mxu1 %v12636_v60  ;;  %4227 = vmatpush1.bf16.msra.mxu1 %v11776_v56 }
 0x4f5   : > { %4228 = vmatprep.subr.bf16.mxu1 %v11784_v58 }
 0x4f8   : > { %4229 = vmatpush1.bf16.msra.mxu1 %v11782_v61 }
 0x4f9   : > { %4230 = vmatprep.subr.bf16.mxu1 %v11790_v63 }
 0x4fc   : > { %4231 = vmatpush1.bf16.msra.mxu1 %v11788_v1 }
 0x4fd   : > { %4232 = vmatprep.subr.bf16.mxu1 %v11796_v3 }
 0x500   : > { %4233 = vmatpush1.bf16.msra.mxu1 %v11794_v5 }
 0x501   : > { %4234 = vmatprep.subr.bf16.mxu1 %v11802_v7 }
 0x504   : > { %4235 = vmatpush1.bf16.msra.mxu1 %v11800_v9 }
 0x505   : > { %4236 = vmatprep.subr.bf16.mxu1 %v11808_v16 }
 0x508   : > { %4237 = vmatpush1.bf16.msra.mxu1 %v11806_v19  ;;  %v11821_v19 = vld [vmem:[%s15678_s9 + $0xe0] ss:$16 sps:$4 sm:$0xff]  }
 0x509   : > { %4238 = vmatprep.subr.bf16.mxu1 %v11814_v23  ;;  %v11832_v23 = vld [vmem:[%s15678_s9 + $0xcc] ss:$16 sps:$4 sm:$0xff]  }
 0x50c   : > { %4239 = vmatpush1.bf16.msra.mxu1 %v11812_v27  ;;  %v11835_v27 = vld [vmem:[%s15678_s9 + $0xa4] ss:$16 sps:$4 sm:$0xff]  }
 0x50d   : > { %4240 = vmatprep.subr.bf16.mxu1 %v11820_v30  ;;  %v11836_v30 = vld [vmem:[%s15678_s9 + $0xa8] ss:$16 sps:$4 sm:$0xff]  }
 0x510   : > { %4241 = vmatpush1.bf16.msra.mxu1 %v11818_v32  ;;  %v11844_v32 = vld [vmem:[%s15678_s9 + $0x8c] ss:$16 sps:$4 sm:$0xff]  }
 0x511   : > { %4468 = vmatprep.subr.bf16.mxu1 %v11826_v34  ;;  %v11842_v34 = vld [vmem:[%s15678_s9 + $0x88] ss:$16 sps:$4 sm:$0xff]  }
 0x52b   : > { %v3181_v10 = vpop.f32.mrf.mxu0 }
 0x52d   : > { %v11336_v11 = vpop.f32.mrf.mxu0 }
 0x52f   : > { %v3184_v12 = vpop.f32.mrf.mxu0 }
 0x531   : > { %v11337_v13 = vpop.f32.mrf.mxu0 }
 0x533   : > { %v3092_v14 = vpop.f32.mrf.mxu1 }
 0x534   : > { %v3182_v17 = vadd.f32 %v3181_v10, %v3092_v14 }
 0x535   : > { %v11316_v20 = vpop.f32.mrf.mxu1 }
 0x536   : > { %v11824_v20 = vld [vmem:[%s15678_s9 + $0xe8] ss:$16 sps:$4 sm:$0xff]  }
 0x537   : > { %v3095_v21 = vpop.f32.mrf.mxu1 }
 0x538   : > { %v3185_v24 = vadd.f32 %v3184_v12, %v3095_v21 }
 0x539   : > { %v11317_v28 = vpop.f32.mrf.mxu1 }
 0x53a   : > { %v11838_v28 = vld [vmem:[%s15678_s9 + $0xac] ss:$16 sps:$4 sm:$0xff]  }
 0x54b   : > { %v3395_v35 = vpop.f32.mrf.mxu0 }
 0x54d   : > { %v11376_v36 = vpop.f32.mrf.mxu0 }
 0x54e   : > { %v11850_v36 = vld [vmem:[%s15678_s9 + $0x6c] ss:$16 sps:$4 sm:$0xff]  }
 0x54f   : > { %v3398_v37 = vpop.f32.mrf.mxu0 }
 0x551   : > { %v11377_v38 = vpop.f32.mrf.mxu0 }
 0x552   : > { %v11848_v38 = vld [vmem:[%s15678_s9 + $0x68] ss:$16 sps:$4 sm:$0xff]  }
 0x553   : > { %v3287_v39 = vpop.f32.mrf.mxu1 }
 0x554   : > { %v3294_v40 = vadd.f32 %v3287_v39, %v3182_v17  ;;  %v11853_v39 = vld [vmem:[%s15678_s9 + $0x44] ss:$16 sps:$4 sm:$0xff]  }
 0x555   : > { %v11356_v41 = vpop.f32.mrf.mxu1 }
 0x556   : > { %v3402_v42 = vadd.f32 %v3395_v35, %v3294_v40  ;;  %v11847_v35 = vld [vmem:[%s15678_s9 + $0x64] ss:$16 sps:$4 sm:$0xff]   ;;  %v11856_v40 = vld [vmem:[%s15678_s9 + $0x4c] ss:$16 sps:$4 sm:$0xff]   ;;  %v11851_v41 = vld [vmem:[%s15678_s9 + $0x40] ss:$16 sps:$4 sm:$0xff]  }
 0x557   : > { %v3290_v43 = vpop.f32.mrf.mxu1 }
 0x558   : > { %v3295_v44 = vadd.f32 %v3290_v43, %v3185_v24  ;;  %v11827_v24 = vld [vmem:[%s15678_s9 + $0xc0] ss:$16 sps:$4 sm:$0xff]   ;;  %v11859_v43 = vld [vmem:[%s15678_s9 + $0x24] ss:$16 sps:$4 sm:$0xff]  }
 0x559   : > { %v11357_v45 = vpop.f32.mrf.mxu1 }
 0x55a   : > { %v3403_v46 = vadd.f32 %v3398_v37, %v3295_v44  ;;  %v11845_v37 = vld [vmem:[%s15678_s9 + $0x60] ss:$16 sps:$4 sm:$0xff]   ;;  %v11862_v44 = vld [vmem:[%s15678_s9 + $0x2c] ss:$16 sps:$4 sm:$0xff]  }
 0x55b   : > { %v11857_v45 = vld [vmem:[%s15678_s9 + $0x20] ss:$16 sps:$4 sm:$0xff]  }
 0x56b   : > { %v3611_v47 = vpop.f32.mrf.mxu0 }
 0x56d   : > { %v11416_v48 = vpop.f32.mrf.mxu0 }
 0x56e   : > { %v11868_v48 = vld [vmem:[%s15678_s9 + $0xc] ss:$16 sps:$4 sm:$0xff]  }
 0x56f   : > { %v3614_v49 = vpop.f32.mrf.mxu0 }
 0x571   : > { %v11417_v50 = vpop.f32.mrf.mxu0 }
 0x572   : > { %v11866_v50 = vld [vmem:[%s15678_s9 + $0x8] ss:$16 sps:$4 sm:$0xff]  }
 0x573   : > { %v3503_v51 = vpop.f32.mrf.mxu1 }
 0x574   : > { %v3510_v52 = vadd.f32 %v3503_v51, %v3402_v42  ;;  %v11854_v42 = vld [vmem:[%s15678_s9 + $0x48] ss:$16 sps:$4 sm:$0xff]   ;;  %v11871_v51 = vld [vmem:[%s15678_s9 + $0x2e4] ss:$16 sps:$4 sm:$0xff]  }
 0x575   : > { %v11396_v53 = vpop.f32.mrf.mxu1 }
 0x576   : > { %v3618_v54 = vadd.f32 %v3611_v47, %v3510_v52  ;;  %v11865_v47 = vld [vmem:[%s15678_s9 + $0x4] ss:$16 sps:$4 sm:$0xff]   ;;  %v11874_v52 = vld [vmem:[%s15678_s9 + $0x2ec] ss:$16 sps:$4 sm:$0xff]   ;;  %v11869_v53 = vld [vmem:[%s15678_s9 + $0x2e0] ss:$16 sps:$4 sm:$0xff]  }
 0x577   : > { %v3506_v55 = vpop.f32.mrf.mxu1 }
 0x578   : > { %v3511_v56 = vadd.f32 %v3506_v55, %v3403_v46  ;;  %v11860_v46 = vld [vmem:[%s15678_s9 + $0x28] ss:$16 sps:$4 sm:$0xff]   ;;  %v11877_v55 = vld [vmem:[%s15678_s9 + $0x2c4] ss:$16 sps:$4 sm:$0xff]  }
 0x579   : > { %v11397_v26 = vpop.f32.mrf.mxu1 }
 0x57a   : > { %v3619_v57 = vadd.f32 %v3614_v49, %v3511_v56  ;;  %v11863_v49 = vld [vmem:[%s15678_s9] ss:$16 sps:$4 sm:$0xff]   ;;  %v11880_v56 = vld [vmem:[%s15678_s9 + $0x2cc] ss:$16 sps:$4 sm:$0xff]  }
 0x57b   : > { %v11875_v26 = vld [vmem:[%s15678_s9 + $0x2c0] ss:$16 sps:$4 sm:$0xff]  }
 0x58b   : > { %v3827_v58 = vpop.f32.mrf.mxu0 }
 0x58d   : > { %v11456_v59 = vpop.f32.mrf.mxu0 }
 0x58e   : > { %v11886_v59 = vld [vmem:[%s15678_s9 + $0x2ac] ss:$16 sps:$4 sm:$0xff]  }
 0x58f   : > { %v3830_v61 = vpop.f32.mrf.mxu0 }
 0x591   : > { %v11457_v62 = vpop.f32.mrf.mxu0 }
 0x592   : > { %v11884_v62 = vld [vmem:[%s15678_s9 + $0x2a8] ss:$16 sps:$4 sm:$0xff]  }
 0x593   : > { %v3719_v63 = vpop.f32.mrf.mxu1 }
 0x594   : > { %v3726_v3 = vadd.f32 %v3719_v63, %v3618_v54  ;;  %v11872_v54 = vld [vmem:[%s15678_s9 + $0x2e8] ss:$16 sps:$4 sm:$0xff]   ;;  %v11889_v63 = vld [vmem:[%s15678_s9 + $0x284] ss:$16 sps:$4 sm:$0xff]  }
 0x595   : > { %v11436_v0 = vpop.f32.mrf.mxu1 }
 0x596   : > { %v3834_v4 = vadd.f32 %v3827_v58, %v3726_v3  ;;  %v11883_v58 = vld [vmem:[%s15678_s9 + $0x2a4] ss:$16 sps:$4 sm:$0xff]   ;;  %v11892_v0 = vld [vmem:[%s15678_s9 + $0x28c] ss:$16 sps:$4 sm:$0xff]  }
 0x597   : > { %v3722_v1 = vpop.f32.mrf.mxu1  ;;  %v11895_v3 = vld [vmem:[%s15678_s9 + $0x264] ss:$16 sps:$4 sm:$0xff]  }
 0x598   : > { %v3727_v5 = vadd.f32 %v3722_v1, %v3619_v57  ;;  %v11878_v57 = vld [vmem:[%s15678_s9 + $0x2c8] ss:$16 sps:$4 sm:$0xff]   ;;  %v11887_v1 = vld [vmem:[%s15678_s9 + $0x280] ss:$16 sps:$4 sm:$0xff]  }
 0x599   : > { %v11437_v2 = vpop.f32.mrf.mxu1 }
 0x59a   : > { %v3835_v10 = vadd.f32 %v3830_v61, %v3727_v5  ;;  %v11881_v61 = vld [vmem:[%s15678_s9 + $0x2a0] ss:$16 sps:$4 sm:$0xff]   ;;  %v11890_v2 = vld [vmem:[%s15678_s9 + $0x288] ss:$16 sps:$4 sm:$0xff]  }
 0x59b   : > { %v11893_v5 = vld [vmem:[%s15678_s9 + $0x260] ss:$16 sps:$4 sm:$0xff]  }
 0x5b3   : > { %v3935_v6 = vpop.f32.mrf.mxu1 }
 0x5b4   : > { %v3942_v7 = vadd.f32 %v3935_v6, %v3834_v4  ;;  %v11898_v4 = vld [vmem:[%s15678_s9 + $0x26c] ss:$16 sps:$4 sm:$0xff]   ;;  %v11896_v6 = vld [vmem:[%s15678_s9 + $0x268] ss:$16 sps:$4 sm:$0xff]  }
 0x5b5   : > { %v11476_v9 = vpop.f32.mrf.mxu1 }
 0x5b6   : > { %v3951_v12 = vadd.f32 %v9533_v8, %v3942_v7  ;;  %v11901_v7 = vld [vmem:[%s15678_s9 + $0x244] ss:$16 sps:$4 sm:$0xff]   ;;  %v11899_v9 = vld [vmem:[%s15678_s9 + $0x240] ss:$16 sps:$4 sm:$0xff]  }
 0x5b7   : > { %v3938_v11 = vpop.f32.mrf.mxu1 }
 0x5b8   : > { %v3943_v13 = vadd.f32 %v3938_v11, %v3835_v10  ;;  %v3953_v16 = vmax.f32 %v3951_v12, 0.0  ;;  %v11902_v10 = vld [vmem:[%s15678_s9 + $0x248] ss:$16 sps:$4 sm:$0xff]   ;;  %v11907_v11 = vld [vmem:[%s15678_s9 + $0x224] ss:$16 sps:$4 sm:$0xff]  }
 0x5b9   : > { %v11477_v14 = vpop.f32.mrf.mxu1  ;;  %v11910_v12 = vld [vmem:[%s15678_s9 + $0x22c] ss:$16 sps:$4 sm:$0xff]  }
 0x5ba   : > { %v3952_v15 = vadd.f32 %v9533_v8, %v3943_v13  ;;  %v11904_v8 = vld [vmem:[%s15678_s9 + $0x24c] ss:$16 sps:$4 sm:$0xff]   ;;  %v11905_v13 = vld [vmem:[%s15678_s9 + $0x220] ss:$16 sps:$4 sm:$0xff]   ;;  %v11908_v14 = vld [vmem:[%s15678_s9 + $0x228] ss:$16 sps:$4 sm:$0xff]  }
 0x5bc   : > { %v3954_v17 = vmax.f32 %v3952_v15, 0.0  ;;  %v11913_v15 = vld [vmem:[%s15678_s9 + $0x204] ss:$16 sps:$4 sm:$0xff]  }
 0x5be   : > { %v13938_v18 = vpack.c.bf16 %v3954_v17, %v3953_v16  ;;  %v11916_v16 = vld [vmem:[%s15678_s9 + $0x20c] ss:$16 sps:$4 sm:$0xff]   ;;  %v11911_v17 = vld [vmem:[%s15678_s9 + $0x200] ss:$16 sps:$4 sm:$0xff]  }
 0x5c0   : > { %v13947_v21 = vshrl.u32 %v13938_v18, 16 }
 0x5c2   : > { %4218 = vmatmul.mubr.bf16.vlgmr.msra.gmra.mxu0 %v13947_v21  ;;  %4259 = vmatmul.mubr.bf16.vlgmr.msra.gmra.mxu1 %v13947_v21 }
 0x5c3   : > { %4428 = vmatpush1.bf16.msra.mxu0 %v11821_v19  ;;  %4469 = vmatpush1.bf16.msra.mxu1 %v11824_v20  ;;  %v11914_v19 = vld [vmem:[%s15678_s9 + $0x208] ss:$16 sps:$4 sm:$0xff]   ;;  %v11919_v20 = vld [vmem:[%s15678_s9 + $0x3e4] ss:$16 sps:$4 sm:$0xff]  }
 0x5c4   : > { %4429 = vmatprep.subr.bf16.mxu0 %v11829_v22  ;;  %4470 = vmatprep.subr.bf16.mxu1 %v11832_v23  ;;  %v11922_v22 = vld [vmem:[%s15678_s9 + $0x3ec] ss:$16 sps:$4 sm:$0xff]   ;;  %v11917_v23 = vld [vmem:[%s15678_s9 + $0x3e0] ss:$16 sps:$4 sm:$0xff]  }
 0x5c5   : > { %4459 = vmatprep.mubr.bf16.mxu0 %v12636_v60  ;;  %4500 = vmatprep.mubr.bf16.mxu1 %v12636_v60 }
 0x5c7   : > { %4430 = vmatpush1.bf16.msra.mxu0 %v11827_v24  ;;  %4471 = vmatpush1.bf16.msra.mxu1 %v11830_v25  ;;  %v11920_v24 = vld [vmem:[%s15678_s9 + $0x3e8] ss:$16 sps:$4 sm:$0xff]   ;;  %v4543_v25 = vrot.slane %v13938_v18, 1 }
 0x5c8   : > { %4431 = vmatprep.subr.bf16.mxu0 %v11835_v27  ;;  %4472 = vmatprep.subr.bf16.mxu1 %v11838_v28  ;;  %v11925_v27 = vld [vmem:[%s15678_s9 + $0x3c4] ss:$16 sps:$4 sm:$0xff]   ;;  %v11928_v28 = vld [vmem:[%s15678_s9 + $0x3cc] ss:$16 sps:$4 sm:$0xff]  }
 0x5cb   : > { %4432 = vmatpush1.bf16.msra.mxu0 %v11833_v29  ;;  %4473 = vmatpush1.bf16.msra.mxu1 %v11836_v30  ;;  %v11923_v29 = vld [vmem:[%s15678_s9 + $0x3c0] ss:$16 sps:$4 sm:$0xff]   ;;  %v11926_v30 = vld [vmem:[%s15678_s9 + $0x3c8] ss:$16 sps:$4 sm:$0xff]  }
 0x5cc   : > { %4433 = vmatprep.subr.bf16.mxu0 %v11841_v31  ;;  %4474 = vmatprep.subr.bf16.mxu1 %v11844_v32  ;;  %v11931_v31 = vld [vmem:[%s15678_s9 + $0x3a4] ss:$16 sps:$4 sm:$0xff]   ;;  %v11934_v32 = vld [vmem:[%s15678_s9 + $0x3ac] ss:$16 sps:$4 sm:$0xff]  }
 0x5cf   : > { %4434 = vmatpush1.bf16.msra.mxu0 %v11839_v33  ;;  %4475 = vmatpush1.bf16.msra.mxu1 %v11842_v34  ;;  %v11929_v33 = vld [vmem:[%s15678_s9 + $0x3a0] ss:$16 sps:$4 sm:$0xff]   ;;  %v11932_v34 = vld [vmem:[%s15678_s9 + $0x3a8] ss:$16 sps:$4 sm:$0xff]  }
 0x5d0   : > { %4435 = vmatprep.subr.bf16.mxu0 %v11847_v35  ;;  %4476 = vmatprep.subr.bf16.mxu1 %v11850_v36  ;;  %v11937_v35 = vld [vmem:[%s15678_s9 + $0x384] ss:$16 sps:$4 sm:$0xff]   ;;  %v11940_v36 = vld [vmem:[%s15678_s9 + $0x38c] ss:$16 sps:$4 sm:$0xff]  }
 0x5d3   : > { %4436 = vmatpush1.bf16.msra.mxu0 %v11845_v37  ;;  %4477 = vmatpush1.bf16.msra.mxu1 %v11848_v38  ;;  %v11935_v37 = vld [vmem:[%s15678_s9 + $0x380] ss:$16 sps:$4 sm:$0xff]   ;;  %v11938_v38 = vld [vmem:[%s15678_s9 + $0x388] ss:$16 sps:$4 sm:$0xff]  }
 0x5d4   : > { %4437 = vmatprep.subr.bf16.mxu0 %v11853_v39  ;;  %4478 = vmatprep.subr.bf16.mxu1 %v11856_v40  ;;  %v11943_v39 = vld [vmem:[%s15678_s9 + $0x364] ss:$16 sps:$4 sm:$0xff]   ;;  %v11946_v40 = vld [vmem:[%s15678_s9 + $0x36c] ss:$16 sps:$4 sm:$0xff]  }
 0x5d7   : > { %4438 = vmatpush1.bf16.msra.mxu0 %v11851_v41  ;;  %4479 = vmatpush1.bf16.msra.mxu1 %v11854_v42  ;;  %v11941_v41 = vld [vmem:[%s15678_s9 + $0x360] ss:$16 sps:$4 sm:$0xff]   ;;  %v11944_v42 = vld [vmem:[%s15678_s9 + $0x368] ss:$16 sps:$4 sm:$0xff]  }
 0x5d8   : > { %4439 = vmatprep.subr.bf16.mxu0 %v11859_v43  ;;  %4480 = vmatprep.subr.bf16.mxu1 %v11862_v44  ;;  %v11949_v43 = vld [vmem:[%s15678_s9 + $0x344] ss:$16 sps:$4 sm:$0xff]   ;;  %v11952_v44 = vld [vmem:[%s15678_s9 + $0x34c] ss:$16 sps:$4 sm:$0xff]  }
 0x5db   : > { %4440 = vmatpush1.bf16.msra.mxu0 %v11857_v45  ;;  %4481 = vmatpush1.bf16.msra.mxu1 %v11860_v46  ;;  %v11947_v45 = vld [vmem:[%s15678_s9 + $0x340] ss:$16 sps:$4 sm:$0xff]   ;;  %v11950_v46 = vld [vmem:[%s15678_s9 + $0x348] ss:$16 sps:$4 sm:$0xff]  }
 0x5dc   : > { %4441 = vmatprep.subr.bf16.mxu0 %v11865_v47  ;;  %4482 = vmatprep.subr.bf16.mxu1 %v11868_v48  ;;  %v11955_v47 = vld [vmem:[%s15678_s9 + $0x324] ss:$16 sps:$4 sm:$0xff]   ;;  %v11958_v48 = vld [vmem:[%s15678_s9 + $0x32c] ss:$16 sps:$4 sm:$0xff]  }
 0x5df   : > { %4442 = vmatpush1.bf16.msra.mxu0 %v11863_v49  ;;  %4483 = vmatpush1.bf16.msra.mxu1 %v11866_v50  ;;  %v11953_v49 = vld [vmem:[%s15678_s9 + $0x320] ss:$16 sps:$4 sm:$0xff]   ;;  %v11956_v50 = vld [vmem:[%s15678_s9 + $0x328] ss:$16 sps:$4 sm:$0xff]  }
 0x5e0   : > { %4705 = vmatprep.subr.bf16.mxu0 %v11871_v51  ;;  %4746 = vmatprep.subr.bf16.mxu1 %v11874_v52  ;;  %v11961_v51 = vld [vmem:[%s15678_s9 + $0x304] ss:$16 sps:$4 sm:$0xff]   ;;  %v11964_v52 = vld [vmem:[%s15678_s9 + $0x30c] ss:$16 sps:$4 sm:$0xff]  }
 0x5e2   : > { %4460 = vmatmul.mubr.bf16.vlgmr.msra.gmra.mxu0 %v13938_v18  ;;  %4501 = vmatmul.mubr.bf16.vlgmr.msra.gmra.mxu1 %v13938_v18 }
 0x5e3   : > { %4706 = vmatpush1.bf16.msra.mxu0 %v11869_v53  ;;  %4747 = vmatpush1.bf16.msra.mxu1 %v11872_v54  ;;  %v11959_v53 = vld [vmem:[%s15678_s9 + $0x300] ss:$16 sps:$4 sm:$0xff]   ;;  %v11962_v54 = vld [vmem:[%s15678_s9 + $0x308] ss:$16 sps:$4 sm:$0xff]  }
 0x5e4   : > { %4707 = vmatprep.subr.bf16.mxu0 %v11877_v55  ;;  %4748 = vmatprep.subr.bf16.mxu1 %v11880_v56  ;;  %v11967_v55 = vld [vmem:[%s15678_s9 + $0x4e4] ss:$16 sps:$4 sm:$0xff]   ;;  %v11970_v56 = vld [vmem:[%s15678_s9 + $0x4ec] ss:$16 sps:$4 sm:$0xff]  }
 0x5e5   : > { %4737 = vmatprep.mubr.bf16.mxu0 %v12636_v60  ;;  %4778 = vmatprep.mubr.bf16.mxu1 %v12636_v60 }
 0x5e7   : > { %4708 = vmatpush1.bf16.msra.mxu0 %v11875_v26  ;;  %4749 = vmatpush1.bf16.msra.mxu1 %v11878_v57  ;;  %v11965_v26 = vld [vmem:[%s15678_s9 + $0x4e0] ss:$16 sps:$4 sm:$0xff]   ;;  %v11968_v57 = vld [vmem:[%s15678_s9 + $0x4e8] ss:$16 sps:$4 sm:$0xff]  }
 0x5e8   : > { %4709 = vmatprep.subr.bf16.mxu0 %v11883_v58  ;;  %4750 = vmatprep.subr.bf16.mxu1 %v11886_v59  ;;  %v4824_v58 = vrot.slane %v13947_v21, 1  ;;  %v11973_v59 = vld [vmem:[%s15678_s9 + $0x4c4] ss:$16 sps:$4 sm:$0xff]  }
 0x5eb   : > { %4710 = vmatpush1.bf16.msra.mxu0 %v11881_v61  ;;  %4751 = vmatpush1.bf16.msra.mxu1 %v11884_v62  ;;  %v11976_v61 = vld [vmem:[%s15678_s9 + $0x4cc] ss:$16 sps:$4 sm:$0xff]   ;;  %v11971_v62 = vld [vmem:[%s15678_s9 + $0x4c0] ss:$16 sps:$4 sm:$0xff]  }
 0x5ec   : > { %4711 = vmatprep.subr.bf16.mxu0 %v11889_v63  ;;  %4752 = vmatprep.subr.bf16.mxu1 %v11892_v0  ;;  %v11974_v63 = vld [vmem:[%s15678_s9 + $0x4c8] ss:$16 sps:$4 sm:$0xff]   ;;  %v11979_v0 = vld [vmem:[%s15678_s9 + $0x4a4] ss:$16 sps:$4 sm:$0xff]  }
 0x5ef   : > { %4712 = vmatpush1.bf16.msra.mxu0 %v11887_v1  ;;  %4753 = vmatpush1.bf16.msra.mxu1 %v11890_v2  ;;  %v11982_v1 = vld [vmem:[%s15678_s9 + $0x4ac] ss:$16 sps:$4 sm:$0xff]   ;;  %v11977_v2 = vld [vmem:[%s15678_s9 + $0x4a0] ss:$16 sps:$4 sm:$0xff]  }
 0x5f0   : > { %4713 = vmatprep.subr.bf16.mxu0 %v11895_v3  ;;  %4754 = vmatprep.subr.bf16.mxu1 %v11898_v4  ;;  %v11980_v3 = vld [vmem:[%s15678_s9 + $0x4a8] ss:$16 sps:$4 sm:$0xff]   ;;  %v11985_v4 = vld [vmem:[%s15678_s9 + $0x484] ss:$16 sps:$4 sm:$0xff]  }
 0x5f3   : > { %4714 = vmatpush1.bf16.msra.mxu0 %v11893_v5  ;;  %4755 = vmatpush1.bf16.msra.mxu1 %v11896_v6  ;;  %v11988_v5 = vld [vmem:[%s15678_s9 + $0x48c] ss:$16 sps:$4 sm:$0xff]   ;;  %v11983_v6 = vld [vmem:[%s15678_s9 + $0x480] ss:$16 sps:$4 sm:$0xff]  }
 0x5f4   : > { %4715 = vmatprep.subr.bf16.mxu0 %v11901_v7  ;;  %4756 = vmatprep.subr.bf16.mxu1 %v11904_v8  ;;  %v11986_v7 = vld [vmem:[%s15678_s9 + $0x488] ss:$16 sps:$4 sm:$0xff]   ;;  %v11991_v8 = vld [vmem:[%s15678_s9 + $0x464] ss:$16 sps:$4 sm:$0xff]  }
 0x5f7   : > { %4716 = vmatpush1.bf16.msra.mxu0 %v11899_v9  ;;  %4757 = vmatpush1.bf16.msra.mxu1 %v11902_v10  ;;  %v11994_v9 = vld [vmem:[%s15678_s9 + $0x46c] ss:$16 sps:$4 sm:$0xff]   ;;  %v11989_v10 = vld [vmem:[%s15678_s9 + $0x460] ss:$16 sps:$4 sm:$0xff]  }
 0x5f8   : > { %4717 = vmatprep.subr.bf16.mxu0 %v11907_v11  ;;  %4758 = vmatprep.subr.bf16.mxu1 %v11910_v12  ;;  %v11992_v11 = vld [vmem:[%s15678_s9 + $0x468] ss:$16 sps:$4 sm:$0xff]   ;;  %v11997_v12 = vld [vmem:[%s15678_s9 + $0x444] ss:$16 sps:$4 sm:$0xff]  }
 0x5fb   : > { %4718 = vmatpush1.bf16.msra.mxu0 %v11905_v13  ;;  %4759 = vmatpush1.bf16.msra.mxu1 %v11908_v14  ;;  %v12000_v13 = vld [vmem:[%s15678_s9 + $0x44c] ss:$16 sps:$4 sm:$0xff]   ;;  %v11995_v14 = vld [vmem:[%s15678_s9 + $0x440] ss:$16 sps:$4 sm:$0xff]  }
 0x5fc   : > { %4719 = vmatprep.subr.bf16.mxu0 %v11913_v15  ;;  %4760 = vmatprep.subr.bf16.mxu1 %v11916_v16  ;;  %v11998_v15 = vld [vmem:[%s15678_s9 + $0x448] ss:$16 sps:$4 sm:$0xff]   ;;  %v12003_v16 = vld [vmem:[%s15678_s9 + $0x424] ss:$16 sps:$4 sm:$0xff]  }
 0x5ff   : > { %4720 = vmatpush1.bf16.msra.mxu0 %v11911_v17  ;;  %4761 = vmatpush1.bf16.msra.mxu1 %v11914_v19  ;;  %v12006_v17 = vld [vmem:[%s15678_s9 + $0x42c] ss:$16 sps:$4 sm:$0xff]   ;;  %v12001_v19 = vld [vmem:[%s15678_s9 + $0x420] ss:$16 sps:$4 sm:$0xff]  }
 0x600   : > { %4986 = vmatprep.subr.bf16.mxu0 %v11919_v20  ;;  %5027 = vmatprep.subr.bf16.mxu1 %v11922_v22  ;;  %v12004_v20 = vld [vmem:[%s15678_s9 + $0x428] ss:$16 sps:$4 sm:$0xff]   ;;  %v12009_v22 = vld [vmem:[%s15678_s9 + $0x404] ss:$16 sps:$4 sm:$0xff]  }
 0x602   : > { %4738 = vmatmul.mubr.bf16.vlgmr.msra.gmra.mxu0 %v4543_v25  ;;  %4779 = vmatmul.mubr.bf16.vlgmr.msra.gmra.mxu1 %v4543_v25  ;;  %v12010_v25 = vld [vmem:[%s15678_s9 + $0x408] ss:$16 sps:$4 sm:$0xff]  }
 0x603   : > { %4987 = vmatpush1.bf16.msra.mxu0 %v11917_v23  ;;  %5028 = vmatpush1.bf16.msra.mxu1 %v11920_v24  ;;  %v12012_v23 = vld [vmem:[%s15678_s9 + $0x40c] ss:$16 sps:$4 sm:$0xff]   ;;  %v12007_v24 = vld [vmem:[%s15678_s9 + $0x400] ss:$16 sps:$4 sm:$0xff]  }
 0x604   : > { %4988 = vmatprep.subr.bf16.mxu0 %v11925_v27  ;;  %5029 = vmatprep.subr.bf16.mxu1 %v11928_v28  ;;  %v12015_v27 = vld [vmem:[%s15678_s9 + $0x5e4] ss:$16 sps:$4 sm:$0xff]   ;;  %v12018_v28 = vld [vmem:[%s15678_s9 + $0x5ec] ss:$16 sps:$4 sm:$0xff]  }
 0x605   : > { %5018 = vmatprep.mubr.bf16.mxu0 %v12636_v60  ;;  %5059 = vmatprep.mubr.bf16.mxu1 %v12636_v60 }
 0x607   : > { %4989 = vmatpush1.bf16.msra.mxu0 %v11923_v29  ;;  %5030 = vmatpush1.bf16.msra.mxu1 %v11926_v30  ;;  %v12013_v29 = vld [vmem:[%s15678_s9 + $0x5e0] ss:$16 sps:$4 sm:$0xff]   ;;  %v12016_v30 = vld [vmem:[%s15678_s9 + $0x5e8] ss:$16 sps:$4 sm:$0xff]  }
 0x608   : > { %4990 = vmatprep.subr.bf16.mxu0 %v11931_v31  ;;  %5031 = vmatprep.subr.bf16.mxu1 %v11934_v32  ;;  %v5105_v31 = vrot.slane %v13938_v18, 2  ;;  %v12021_v32 = vld [vmem:[%s15678_s9 + $0x5c4] ss:$16 sps:$4 sm:$0xff]  }
 0x60b   : > { %4991 = vmatpush1.bf16.msra.mxu0 %v11929_v33  ;;  %5032 = vmatpush1.bf16.msra.mxu1 %v11932_v34  ;;  %v12024_v33 = vld [vmem:[%s15678_s9 + $0x5cc] ss:$16 sps:$4 sm:$0xff]   ;;  %v12019_v34 = vld [vmem:[%s15678_s9 + $0x5c0] ss:$16 sps:$4 sm:$0xff]  }
 0x60c   : > { %4992 = vmatprep.subr.bf16.mxu0 %v11937_v35  ;;  %5033 = vmatprep.subr.bf16.mxu1 %v11940_v36  ;;  %v12022_v35 = vld [vmem:[%s15678_s9 + $0x5c8] ss:$16 sps:$4 sm:$0xff]   ;;  %v12027_v36 = vld [vmem:[%s15678_s9 + $0x5a4] ss:$16 sps:$4 sm:$0xff]  }
 0x60f   : > { %4993 = vmatpush1.bf16.msra.mxu0 %v11935_v37  ;;  %5034 = vmatpush1.bf16.msra.mxu1 %v11938_v38  ;;  %v12030_v37 = vld [vmem:[%s15678_s9 + $0x5ac] ss:$16 sps:$4 sm:$0xff]   ;;  %v12025_v38 = vld [vmem:[%s15678_s9 + $0x5a0] ss:$16 sps:$4 sm:$0xff]  }
 0x610   : > { %4994 = vmatprep.subr.bf16.mxu0 %v11943_v39  ;;  %5035 = vmatprep.subr.bf16.mxu1 %v11946_v40  ;;  %v12028_v39 = vld [vmem:[%s15678_s9 + $0x5a8] ss:$16 sps:$4 sm:$0xff]   ;;  %v12033_v40 = vld [vmem:[%s15678_s9 + $0x584] ss:$16 sps:$4 sm:$0xff]  }
 0x613   : > { %4995 = vmatpush1.bf16.msra.mxu0 %v11941_v41  ;;  %5036 = vmatpush1.bf16.msra.mxu1 %v11944_v42  ;;  %v12036_v41 = vld [vmem:[%s15678_s9 + $0x58c] ss:$16 sps:$4 sm:$0xff]   ;;  %v12031_v42 = vld [vmem:[%s15678_s9 + $0x580] ss:$16 sps:$4 sm:$0xff]  }
 0x614   : > { %4996 = vmatprep.subr.bf16.mxu0 %v11949_v43  ;;  %5037 = vmatprep.subr.bf16.mxu1 %v11952_v44  ;;  %v12034_v43 = vld [vmem:[%s15678_s9 + $0x588] ss:$16 sps:$4 sm:$0xff]   ;;  %v12039_v44 = vld [vmem:[%s15678_s9 + $0x564] ss:$16 sps:$4 sm:$0xff]  }
 0x617   : > { %4997 = vmatpush1.bf16.msra.mxu0 %v11947_v45  ;;  %5038 = vmatpush1.bf16.msra.mxu1 %v11950_v46  ;;  %v12042_v45 = vld [vmem:[%s15678_s9 + $0x56c] ss:$16 sps:$4 sm:$0xff]   ;;  %v12037_v46 = vld [vmem:[%s15678_s9 + $0x560] ss:$16 sps:$4 sm:$0xff]  }
 0x618   : > { %4998 = vmatprep.subr.bf16.mxu0 %v11955_v47  ;;  %5039 = vmatprep.subr.bf16.mxu1 %v11958_v48  ;;  %v12040_v47 = vld [vmem:[%s15678_s9 + $0x568] ss:$16 sps:$4 sm:$0xff]   ;;  %v12045_v48 = vld [vmem:[%s15678_s9 + $0x544] ss:$16 sps:$4 sm:$0xff]  }
 0x61b   : > { %4999 = vmatpush1.bf16.msra.mxu0 %v11953_v49  ;;  %5040 = vmatpush1.bf16.msra.mxu1 %v11956_v50  ;;  %v12048_v49 = vld [vmem:[%s15678_s9 + $0x54c] ss:$16 sps:$4 sm:$0xff]   ;;  %v12043_v50 = vld [vmem:[%s15678_s9 + $0x540] ss:$16 sps:$4 sm:$0xff]  }
 0x61c   : > { %5000 = vmatprep.subr.bf16.mxu0 %v11961_v51  ;;  %5041 = vmatprep.subr.bf16.mxu1 %v11964_v52  ;;  %v12046_v51 = vld [vmem:[%s15678_s9 + $0x548] ss:$16 sps:$4 sm:$0xff]   ;;  %v12051_v52 = vld [vmem:[%s15678_s9 + $0x524] ss:$16 sps:$4 sm:$0xff]  }
 0x61f   : > { %5001 = vmatpush1.bf16.msra.mxu0 %v11959_v53  ;;  %5042 = vmatpush1.bf16.msra.mxu1 %v11962_v54  ;;  %v12054_v53 = vld [vmem:[%s15678_s9 + $0x52c] ss:$16 sps:$4 sm:$0xff]   ;;  %v12049_v54 = vld [vmem:[%s15678_s9 + $0x520] ss:$16 sps:$4 sm:$0xff]  }
 0x620   : > { %5267 = vmatprep.subr.bf16.mxu0 %v11967_v55  ;;  %5308 = vmatprep.subr.bf16.mxu1 %v11970_v56  ;;  %v12052_v55 = vld [vmem:[%s15678_s9 + $0x528] ss:$16 sps:$4 sm:$0xff]   ;;  %v12057_v56 = vld [vmem:[%s15678_s9 + $0x504] ss:$16 sps:$4 sm:$0xff]  }
 0x622   : > { %5019 = vmatmul.mubr.bf16.vlgmr.msra.gmra.mxu0 %v4824_v58  ;;  %5060 = vmatmul.mubr.bf16.vlgmr.msra.gmra.mxu1 %v4824_v58  ;;  %v12058_v58 = vld [vmem:[%s15678_s9 + $0x508] ss:$16 sps:$4 sm:$0xff]  }
 0x623   : > { %5268 = vmatpush1.bf16.msra.mxu0 %v11965_v26  ;;  %5309 = vmatpush1.bf16.msra.mxu1 %v11968_v57  ;;  %v12060_v26 = vld [vmem:[%s15678_s9 + $0x50c] ss:$16 sps:$4 sm:$0xff]   ;;  %v12055_v57 = vld [vmem:[%s15678_s9 + $0x500] ss:$16 sps:$4 sm:$0xff]  }
 0x624   : > { %5269 = vmatprep.subr.bf16.mxu0 %v11973_v59  ;;  %5310 = vmatprep.subr.bf16.mxu1 %v11976_v61  ;;  %v12063_v59 = vld [vmem:[%s15678_s9 + $0x6e4] ss:$16 sps:$4 sm:$0xff]   ;;  %v12066_v61 = vld [vmem:[%s15678_s9 + $0x6ec] ss:$16 sps:$4 sm:$0xff]  }
 0x625   : > { %5299 = vmatprep.mubr.bf16.mxu0 %v12636_v60  ;;  %5340 = vmatprep.mubr.bf16.mxu1 %v12636_v60 }
 0x627   : > { %5270 = vmatpush1.bf16.msra.mxu0 %v11971_v62  ;;  %5311 = vmatpush1.bf16.msra.mxu1 %v11974_v63  ;;  %v12061_v62 = vld [vmem:[%s15678_s9 + $0x6e0] ss:$16 sps:$4 sm:$0xff]   ;;  %v12064_v63 = vld [vmem:[%s15678_s9 + $0x6e8] ss:$16 sps:$4 sm:$0xff]  }
 0x628   : > { %5271 = vmatprep.subr.bf16.mxu0 %v11979_v0  ;;  %5312 = vmatprep.subr.bf16.mxu1 %v11982_v1  ;;  %v5386_v0 = vrot.slane %v13947_v21, 2  ;;  %v12069_v1 = vld [vmem:[%s15678_s9 + $0x6c4] ss:$16 sps:$4 sm:$0xff]  }
 0x62b   : > { %5272 = vmatpush1.bf16.msra.mxu0 %v11977_v2  ;;  %5313 = vmatpush1.bf16.msra.mxu1 %v11980_v3  ;;  %v12072_v2 = vld [vmem:[%s15678_s9 + $0x6cc] ss:$16 sps:$4 sm:$0xff]   ;;  %v12067_v3 = vld [vmem:[%s15678_s9 + $0x6c0] ss:$16 sps:$4 sm:$0xff]  }
 0x62c   : > { %5273 = vmatprep.subr.bf16.mxu0 %v11985_v4  ;;  %5314 = vmatprep.subr.bf16.mxu1 %v11988_v5  ;;  %v12070_v4 = vld [vmem:[%s15678_s9 + $0x6c8] ss:$16 sps:$4 sm:$0xff]   ;;  %v12075_v5 = vld [vmem:[%s15678_s9 + $0x6a4] ss:$16 sps:$4 sm:$0xff]  }
 0x62f   : > { %5274 = vmatpush1.bf16.msra.mxu0 %v11983_v6  ;;  %5315 = vmatpush1.bf16.msra.mxu1 %v11986_v7  ;;  %v12078_v6 = vld [vmem:[%s15678_s9 + $0x6ac] ss:$16 sps:$4 sm:$0xff]   ;;  %v12073_v7 = vld [vmem:[%s15678_s9 + $0x6a0] ss:$16 sps:$4 sm:$0xff]  }
 0x630   : > { %5275 = vmatprep.subr.bf16.mxu0 %v11991_v8  ;;  %5316 = vmatprep.subr.bf16.mxu1 %v11994_v9  ;;  %v12076_v8 = vld [vmem:[%s15678_s9 + $0x6a8] ss:$16 sps:$4 sm:$0xff]   ;;  %v12081_v9 = vld [vmem:[%s15678_s9 + $0x684] ss:$16 sps:$4 sm:$0xff]  }
 0x633   : > { %5276 = vmatpush1.bf16.msra.mxu0 %v11989_v10  ;;  %5317 = vmatpush1.bf16.msra.mxu1 %v11992_v11  ;;  %v12084_v10 = vld [vmem:[%s15678_s9 + $0x68c] ss:$16 sps:$4 sm:$0xff]   ;;  %v12079_v11 = vld [vmem:[%s15678_s9 + $0x680] ss:$16 sps:$4 sm:$0xff]  }
 0x634   : > { %5277 = vmatprep.subr.bf16.mxu0 %v11997_v12  ;;  %5318 = vmatprep.subr.bf16.mxu1 %v12000_v13  ;;  %v12082_v12 = vld [vmem:[%s15678_s9 + $0x688] ss:$16 sps:$4 sm:$0xff]   ;;  %v12087_v13 = vld [vmem:[%s15678_s9 + $0x664] ss:$16 sps:$4 sm:$0xff]  }
 0x637   : > { %5278 = vmatpush1.bf16.msra.mxu0 %v11995_v14  ;;  %5319 = vmatpush1.bf16.msra.mxu1 %v11998_v15  ;;  %v12090_v14 = vld [vmem:[%s15678_s9 + $0x66c] ss:$16 sps:$4 sm:$0xff]   ;;  %v12085_v15 = vld [vmem:[%s15678_s9 + $0x660] ss:$16 sps:$4 sm:$0xff]  }
 0x638   : > { %5279 = vmatprep.subr.bf16.mxu0 %v12003_v16  ;;  %5320 = vmatprep.subr.bf16.mxu1 %v12006_v17  ;;  %v12088_v16 = vld [vmem:[%s15678_s9 + $0x668] ss:$16 sps:$4 sm:$0xff]   ;;  %v12093_v17 = vld [vmem:[%s15678_s9 + $0x644] ss:$16 sps:$4 sm:$0xff]  }
 0x63b   : > { %5280 = vmatpush1.bf16.msra.mxu0 %v12001_v19  ;;  %5321 = vmatpush1.bf16.msra.mxu1 %v12004_v20  ;;  %v12096_v19 = vld [vmem:[%s15678_s9 + $0x64c] ss:$16 sps:$4 sm:$0xff]   ;;  %v12091_v20 = vld [vmem:[%s15678_s9 + $0x640] ss:$16 sps:$4 sm:$0xff]  }
 0x63c   : > { %5281 = vmatprep.subr.bf16.mxu0 %v12009_v22  ;;  %5322 = vmatprep.subr.bf16.mxu1 %v12012_v23  ;;  %v12094_v22 = vld [vmem:[%s15678_s9 + $0x648] ss:$16 sps:$4 sm:$0xff]   ;;  %v12099_v23 = vld [vmem:[%s15678_s9 + $0x624] ss:$16 sps:$4 sm:$0xff]  }
 0x63f   : > { %5282 = vmatpush1.bf16.msra.mxu0 %v12007_v24  ;;  %5323 = vmatpush1.bf16.msra.mxu1 %v12010_v25  ;;  %v12102_v24 = vld [vmem:[%s15678_s9 + $0x62c] ss:$16 sps:$4 sm:$0xff]   ;;  %v12097_v25 = vld [vmem:[%s15678_s9 + $0x620] ss:$16 sps:$4 sm:$0xff]  }
 0x640   : > { %5548 = vmatprep.subr.bf16.mxu0 %v12015_v27  ;;  %5589 = vmatprep.subr.bf16.mxu1 %v12018_v28  ;;  %v12100_v27 = vld [vmem:[%s15678_s9 + $0x628] ss:$16 sps:$4 sm:$0xff]   ;;  %v12105_v28 = vld [vmem:[%s15678_s9 + $0x604] ss:$16 sps:$4 sm:$0xff]  }
 0x642   : > { %5300 = vmatmul.mubr.bf16.vlgmr.msra.gmra.mxu0 %v5105_v31  ;;  %5341 = vmatmul.mubr.bf16.vlgmr.msra.gmra.mxu1 %v5105_v31  ;;  %v12106_v31 = vld [vmem:[%s15678_s9 + $0x608] ss:$16 sps:$4 sm:$0xff]  }
 0x643   : > { %5549 = vmatpush1.bf16.msra.mxu0 %v12013_v29  ;;  %5590 = vmatpush1.bf16.msra.mxu1 %v12016_v30  ;;  %v12108_v29 = vld [vmem:[%s15678_s9 + $0x60c] ss:$16 sps:$4 sm:$0xff]   ;;  %v12103_v30 = vld [vmem:[%s15678_s9 + $0x600] ss:$16 sps:$4 sm:$0xff]  }
 0x644   : > { %5550 = vmatprep.subr.bf16.mxu0 %v12021_v32  ;;  %5591 = vmatprep.subr.bf16.mxu1 %v12024_v33  ;;  %v12111_v32 = vld [vmem:[%s15678_s9 + $0x7e4] ss:$16 sps:$4 sm:$0xff]   ;;  %v12114_v33 = vld [vmem:[%s15678_s9 + $0x7ec] ss:$16 sps:$4 sm:$0xff]  }
 0x645   : > { %5580 = vmatprep.mubr.bf16.mxu0 %v12636_v60  ;;  %5621 = vmatprep.mubr.bf16.mxu1 %v12636_v60 }
 0x647   : > { %5551 = vmatpush1.bf16.msra.mxu0 %v12019_v34  ;;  %5592 = vmatpush1.bf16.msra.mxu1 %v12022_v35  ;;  %v12109_v34 = vld [vmem:[%s15678_s9 + $0x7e0] ss:$16 sps:$4 sm:$0xff]   ;;  %v12112_v35 = vld [vmem:[%s15678_s9 + $0x7e8] ss:$16 sps:$4 sm:$0xff]  }
 0x648   : > { %5552 = vmatprep.subr.bf16.mxu0 %v12027_v36  ;;  %5593 = vmatprep.subr.bf16.mxu1 %v12030_v37  ;;  %v5667_v36 = vrot.slane %v13938_v18, 3  ;;  %v12117_v37 = vld [vmem:[%s15678_s9 + $0x7c4] ss:$16 sps:$4 sm:$0xff]  }
 0x64b   : > { %5553 = vmatpush1.bf16.msra.mxu0 %v12025_v38  ;;  %5594 = vmatpush1.bf16.msra.mxu1 %v12028_v39  ;;  %v12120_v38 = vld [vmem:[%s15678_s9 + $0x7cc] ss:$16 sps:$4 sm:$0xff]  }
 0x64c   : > { %5554 = vmatprep.subr.bf16.mxu0 %v12033_v40  ;;  %5595 = vmatprep.subr.bf16.mxu1 %v12036_v41  ;;  %v12115_v41 = vld [vmem:[%s15678_s9 + $0x7c0] ss:$16 sps:$4 sm:$0xff]  }
 0x64f   : > { %5555 = vmatpush1.bf16.msra.mxu0 %v12031_v42  ;;  %5596 = vmatpush1.bf16.msra.mxu1 %v12034_v43  ;;  %v12118_v42 = vld [vmem:[%s15678_s9 + $0x7c8] ss:$16 sps:$4 sm:$0xff]  }
 0x650   : > { %5556 = vmatprep.subr.bf16.mxu0 %v12039_v44  ;;  %5597 = vmatprep.subr.bf16.mxu1 %v12042_v45  ;;  %v12123_v45 = vld [vmem:[%s15678_s9 + $0x7a4] ss:$16 sps:$4 sm:$0xff]  }
 0x653   : > { %5557 = vmatpush1.bf16.msra.mxu0 %v12037_v46  ;;  %5598 = vmatpush1.bf16.msra.mxu1 %v12040_v47  ;;  %v12126_v46 = vld [vmem:[%s15678_s9 + $0x7ac] ss:$16 sps:$4 sm:$0xff]  }
 0x654   : > { %5558 = vmatprep.subr.bf16.mxu0 %v12045_v48  ;;  %5599 = vmatprep.subr.bf16.mxu1 %v12048_v49  ;;  %v12121_v49 = vld [vmem:[%s15678_s9 + $0x7a0] ss:$16 sps:$4 sm:$0xff]  }
 0x657   : > { %5559 = vmatpush1.bf16.msra.mxu0 %v12043_v50  ;;  %5600 = vmatpush1.bf16.msra.mxu1 %v12046_v51  ;;  %v12124_v50 = vld [vmem:[%s15678_s9 + $0x7a8] ss:$16 sps:$4 sm:$0xff]  }
 0x658   : > { %5560 = vmatprep.subr.bf16.mxu0 %v12051_v52  ;;  %5601 = vmatprep.subr.bf16.mxu1 %v12054_v53  ;;  %v12129_v53 = vld [vmem:[%s15678_s9 + $0x784] ss:$16 sps:$4 sm:$0xff]  }
 0x65b   : > { %5561 = vmatpush1.bf16.msra.mxu0 %v12049_v54  ;;  %5602 = vmatpush1.bf16.msra.mxu1 %v12052_v55  ;;  %v12132_v54 = vld [vmem:[%s15678_s9 + $0x78c] ss:$16 sps:$4 sm:$0xff]   ;;  %v12127_v55 = vld [vmem:[%s15678_s9 + $0x780] ss:$16 sps:$4 sm:$0xff]  }
 0x65c   : > { %5562 = vmatprep.subr.bf16.mxu0 %v12057_v56  ;;  %5603 = vmatprep.subr.bf16.mxu1 %v12060_v26  ;;  %v12130_v56 = vld [vmem:[%s15678_s9 + $0x788] ss:$16 sps:$4 sm:$0xff]   ;;  %v12135_v26 = vld [vmem:[%s15678_s9 + $0x764] ss:$16 sps:$4 sm:$0xff]  }
 0x65f   : > { %5563 = vmatpush1.bf16.msra.mxu0 %v12055_v57  ;;  %5604 = vmatpush1.bf16.msra.mxu1 %v12058_v58  ;;  %v12138_v57 = vld [vmem:[%s15678_s9 + $0x76c] ss:$16 sps:$4 sm:$0xff]   ;;  %v12133_v58 = vld [vmem:[%s15678_s9 + $0x760] ss:$16 sps:$4 sm:$0xff]  }
 0x660   : > { %5829 = vmatprep.subr.bf16.mxu0 %v12063_v59  ;;  %5870 = vmatprep.subr.bf16.mxu1 %v12066_v61  ;;  %v12136_v59 = vld [vmem:[%s15678_s9 + $0x768] ss:$16 sps:$4 sm:$0xff]   ;;  %v12141_v61 = vld [vmem:[%s15678_s9 + $0x744] ss:$16 sps:$4 sm:$0xff]  }
 0x662   : > { %5581 = vmatmul.mubr.bf16.vlgmr.msra.gmra.mxu0 %v5386_v0  ;;  %5622 = vmatmul.mubr.bf16.vlgmr.msra.gmra.mxu1 %v5386_v0  ;;  %v12142_v0 = vld [vmem:[%s15678_s9 + $0x748] ss:$16 sps:$4 sm:$0xff]  }
 0x663   : > { %5830 = vmatpush1.bf16.msra.mxu0 %v12061_v62  ;;  %5871 = vmatpush1.bf16.msra.mxu1 %v12064_v63  ;;  %v12144_v62 = vld [vmem:[%s15678_s9 + $0x74c] ss:$16 sps:$4 sm:$0xff]   ;;  %v12139_v63 = vld [vmem:[%s15678_s9 + $0x740] ss:$16 sps:$4 sm:$0xff]  }
 0x664   : > { %5831 = vmatprep.subr.bf16.mxu0 %v12069_v1  ;;  %5872 = vmatprep.subr.bf16.mxu1 %v12072_v2  ;;  %v12147_v1 = vld [vmem:[%s15678_s9 + $0x724] ss:$16 sps:$4 sm:$0xff]   ;;  %v12150_v2 = vld [vmem:[%s15678_s9 + $0x72c] ss:$16 sps:$4 sm:$0xff]  }
 0x665   : > { %5861 = vmatprep.mubr.bf16.mxu0 %v12636_v60  ;;  %5902 = vmatprep.mubr.bf16.mxu1 %v12636_v60 }
 0x667   : > { %5832 = vmatpush1.bf16.msra.mxu0 %v12067_v3  ;;  %5873 = vmatpush1.bf16.msra.mxu1 %v12070_v4  ;;  %v12145_v3 = vld [vmem:[%s15678_s9 + $0x720] ss:$16 sps:$4 sm:$0xff]   ;;  %v12148_v4 = vld [vmem:[%s15678_s9 + $0x728] ss:$16 sps:$4 sm:$0xff]  }
 0x668   : > { %5833 = vmatprep.subr.bf16.mxu0 %v12075_v5  ;;  %5874 = vmatprep.subr.bf16.mxu1 %v12078_v6  ;;  %v12153_v5 = vld [vmem:[%s15678_s9 + $0x704] ss:$16 sps:$4 sm:$0xff]   ;;  %v12156_v6 = vld [vmem:[%s15678_s9 + $0x70c] ss:$16 sps:$4 sm:$0xff]  }
 0x66b   : > { %5834 = vmatpush1.bf16.msra.mxu0 %v12073_v7  ;;  %5875 = vmatpush1.bf16.msra.mxu1 %v12076_v8  ;;  %v12151_v7 = vld [vmem:[%s15678_s9 + $0x700] ss:$16 sps:$4 sm:$0xff]   ;;  %v12154_v8 = vld [vmem:[%s15678_s9 + $0x708] ss:$16 sps:$4 sm:$0xff]  }
 0x66c   : > { %5835 = vmatprep.subr.bf16.mxu0 %v12081_v9  ;;  %5876 = vmatprep.subr.bf16.mxu1 %v12084_v10  ;;  %v12159_v9 = vld [vmem:[%s15678_s9 + $0x8e4] ss:$16 sps:$4 sm:$0xff]   ;;  %v12162_v10 = vld [vmem:[%s15678_s9 + $0x8ec] ss:$16 sps:$4 sm:$0xff]  }
 0x66f   : > { %5836 = vmatpush1.bf16.msra.mxu0 %v12079_v11  ;;  %5877 = vmatpush1.bf16.msra.mxu1 %v12082_v12  ;;  %v12157_v11 = vld [vmem:[%s15678_s9 + $0x8e0] ss:$16 sps:$4 sm:$0xff]   ;;  %v12160_v12 = vld [vmem:[%s15678_s9 + $0x8e8] ss:$16 sps:$4 sm:$0xff]  }
 0x670   : > { %5837 = vmatprep.subr.bf16.mxu0 %v12087_v13  ;;  %5878 = vmatprep.subr.bf16.mxu1 %v12090_v14  ;;  %v5948_v13 = vrot.slane %v13947_v21, 3  ;;  %v12165_v14 = vld [vmem:[%s15678_s9 + $0x8c4] ss:$16 sps:$4 sm:$0xff]  }
 0x673   : > { %5838 = vmatpush1.bf16.msra.mxu0 %v12085_v15  ;;  %5879 = vmatpush1.bf16.msra.mxu1 %v12088_v16  ;;  %v12168_v15 = vld [vmem:[%s15678_s9 + $0x8cc] ss:$16 sps:$4 sm:$0xff]  }
 0x674   : > { %5839 = vmatprep.subr.bf16.mxu0 %v12093_v17  ;;  %5880 = vmatprep.subr.bf16.mxu1 %v12096_v19 }
 0x677   : > { %5840 = vmatpush1.bf16.msra.mxu0 %v12091_v20  ;;  %5881 = vmatpush1.bf16.msra.mxu1 %v12094_v22  ;;  %v12163_v22 = vld [vmem:[%s15678_s9 + $0x8c0] ss:$16 sps:$4 sm:$0xff]  }
 0x678   : > { %5841 = vmatprep.subr.bf16.mxu0 %v12099_v23  ;;  %5882 = vmatprep.subr.bf16.mxu1 %v12102_v24  ;;  %v12166_v23 = vld [vmem:[%s15678_s9 + $0x8c8] ss:$16 sps:$4 sm:$0xff]  }
 0x67b   : > { %5842 = vmatpush1.bf16.msra.mxu0 %v12097_v25  ;;  %5883 = vmatpush1.bf16.msra.mxu1 %v12100_v27  ;;  %v12171_v27 = vld [vmem:[%s15678_s9 + $0x8a4] ss:$16 sps:$4 sm:$0xff]  }
 0x67c   : > { %5843 = vmatprep.subr.bf16.mxu0 %v12105_v28  ;;  %5884 = vmatprep.subr.bf16.mxu1 %v12108_v29  ;;  %v12174_v28 = vld [vmem:[%s15678_s9 + $0x8ac] ss:$16 sps:$4 sm:$0xff]  }
 0x67f   : > { %5844 = vmatpush1.bf16.msra.mxu0 %v12103_v30  ;;  %5885 = vmatpush1.bf16.msra.mxu1 %v12106_v31 }
 0x680   : > { %6110 = vmatprep.subr.bf16.mxu0 %v12111_v32  ;;  %6151 = vmatprep.subr.bf16.mxu1 %v12114_v33  ;;  %v12169_v33 = vld [vmem:[%s15678_s9 + $0x8a0] ss:$16 sps:$4 sm:$0xff]  }
 0x682   : > { %5862 = vmatmul.mubr.bf16.vlgmr.msra.gmra.mxu0 %v5667_v36  ;;  %5903 = vmatmul.mubr.bf16.vlgmr.msra.gmra.mxu1 %v5667_v36  ;;  %v14552_v39 = vpop.f32.mrf.mxu0  ;;  %v14554_v40 = vpop.f32.mrf.mxu1 }
 0x683   : > { %6111 = vmatpush1.bf16.msra.mxu0 %v12109_v34  ;;  %6152 = vmatpush1.bf16.msra.mxu1 %v12112_v35  ;;  %v12172_v34 = vld [vmem:[%s15678_s9 + $0x8a8] ss:$16 sps:$4 sm:$0xff]  }
 0x684   : > { %v14562_v43 = vpop.f32.mrf.mxu0  ;;  %v14564_v44 = vpop.f32.mrf.mxu1  ;;  %6112 = vmatprep.subr.bf16.mxu0 %v12117_v37  ;;  %6153 = vmatprep.subr.bf16.mxu1 %v12120_v38  ;;  %v12177_v37 = vld [vmem:[%s15678_s9 + $0x884] ss:$16 sps:$4 sm:$0xff]   ;;  %v12180_v38 = vld [vmem:[%s15678_s9 + $0x88c] ss:$16 sps:$4 sm:$0xff]  }
 0x685   : > { %6142 = vmatprep.mubr.bf16.mxu0 %v12636_v60  ;;  %6183 = vmatprep.mubr.bf16.mxu1 %v12636_v60 }
 0x686   : > { %v4223_v47 = vpop.f32.mrf.mxu0  ;;  %v4264_v48 = vpop.f32.mrf.mxu1 }
 0x687   : > { %6113 = vmatpush1.bf16.msra.mxu0 %v12115_v41  ;;  %6154 = vmatpush1.bf16.msra.mxu1 %v12118_v42  ;;  %v12183_v41 = vld [vmem:[%s15678_s9 + $0x864] ss:$16 sps:$4 sm:$0xff]   ;;  %v12186_v42 = vld [vmem:[%s15678_s9 + $0x86c] ss:$16 sps:$4 sm:$0xff]   ;;  %v12187_v47 = vld [vmem:[%s15678_s9 + $0x840] ss:$16 sps:$4 sm:$0xff]  }
 0x688   : > { %v4224_v51 = vpop.f32.mrf.mxu0  ;;  %v4265_v52 = vpop.f32.mrf.mxu1  ;;  %6114 = vmatprep.subr.bf16.mxu0 %v12123_v45  ;;  %6155 = vmatprep.subr.bf16.mxu1 %v12126_v46  ;;  %v12189_v45 = vld [vmem:[%s15678_s9 + $0x844] ss:$16 sps:$4 sm:$0xff]   ;;  %v12192_v46 = vld [vmem:[%s15678_s9 + $0x84c] ss:$16 sps:$4 sm:$0xff]   ;;  %v12190_v48 = vld [vmem:[%s15678_s9 + $0x848] ss:$16 sps:$4 sm:$0xff]  }
 0x689   : > { %v12193_v51 = vld [vmem:[%s15678_s9 + $0x820] ss:$16 sps:$4 sm:$0xff]   ;;  %v12196_v52 = vld [vmem:[%s15678_s9 + $0x828] ss:$16 sps:$4 sm:$0xff]  }
 0x68b   : > { %6115 = vmatpush1.bf16.msra.mxu0 %v12121_v49  ;;  %6156 = vmatpush1.bf16.msra.mxu1 %v12124_v50  ;;  %v12195_v49 = vld [vmem:[%s15678_s9 + $0x824] ss:$16 sps:$4 sm:$0xff]   ;;  %v12198_v50 = vld [vmem:[%s15678_s9 + $0x82c] ss:$16 sps:$4 sm:$0xff]  }
 0x68c   : > { %6116 = vmatprep.subr.bf16.mxu0 %v12129_v53  ;;  %6157 = vmatprep.subr.bf16.mxu1 %v12132_v54  ;;  %v12201_v53 = vld [vmem:[%s15678_s9 + $0x804] ss:$16 sps:$4 sm:$0xff]   ;;  %v12204_v54 = vld [vmem:[%s15678_s9 + $0x80c] ss:$16 sps:$4 sm:$0xff]  }
 0x68f   : > { %6117 = vmatpush1.bf16.msra.mxu0 %v12127_v55  ;;  %6158 = vmatpush1.bf16.msra.mxu1 %v12130_v56  ;;  %v12199_v55 = vld [vmem:[%s15678_s9 + $0x800] ss:$16 sps:$4 sm:$0xff]   ;;  %v12202_v56 = vld [vmem:[%s15678_s9 + $0x808] ss:$16 sps:$4 sm:$0xff]  }
 0x690   : > { %6118 = vmatprep.subr.bf16.mxu0 %v12135_v26  ;;  %6159 = vmatprep.subr.bf16.mxu1 %v12138_v57  ;;  %v12207_v26 = vld [vmem:[%s15678_s9 + $0x9e4] ss:$16 sps:$4 sm:$0xff]   ;;  %v12210_v57 = vld [vmem:[%s15678_s9 + $0x9ec] ss:$16 sps:$4 sm:$0xff]  }
 0x693   : > { %6119 = vmatpush1.bf16.msra.mxu0 %v12133_v58  ;;  %6160 = vmatpush1.bf16.msra.mxu1 %v12136_v59  ;;  %v12205_v58 = vld [vmem:[%s15678_s9 + $0x9e0] ss:$16 sps:$4 sm:$0xff]   ;;  %v12208_v59 = vld [vmem:[%s15678_s9 + $0x9e8] ss:$16 sps:$4 sm:$0xff]  }
 0x694   : > { %6120 = vmatprep.subr.bf16.mxu0 %v12141_v61  ;;  %6161 = vmatprep.subr.bf16.mxu1 %v12144_v62  ;;  %v6229_v61 = vrot.slane %v13938_v18, 4  ;;  %v12213_v62 = vld [vmem:[%s15678_s9 + $0x9c4] ss:$16 sps:$4 sm:$0xff]  }
 0x697   : > { %6121 = vmatpush1.bf16.msra.mxu0 %v12139_v63  ;;  %6162 = vmatpush1.bf16.msra.mxu1 %v12142_v0  ;;  %v12216_v63 = vld [vmem:[%s15678_s9 + $0x9cc] ss:$16 sps:$4 sm:$0xff]  }
 0x698   : > { %6122 = vmatprep.subr.bf16.mxu0 %v12147_v1  ;;  %6163 = vmatprep.subr.bf16.mxu1 %v12150_v2 }
 0x69b   : > { %6123 = vmatpush1.bf16.msra.mxu0 %v12145_v3  ;;  %6164 = vmatpush1.bf16.msra.mxu1 %v12148_v4  ;;  %v12211_v4 = vld [vmem:[%s15678_s9 + $0x9c0] ss:$16 sps:$4 sm:$0xff]  }
 0x69c   : > { %6124 = vmatprep.subr.bf16.mxu0 %v12153_v5  ;;  %6165 = vmatprep.subr.bf16.mxu1 %v12156_v6  ;;  %v12214_v5 = vld [vmem:[%s15678_s9 + $0x9c8] ss:$16 sps:$4 sm:$0xff]  }
 0x69f   : > { %6125 = vmatpush1.bf16.msra.mxu0 %v12151_v7  ;;  %6166 = vmatpush1.bf16.msra.mxu1 %v12154_v8  ;;  %v12219_v8 = vld [vmem:[%s15678_s9 + $0x9a4] ss:$16 sps:$4 sm:$0xff]  }
 0x6a0   : > { %6391 = vmatprep.subr.bf16.mxu0 %v12159_v9  ;;  %6432 = vmatprep.subr.bf16.mxu1 %v12162_v10  ;;  %v12222_v9 = vld [vmem:[%s15678_s9 + $0x9ac] ss:$16 sps:$4 sm:$0xff]  }
 0x6a2   : > { %v4461_v16 = vpop.f32.mrf.mxu0  ;;  %v4502_v17 = vpop.f32.mrf.mxu1  ;;  %6143 = vmatmul.mubr.bf16.vlgmr.msra.gmra.mxu0 %v5948_v13  ;;  %6184 = vmatmul.mubr.bf16.vlgmr.msra.gmra.mxu1 %v5948_v13 }
 0x6a3   : > { %v14660_v19 = vadd.f32 %v4461_v16, %v14552_v39  ;;  %v14663_v20 = vadd.f32 %v4502_v17, %v14554_v40  ;;  %6392 = vmatpush1.bf16.msra.mxu0 %v12157_v11  ;;  %6433 = vmatpush1.bf16.msra.mxu1 %v12160_v12  ;;  %v12175_v39 = vld [vmem:[%s15678_s9 + $0x880] ss:$16 sps:$4 sm:$0xff]   ;;  %v12178_v40 = vld [vmem:[%s15678_s9 + $0x888] ss:$16 sps:$4 sm:$0xff]  }
 0x6a4   : > { %v4463_v24 = vpop.f32.mrf.mxu0  ;;  %v4504_v25 = vpop.f32.mrf.mxu1  ;;  %6393 = vmatprep.subr.bf16.mxu0 %v12165_v14  ;;  %6434 = vmatprep.subr.bf16.mxu1 %v12168_v15  ;;  %v12217_v14 = vld [vmem:[%s15678_s9 + $0x9a0] ss:$16 sps:$4 sm:$0xff]   ;;  %v12220_v15 = vld [vmem:[%s15678_s9 + $0x9a8] ss:$16 sps:$4 sm:$0xff]  }
 0x6a5   : > { %v14678_v29 = vadd.f32 %v4463_v24, %v14562_v43  ;;  %v14681_v30 = vadd.f32 %v4504_v25, %v14564_v44  ;;  %6423 = vmatprep.mubr.bf16.mxu0 %v12636_v60  ;;  %6464 = vmatprep.mubr.bf16.mxu1 %v12636_v60  ;;  %v12181_v43 = vld [vmem:[%s15678_s9 + $0x860] ss:$16 sps:$4 sm:$0xff]   ;;  %v12184_v44 = vld [vmem:[%s15678_s9 + $0x868] ss:$16 sps:$4 sm:$0xff]   ;;  %v12231_v24 = vld [vmem:[%s15678_s9 + $0x964] ss:$16 sps:$4 sm:$0xff]  }
 0x6a6   : > { %v4465_v31 = vpop.f32.mrf.mxu0  ;;  %v4506_v32 = vpop.f32.mrf.mxu1  ;;  %v12234_v25 = vld [vmem:[%s15678_s9 + $0x96c] ss:$16 sps:$4 sm:$0xff]  }
 0x6a7   : > { %6394 = vmatpush1.bf16.msra.mxu0 %v12163_v22  ;;  %6435 = vmatpush1.bf16.msra.mxu1 %v12166_v23  ;;  %v12223_v22 = vld [vmem:[%s15678_s9 + $0x980] ss:$16 sps:$4 sm:$0xff]   ;;  %v12226_v23 = vld [vmem:[%s15678_s9 + $0x988] ss:$16 sps:$4 sm:$0xff]  }
 0x6a8   : > { %v4466_v35 = vpop.f32.mrf.mxu0  ;;  %v4507_v36 = vpop.f32.mrf.mxu1  ;;  %6395 = vmatprep.subr.bf16.mxu0 %v12171_v27  ;;  %6436 = vmatprep.subr.bf16.mxu1 %v12174_v28  ;;  %v12229_v27 = vld [vmem:[%s15678_s9 + $0x960] ss:$16 sps:$4 sm:$0xff]   ;;  %v12232_v28 = vld [vmem:[%s15678_s9 + $0x968] ss:$16 sps:$4 sm:$0xff]  }
 0x6a9   : > { %v12235_v31 = vld [vmem:[%s15678_s9 + $0x940] ss:$16 sps:$4 sm:$0xff]   ;;  %v12238_v32 = vld [vmem:[%s15678_s9 + $0x948] ss:$16 sps:$4 sm:$0xff]  }
 0x6aa   : > { %v12241_v35 = vld [vmem:[%s15678_s9 + $0x920] ss:$16 sps:$4 sm:$0xff]   ;;  %v12244_v36 = vld [vmem:[%s15678_s9 + $0x928] ss:$16 sps:$4 sm:$0xff]  }
 0x6ab   : > { %6396 = vmatpush1.bf16.msra.mxu0 %v12169_v33  ;;  %6437 = vmatpush1.bf16.msra.mxu1 %v12172_v34  ;;  %v12243_v33 = vld [vmem:[%s15678_s9 + $0x924] ss:$16 sps:$4 sm:$0xff]   ;;  %v12246_v34 = vld [vmem:[%s15678_s9 + $0x92c] ss:$16 sps:$4 sm:$0xff]  }
 0x6ac   : > { %6397 = vmatprep.subr.bf16.mxu0 %v12177_v37  ;;  %6438 = vmatprep.subr.bf16.mxu1 %v12180_v38  ;;  %v12249_v37 = vld [vmem:[%s15678_s9 + $0x904] ss:$16 sps:$4 sm:$0xff]   ;;  %v12252_v38 = vld [vmem:[%s15678_s9 + $0x90c] ss:$16 sps:$4 sm:$0xff]  }
 0x6af   : > { %6398 = vmatpush1.bf16.msra.mxu0 %v12175_v39  ;;  %6439 = vmatpush1.bf16.msra.mxu1 %v12178_v40  ;;  %v12247_v39 = vld [vmem:[%s15678_s9 + $0x900] ss:$16 sps:$4 sm:$0xff]   ;;  %v12250_v40 = vld [vmem:[%s15678_s9 + $0x908] ss:$16 sps:$4 sm:$0xff]  }
 0x6b0   : > { %6399 = vmatprep.subr.bf16.mxu0 %v12183_v41  ;;  %6440 = vmatprep.subr.bf16.mxu1 %v12186_v42  ;;  %v12255_v41 = vld [vmem:[%s15678_s9 + $0xae4] ss:$16 sps:$4 sm:$0xff]   ;;  %v12258_v42 = vld [vmem:[%s15678_s9 + $0xaec] ss:$16 sps:$4 sm:$0xff]  }
 0x6b3   : > { %6400 = vmatpush1.bf16.msra.mxu0 %v12181_v43  ;;  %6441 = vmatpush1.bf16.msra.mxu1 %v12184_v44  ;;  %v12253_v43 = vld [vmem:[%s15678_s9 + $0xae0] ss:$16 sps:$4 sm:$0xff]   ;;  %v12256_v44 = vld [vmem:[%s15678_s9 + $0xae8] ss:$16 sps:$4 sm:$0xff]  }
 0x6b4   : > { %6401 = vmatprep.subr.bf16.mxu0 %v12189_v45  ;;  %6442 = vmatprep.subr.bf16.mxu1 %v12192_v46  ;;  %v6510_v45 = vrot.slane %v13947_v21, 4  ;;  %v12261_v46 = vld [vmem:[%s15678_s9 + $0xac4] ss:$16 sps:$4 sm:$0xff]  }
 0x6b7   : > { %6402 = vmatpush1.bf16.msra.mxu0 %v12187_v47  ;;  %6443 = vmatpush1.bf16.msra.mxu1 %v12190_v48  ;;  %v12264_v47 = vld [vmem:[%s15678_s9 + $0xacc] ss:$16 sps:$4 sm:$0xff]  }
 0x6b8   : > { %6403 = vmatprep.subr.bf16.mxu0 %v12195_v49  ;;  %6444 = vmatprep.subr.bf16.mxu1 %v12198_v50 }
 0x6bb   : > { %6404 = vmatpush1.bf16.msra.mxu0 %v12193_v51  ;;  %6445 = vmatpush1.bf16.msra.mxu1 %v12196_v52  ;;  %v12259_v52 = vld [vmem:[%s15678_s9 + $0xac0] ss:$16 sps:$4 sm:$0xff]  }
 0x6bc   : > { %6405 = vmatprep.subr.bf16.mxu0 %v12201_v53  ;;  %6446 = vmatprep.subr.bf16.mxu1 %v12204_v54  ;;  %v12262_v53 = vld [vmem:[%s15678_s9 + $0xac8] ss:$16 sps:$4 sm:$0xff]  }
 0x6bf   : > { %6406 = vmatpush1.bf16.msra.mxu0 %v12199_v55  ;;  %6447 = vmatpush1.bf16.msra.mxu1 %v12202_v56  ;;  %v12267_v56 = vld [vmem:[%s15678_s9 + $0xaa4] ss:$16 sps:$4 sm:$0xff]  }
 0x6c0   : > { %6672 = vmatprep.subr.bf16.mxu0 %v12207_v26  ;;  %6713 = vmatprep.subr.bf16.mxu1 %v12210_v57  ;;  %v12270_v26 = vld [vmem:[%s15678_s9 + $0xaac] ss:$16 sps:$4 sm:$0xff]  }
 0x6c2   : > { %v4739_v0 = vpop.f32.mrf.mxu0  ;;  %v4780_v1 = vpop.f32.mrf.mxu1  ;;  %6424 = vmatmul.mubr.bf16.vlgmr.msra.gmra.mxu0 %v6229_v61  ;;  %6465 = vmatmul.mubr.bf16.vlgmr.msra.gmra.mxu1 %v6229_v61 }
 0x6c3   : > { %v14771_v2 = vadd.f32 %v4739_v0, %v14660_v19  ;;  %v14774_v3 = vadd.f32 %v4780_v1, %v14663_v20  ;;  %6673 = vmatpush1.bf16.msra.mxu0 %v12205_v58  ;;  %6714 = vmatpush1.bf16.msra.mxu1 %v12208_v59  ;;  %v12225_v19 = vld [vmem:[%s15678_s9 + $0x984] ss:$16 sps:$4 sm:$0xff]   ;;  %v12228_v20 = vld [vmem:[%s15678_s9 + $0x98c] ss:$16 sps:$4 sm:$0xff]  }
 0x6c4   : > { %v4741_v6 = vpop.f32.mrf.mxu0  ;;  %v4782_v7 = vpop.f32.mrf.mxu1  ;;  %6674 = vmatprep.subr.bf16.mxu0 %v12213_v62  ;;  %6715 = vmatprep.subr.bf16.mxu1 %v12216_v63  ;;  %v12265_v62 = vld [vmem:[%s15678_s9 + $0xaa0] ss:$16 sps:$4 sm:$0xff]   ;;  %v12268_v63 = vld [vmem:[%s15678_s9 + $0xaa8] ss:$16 sps:$4 sm:$0xff]  }
 0x6c5   : > { %v14789_v10 = vadd.f32 %v4741_v6, %v14678_v29  ;;  %v14792_v11 = vadd.f32 %v4782_v7, %v14681_v30  ;;  %6704 = vmatprep.mubr.bf16.mxu0 %v12636_v60  ;;  %6745 = vmatprep.mubr.bf16.mxu1 %v12636_v60  ;;  %v12237_v29 = vld [vmem:[%s15678_s9 + $0x944] ss:$16 sps:$4 sm:$0xff]   ;;  %v12240_v30 = vld [vmem:[%s15678_s9 + $0x94c] ss:$16 sps:$4 sm:$0xff]  }
 0x6c6   : > { %v4743_v12 = vpop.f32.mrf.mxu0  ;;  %v4784_v13 = vpop.f32.mrf.mxu1  ;;  %v12279_v6 = vld [vmem:[%s15678_s9 + $0xa64] ss:$16 sps:$4 sm:$0xff]   ;;  %v12282_v7 = vld [vmem:[%s15678_s9 + $0xa6c] ss:$16 sps:$4 sm:$0xff]  }
 0x6c7   : > { %6675 = vmatpush1.bf16.msra.mxu0 %v12211_v4  ;;  %6716 = vmatpush1.bf16.msra.mxu1 %v12214_v5  ;;  %v12271_v4 = vld [vmem:[%s15678_s9 + $0xa80] ss:$16 sps:$4 sm:$0xff]   ;;  %v12274_v5 = vld [vmem:[%s15678_s9 + $0xa88] ss:$16 sps:$4 sm:$0xff]  }
 0x6c8   : > { %v4744_v16 = vpop.f32.mrf.mxu0  ;;  %v4785_v17 = vpop.f32.mrf.mxu1  ;;  %6676 = vmatprep.subr.bf16.mxu0 %v12219_v8  ;;  %6717 = vmatprep.subr.bf16.mxu1 %v12222_v9  ;;  %v12277_v8 = vld [vmem:[%s15678_s9 + $0xa60] ss:$16 sps:$4 sm:$0xff]   ;;  %v12280_v9 = vld [vmem:[%s15678_s9 + $0xa68] ss:$16 sps:$4 sm:$0xff]  }
 0x6c9   : > { %v12283_v12 = vld [vmem:[%s15678_s9 + $0xa40] ss:$16 sps:$4 sm:$0xff]   ;;  %v12286_v13 = vld [vmem:[%s15678_s9 + $0xa48] ss:$16 sps:$4 sm:$0xff]  }
 0x6ca   : > { %v12289_v16 = vld [vmem:[%s15678_s9 + $0xa20] ss:$16 sps:$4 sm:$0xff]   ;;  %v12292_v17 = vld [vmem:[%s15678_s9 + $0xa28] ss:$16 sps:$4 sm:$0xff]  }
 0x6cb   : > { %6677 = vmatpush1.bf16.msra.mxu0 %v12217_v14  ;;  %6718 = vmatpush1.bf16.msra.mxu1 %v12220_v15  ;;  %v12291_v14 = vld [vmem:[%s15678_s9 + $0xa24] ss:$16 sps:$4 sm:$0xff]   ;;  %v12294_v15 = vld [vmem:[%s15678_s9 + $0xa2c] ss:$16 sps:$4 sm:$0xff]  }
 0x6cc   : > { %6678 = vmatprep.subr.bf16.mxu0 %v12225_v19  ;;  %6719 = vmatprep.subr.bf16.mxu1 %v12228_v20  ;;  %v12297_v19 = vld [vmem:[%s15678_s9 + $0xa04] ss:$16 sps:$4 sm:$0xff]   ;;  %v12300_v20 = vld [vmem:[%s15678_s9 + $0xa0c] ss:$16 sps:$4 sm:$0xff]  }
 0x6cf   : > { %6679 = vmatpush1.bf16.msra.mxu0 %v12223_v22  ;;  %6720 = vmatpush1.bf16.msra.mxu1 %v12226_v23  ;;  %v12295_v22 = vld [vmem:[%s15678_s9 + $0xa00] ss:$16 sps:$4 sm:$0xff]   ;;  %v12298_v23 = vld [vmem:[%s15678_s9 + $0xa08] ss:$16 sps:$4 sm:$0xff]  }
 0x6d0   : > { %6680 = vmatprep.subr.bf16.mxu0 %v12231_v24  ;;  %6721 = vmatprep.subr.bf16.mxu1 %v12234_v25  ;;  %v12303_v24 = vld [vmem:[%s15678_s9 + $0xbe4] ss:$16 sps:$4 sm:$0xff]   ;;  %v12306_v25 = vld [vmem:[%s15678_s9 + $0xbec] ss:$16 sps:$4 sm:$0xff]  }
 0x6d3   : > { %6681 = vmatpush1.bf16.msra.mxu0 %v12229_v27  ;;  %6722 = vmatpush1.bf16.msra.mxu1 %v12232_v28  ;;  %v12301_v27 = vld [vmem:[%s15678_s9 + $0xbe0] ss:$16 sps:$4 sm:$0xff]   ;;  %v12304_v28 = vld [vmem:[%s15678_s9 + $0xbe8] ss:$16 sps:$4 sm:$0xff]  }
 0x6d4   : > { %6682 = vmatprep.subr.bf16.mxu0 %v12237_v29  ;;  %6723 = vmatprep.subr.bf16.mxu1 %v12240_v30  ;;  %v6791_v29 = vrot.slane %v13938_v18, 5  ;;  %v12309_v30 = vld [vmem:[%s15678_s9 + $0xbc4] ss:$16 sps:$4 sm:$0xff]  }
 0x6d7   : > { %6683 = vmatpush1.bf16.msra.mxu0 %v12235_v31  ;;  %6724 = vmatpush1.bf16.msra.mxu1 %v12238_v32  ;;  %v12312_v31 = vld [vmem:[%s15678_s9 + $0xbcc] ss:$16 sps:$4 sm:$0xff]  }
 0x6d8   : > { %6684 = vmatprep.subr.bf16.mxu0 %v12243_v33  ;;  %6725 = vmatprep.subr.bf16.mxu1 %v12246_v34 }
 0x6db   : > { %6685 = vmatpush1.bf16.msra.mxu0 %v12241_v35  ;;  %6726 = vmatpush1.bf16.msra.mxu1 %v12244_v36  ;;  %v12307_v36 = vld [vmem:[%s15678_s9 + $0xbc0] ss:$16 sps:$4 sm:$0xff]  }
 0x6dc   : > { %6686 = vmatprep.subr.bf16.mxu0 %v12249_v37  ;;  %6727 = vmatprep.subr.bf16.mxu1 %v12252_v38  ;;  %v12310_v37 = vld [vmem:[%s15678_s9 + $0xbc8] ss:$16 sps:$4 sm:$0xff]  }
 0x6df   : > { %6687 = vmatpush1.bf16.msra.mxu0 %v12247_v39  ;;  %6728 = vmatpush1.bf16.msra.mxu1 %v12250_v40  ;;  %v12315_v40 = vld [vmem:[%s15678_s9 + $0xba4] ss:$16 sps:$4 sm:$0xff]  }
 0x6e0   : > { %6953 = vmatprep.subr.bf16.mxu0 %v12255_v41  ;;  %6994 = vmatprep.subr.bf16.mxu1 %v12258_v42  ;;  %v12318_v41 = vld [vmem:[%s15678_s9 + $0xbac] ss:$16 sps:$4 sm:$0xff]  }
 0x6e2   : > { %v5020_v48 = vpop.f32.mrf.mxu0  ;;  %v5061_v49 = vpop.f32.mrf.mxu1  ;;  %6705 = vmatmul.mubr.bf16.vlgmr.msra.gmra.mxu0 %v6510_v45  ;;  %6746 = vmatmul.mubr.bf16.vlgmr.msra.gmra.mxu1 %v6510_v45 }
 0x6e3   : > { %v14882_v50 = vadd.f32 %v5020_v48, %v14771_v2  ;;  %v14885_v51 = vadd.f32 %v5061_v49, %v14774_v3  ;;  %6954 = vmatpush1.bf16.msra.mxu0 %v12253_v43  ;;  %6995 = vmatpush1.bf16.msra.mxu1 %v12256_v44  ;;  %v12273_v2 = vld [vmem:[%s15678_s9 + $0xa84] ss:$16 sps:$4 sm:$0xff]   ;;  %v12276_v3 = vld [vmem:[%s15678_s9 + $0xa8c] ss:$16 sps:$4 sm:$0xff]  }
 0x6e4   : > { %v5022_v54 = vpop.f32.mrf.mxu0  ;;  %v5063_v55 = vpop.f32.mrf.mxu1  ;;  %6955 = vmatprep.subr.bf16.mxu0 %v12261_v46  ;;  %6996 = vmatprep.subr.bf16.mxu1 %v12264_v47  ;;  %v12313_v46 = vld [vmem:[%s15678_s9 + $0xba0] ss:$16 sps:$4 sm:$0xff]   ;;  %v12316_v47 = vld [vmem:[%s15678_s9 + $0xba8] ss:$16 sps:$4 sm:$0xff]  }
 0x6e5   : > { %v14900_v57 = vadd.f32 %v5022_v54, %v14789_v10  ;;  %v14903_v58 = vadd.f32 %v5063_v55, %v14792_v11  ;;  %6985 = vmatprep.mubr.bf16.mxu0 %v12636_v60  ;;  %7026 = vmatprep.mubr.bf16.mxu1 %v12636_v60  ;;  %v12285_v10 = vld [vmem:[%s15678_s9 + $0xa44] ss:$16 sps:$4 sm:$0xff]   ;;  %v12288_v11 = vld [vmem:[%s15678_s9 + $0xa4c] ss:$16 sps:$4 sm:$0xff]  }
 0x6e6   : > { %v5024_v59 = vpop.f32.mrf.mxu0  ;;  %v5065_v61 = vpop.f32.mrf.mxu1  ;;  %v12327_v54 = vld [vmem:[%s15678_s9 + $0xb64] ss:$16 sps:$4 sm:$0xff]   ;;  %v12330_v55 = vld [vmem:[%s15678_s9 + $0xb6c] ss:$16 sps:$4 sm:$0xff]  }
 0x6e7   : > { %6956 = vmatpush1.bf16.msra.mxu0 %v12259_v52  ;;  %6997 = vmatpush1.bf16.msra.mxu1 %v12262_v53  ;;  %v12319_v52 = vld [vmem:[%s15678_s9 + $0xb80] ss:$16 sps:$4 sm:$0xff]   ;;  %v12322_v53 = vld [vmem:[%s15678_s9 + $0xb88] ss:$16 sps:$4 sm:$0xff]  }
 0x6e8   : > { %v5025_v0 = vpop.f32.mrf.mxu0  ;;  %v5066_v1 = vpop.f32.mrf.mxu1  ;;  %6957 = vmatprep.subr.bf16.mxu0 %v12267_v56  ;;  %6998 = vmatprep.subr.bf16.mxu1 %v12270_v26  ;;  %v12325_v56 = vld [vmem:[%s15678_s9 + $0xb60] ss:$16 sps:$4 sm:$0xff]   ;;  %v12328_v26 = vld [vmem:[%s15678_s9 + $0xb68] ss:$16 sps:$4 sm:$0xff]  }
 0x6e9   : > { %v12331_v59 = vld [vmem:[%s15678_s9 + $0xb40] ss:$16 sps:$4 sm:$0xff]   ;;  %v12334_v61 = vld [vmem:[%s15678_s9 + $0xb48] ss:$16 sps:$4 sm:$0xff]  }
 0x6ea   : > { %v12337_v0 = vld [vmem:[%s15678_s9 + $0xb20] ss:$16 sps:$4 sm:$0xff]   ;;  %v12340_v1 = vld [vmem:[%s15678_s9 + $0xb28] ss:$16 sps:$4 sm:$0xff]  }
 0x6eb   : > { %6958 = vmatpush1.bf16.msra.mxu0 %v12265_v62  ;;  %6999 = vmatpush1.bf16.msra.mxu1 %v12268_v63  ;;  %v12339_v62 = vld [vmem:[%s15678_s9 + $0xb24] ss:$16 sps:$4 sm:$0xff]   ;;  %v12342_v63 = vld [vmem:[%s15678_s9 + $0xb2c] ss:$16 sps:$4 sm:$0xff]  }
 0x6ec   : > { %6959 = vmatprep.subr.bf16.mxu0 %v12273_v2  ;;  %7000 = vmatprep.subr.bf16.mxu1 %v12276_v3  ;;  %v12345_v2 = vld [vmem:[%s15678_s9 + $0xb04] ss:$16 sps:$4 sm:$0xff]   ;;  %v12348_v3 = vld [vmem:[%s15678_s9 + $0xb0c] ss:$16 sps:$4 sm:$0xff]  }
 0x6ef   : > { %6960 = vmatpush1.bf16.msra.mxu0 %v12271_v4  ;;  %7001 = vmatpush1.bf16.msra.mxu1 %v12274_v5  ;;  %v12343_v4 = vld [vmem:[%s15678_s9 + $0xb00] ss:$16 sps:$4 sm:$0xff]   ;;  %v12346_v5 = vld [vmem:[%s15678_s9 + $0xb08] ss:$16 sps:$4 sm:$0xff]  }
 0x6f0   : > { %6961 = vmatprep.subr.bf16.mxu0 %v12279_v6  ;;  %7002 = vmatprep.subr.bf16.mxu1 %v12282_v7  ;;  %v12351_v6 = vld [vmem:[%s15678_s9 + $0xce4] ss:$16 sps:$4 sm:$0xff]   ;;  %v12354_v7 = vld [vmem:[%s15678_s9 + $0xcec] ss:$16 sps:$4 sm:$0xff]  }
 0x6f3   : > { %6962 = vmatpush1.bf16.msra.mxu0 %v12277_v8  ;;  %7003 = vmatpush1.bf16.msra.mxu1 %v12280_v9  ;;  %v12349_v8 = vld [vmem:[%s15678_s9 + $0xce0] ss:$16 sps:$4 sm:$0xff]   ;;  %v12352_v9 = vld [vmem:[%s15678_s9 + $0xce8] ss:$16 sps:$4 sm:$0xff]  }
 0x6f4   : > { %6963 = vmatprep.subr.bf16.mxu0 %v12285_v10  ;;  %7004 = vmatprep.subr.bf16.mxu1 %v12288_v11  ;;  %v7072_v10 = vrot.slane %v13947_v21, 5  ;;  %v12357_v11 = vld [vmem:[%s15678_s9 + $0xcc4] ss:$16 sps:$4 sm:$0xff]  }
 0x6f7   : > { %6964 = vmatpush1.bf16.msra.mxu0 %v12283_v12  ;;  %7005 = vmatpush1.bf16.msra.mxu1 %v12286_v13  ;;  %v12360_v12 = vld [vmem:[%s15678_s9 + $0xccc] ss:$16 sps:$4 sm:$0xff]  }
 0x6f8   : > { %6965 = vmatprep.subr.bf16.mxu0 %v12291_v14  ;;  %7006 = vmatprep.subr.bf16.mxu1 %v12294_v15 }
 0x6fb   : > { %6966 = vmatpush1.bf16.msra.mxu0 %v12289_v16  ;;  %7007 = vmatpush1.bf16.msra.mxu1 %v12292_v17  ;;  %v12355_v17 = vld [vmem:[%s15678_s9 + $0xcc0] ss:$16 sps:$4 sm:$0xff]  }
 0x6fc   : > { %6967 = vmatprep.subr.bf16.mxu0 %v12297_v19  ;;  %7008 = vmatprep.subr.bf16.mxu1 %v12300_v20  ;;  %v12358_v19 = vld [vmem:[%s15678_s9 + $0xcc8] ss:$16 sps:$4 sm:$0xff]  }
 0x6ff   : > { %6968 = vmatpush1.bf16.msra.mxu0 %v12295_v22  ;;  %7009 = vmatpush1.bf16.msra.mxu1 %v12298_v23  ;;  %v12363_v23 = vld [vmem:[%s15678_s9 + $0xca4] ss:$16 sps:$4 sm:$0xff]  }
 0x700   : > { %7234 = vmatprep.subr.bf16.mxu0 %v12303_v24  ;;  %7275 = vmatprep.subr.bf16.mxu1 %v12306_v25  ;;  %v12366_v24 = vld [vmem:[%s15678_s9 + $0xcac] ss:$16 sps:$4 sm:$0xff]  }
 0x702   : > { %v5301_v32 = vpop.f32.mrf.mxu0  ;;  %v5342_v33 = vpop.f32.mrf.mxu1  ;;  %6986 = vmatmul.mubr.bf16.vlgmr.msra.gmra.mxu0 %v6791_v29  ;;  %7027 = vmatmul.mubr.bf16.vlgmr.msra.gmra.mxu1 %v6791_v29 }
 0x703   : > { %v14993_v34 = vadd.f32 %v5301_v32, %v14882_v50  ;;  %v14996_v35 = vadd.f32 %v5342_v33, %v14885_v51  ;;  %7235 = vmatpush1.bf16.msra.mxu0 %v12301_v27  ;;  %7276 = vmatpush1.bf16.msra.mxu1 %v12304_v28  ;;  %v12321_v50 = vld [vmem:[%s15678_s9 + $0xb84] ss:$16 sps:$4 sm:$0xff]   ;;  %v12324_v51 = vld [vmem:[%s15678_s9 + $0xb8c] ss:$16 sps:$4 sm:$0xff]  }
 0x704   : > { %v5303_v38 = vpop.f32.mrf.mxu0  ;;  %v5344_v39 = vpop.f32.mrf.mxu1  ;;  %7236 = vmatprep.subr.bf16.mxu0 %v12309_v30  ;;  %7277 = vmatprep.subr.bf16.mxu1 %v12312_v31  ;;  %v12361_v30 = vld [vmem:[%s15678_s9 + $0xca0] ss:$16 sps:$4 sm:$0xff]   ;;  %v12364_v31 = vld [vmem:[%s15678_s9 + $0xca8] ss:$16 sps:$4 sm:$0xff]  }
 0x705   : > { %v15011_v42 = vadd.f32 %v5303_v38, %v14900_v57  ;;  %v15014_v43 = vadd.f32 %v5344_v39, %v14903_v58  ;;  %7266 = vmatprep.mubr.bf16.mxu0 %v12636_v60  ;;  %7307 = vmatprep.mubr.bf16.mxu1 %v12636_v60  ;;  %v12333_v57 = vld [vmem:[%s15678_s9 + $0xb44] ss:$16 sps:$4 sm:$0xff]   ;;  %v12336_v58 = vld [vmem:[%s15678_s9 + $0xb4c] ss:$16 sps:$4 sm:$0xff]  }
 0x706   : > { %v5305_v44 = vpop.f32.mrf.mxu0  ;;  %v5346_v45 = vpop.f32.mrf.mxu1  ;;  %v12375_v38 = vld [vmem:[%s15678_s9 + $0xc64] ss:$16 sps:$4 sm:$0xff]   ;;  %v12378_v39 = vld [vmem:[%s15678_s9 + $0xc6c] ss:$16 sps:$4 sm:$0xff]  }
 0x707   : > { %7237 = vmatpush1.bf16.msra.mxu0 %v12307_v36  ;;  %7278 = vmatpush1.bf16.msra.mxu1 %v12310_v37  ;;  %v12367_v36 = vld [vmem:[%s15678_s9 + $0xc80] ss:$16 sps:$4 sm:$0xff]   ;;  %v12370_v37 = vld [vmem:[%s15678_s9 + $0xc88] ss:$16 sps:$4 sm:$0xff]  }
 0x708   : > { %v5306_v48 = vpop.f32.mrf.mxu0  ;;  %v5347_v49 = vpop.f32.mrf.mxu1  ;;  %7238 = vmatprep.subr.bf16.mxu0 %v12315_v40  ;;  %7279 = vmatprep.subr.bf16.mxu1 %v12318_v41  ;;  %v12373_v40 = vld [vmem:[%s15678_s9 + $0xc60] ss:$16 sps:$4 sm:$0xff]   ;;  %v12376_v41 = vld [vmem:[%s15678_s9 + $0xc68] ss:$16 sps:$4 sm:$0xff]  }
 0x709   : > { %v12379_v44 = vld [vmem:[%s15678_s9 + $0xc40] ss:$16 sps:$4 sm:$0xff]   ;;  %v12382_v45 = vld [vmem:[%s15678_s9 + $0xc48] ss:$16 sps:$4 sm:$0xff]  }
 0x70a   : > { %v12385_v48 = vld [vmem:[%s15678_s9 + $0xc20] ss:$16 sps:$4 sm:$0xff]   ;;  %v12388_v49 = vld [vmem:[%s15678_s9 + $0xc28] ss:$16 sps:$4 sm:$0xff]  }
 0x70b   : > { %7239 = vmatpush1.bf16.msra.mxu0 %v12313_v46  ;;  %7280 = vmatpush1.bf16.msra.mxu1 %v12316_v47  ;;  %v12387_v46 = vld [vmem:[%s15678_s9 + $0xc24] ss:$16 sps:$4 sm:$0xff]   ;;  %v12390_v47 = vld [vmem:[%s15678_s9 + $0xc2c] ss:$16 sps:$4 sm:$0xff]  }
 0x70c   : > { %7240 = vmatprep.subr.bf16.mxu0 %v12321_v50  ;;  %7281 = vmatprep.subr.bf16.mxu1 %v12324_v51  ;;  %v12393_v50 = vld [vmem:[%s15678_s9 + $0xc04] ss:$16 sps:$4 sm:$0xff]   ;;  %v12396_v51 = vld [vmem:[%s15678_s9 + $0xc0c] ss:$16 sps:$4 sm:$0xff]  }
 0x70f   : > { %7241 = vmatpush1.bf16.msra.mxu0 %v12319_v52  ;;  %7282 = vmatpush1.bf16.msra.mxu1 %v12322_v53  ;;  %v12391_v52 = vld [vmem:[%s15678_s9 + $0xc00] ss:$16 sps:$4 sm:$0xff]   ;;  %v12394_v53 = vld [vmem:[%s15678_s9 + $0xc08] ss:$16 sps:$4 sm:$0xff]  }
 0x710   : > { %7242 = vmatprep.subr.bf16.mxu0 %v12327_v54  ;;  %7283 = vmatprep.subr.bf16.mxu1 %v12330_v55  ;;  %v12399_v54 = vld [vmem:[%s15678_s9 + $0xde4] ss:$16 sps:$4 sm:$0xff]   ;;  %v12402_v55 = vld [vmem:[%s15678_s9 + $0xdec] ss:$16 sps:$4 sm:$0xff]  }
 0x713   : > { %7243 = vmatpush1.bf16.msra.mxu0 %v12325_v56  ;;  %7284 = vmatpush1.bf16.msra.mxu1 %v12328_v26  ;;  %v12397_v56 = vld [vmem:[%s15678_s9 + $0xde0] ss:$16 sps:$4 sm:$0xff]   ;;  %v12400_v26 = vld [vmem:[%s15678_s9 + $0xde8] ss:$16 sps:$4 sm:$0xff]  }
 0x714   : > { %7244 = vmatprep.subr.bf16.mxu0 %v12333_v57  ;;  %7285 = vmatprep.subr.bf16.mxu1 %v12336_v58  ;;  %v7353_v57 = vrot.slane %v13938_v18, 6  ;;  %v12405_v58 = vld [vmem:[%s15678_s9 + $0xdc4] ss:$16 sps:$4 sm:$0xff]  }
 0x717   : > { %7245 = vmatpush1.bf16.msra.mxu0 %v12331_v59  ;;  %7286 = vmatpush1.bf16.msra.mxu1 %v12334_v61  ;;  %v12408_v59 = vld [vmem:[%s15678_s9 + $0xdcc] ss:$16 sps:$4 sm:$0xff]  }
 0x718   : > { %7246 = vmatprep.subr.bf16.mxu0 %v12339_v62  ;;  %7287 = vmatprep.subr.bf16.mxu1 %v12342_v63 }
 0x71b   : > { %7247 = vmatpush1.bf16.msra.mxu0 %v12337_v0  ;;  %7288 = vmatpush1.bf16.msra.mxu1 %v12340_v1  ;;  %v12403_v1 = vld [vmem:[%s15678_s9 + $0xdc0] ss:$16 sps:$4 sm:$0xff]  }
 0x71c   : > { %7248 = vmatprep.subr.bf16.mxu0 %v12345_v2  ;;  %7289 = vmatprep.subr.bf16.mxu1 %v12348_v3  ;;  %v12406_v2 = vld [vmem:[%s15678_s9 + $0xdc8] ss:$16 sps:$4 sm:$0xff]  }
 0x71f   : > { %7249 = vmatpush1.bf16.msra.mxu0 %v12343_v4  ;;  %7290 = vmatpush1.bf16.msra.mxu1 %v12346_v5  ;;  %v12411_v5 = vld [vmem:[%s15678_s9 + $0xda4] ss:$16 sps:$4 sm:$0xff]  }
 0x720   : > { %7515 = vmatprep.subr.bf16.mxu0 %v12351_v6  ;;  %7556 = vmatprep.subr.bf16.mxu1 %v12354_v7  ;;  %v12414_v6 = vld [vmem:[%s15678_s9 + $0xdac] ss:$16 sps:$4 sm:$0xff]  }
 0x722   : > { %v5582_v13 = vpop.f32.mrf.mxu0  ;;  %v5623_v14 = vpop.f32.mrf.mxu1  ;;  %7267 = vmatmul.mubr.bf16.vlgmr.msra.gmra.mxu0 %v7072_v10  ;;  %7308 = vmatmul.mubr.bf16.vlgmr.msra.gmra.mxu1 %v7072_v10 }
 0x723   : > { %v15104_v15 = vadd.f32 %v5582_v13, %v14993_v34  ;;  %v15107_v16 = vadd.f32 %v5623_v14, %v14996_v35  ;;  %7516 = vmatpush1.bf16.msra.mxu0 %v12349_v8  ;;  %7557 = vmatpush1.bf16.msra.mxu1 %v12352_v9  ;;  %v12369_v34 = vld [vmem:[%s15678_s9 + $0xc84] ss:$16 sps:$4 sm:$0xff]   ;;  %v12372_v35 = vld [vmem:[%s15678_s9 + $0xc8c] ss:$16 sps:$4 sm:$0xff]  }
 0x724   : > { %v5584_v20 = vpop.f32.mrf.mxu0  ;;  %v5625_v22 = vpop.f32.mrf.mxu1  ;;  %7517 = vmatprep.subr.bf16.mxu0 %v12357_v11  ;;  %7558 = vmatprep.subr.bf16.mxu1 %v12360_v12  ;;  %v12409_v11 = vld [vmem:[%s15678_s9 + $0xda0] ss:$16 sps:$4 sm:$0xff]   ;;  %v12412_v12 = vld [vmem:[%s15678_s9 + $0xda8] ss:$16 sps:$4 sm:$0xff]  }
 0x725   : > { %v15122_v25 = vadd.f32 %v5584_v20, %v15011_v42  ;;  %v15125_v27 = vadd.f32 %v5625_v22, %v15014_v43  ;;  %7547 = vmatprep.mubr.bf16.mxu0 %v12636_v60  ;;  %7588 = vmatprep.mubr.bf16.mxu1 %v12636_v60  ;;  %v12381_v42 = vld [vmem:[%s15678_s9 + $0xc44] ss:$16 sps:$4 sm:$0xff]   ;;  %v12384_v43 = vld [vmem:[%s15678_s9 + $0xc4c] ss:$16 sps:$4 sm:$0xff]  }
 0x726   : > { %v5586_v28 = vpop.f32.mrf.mxu0  ;;  %v5627_v29 = vpop.f32.mrf.mxu1  ;;  %v12423_v20 = vld [vmem:[%s15678_s9 + $0xd64] ss:$16 sps:$4 sm:$0xff]   ;;  %v12426_v22 = vld [vmem:[%s15678_s9 + $0xd6c] ss:$16 sps:$4 sm:$0xff]  }
 0x727   : > { %7518 = vmatpush1.bf16.msra.mxu0 %v12355_v17  ;;  %7559 = vmatpush1.bf16.msra.mxu1 %v12358_v19  ;;  %v12415_v17 = vld [vmem:[%s15678_s9 + $0xd80] ss:$16 sps:$4 sm:$0xff]   ;;  %v12418_v19 = vld [vmem:[%s15678_s9 + $0xd88] ss:$16 sps:$4 sm:$0xff]  }
 0x728   : > { %v5587_v32 = vpop.f32.mrf.mxu0  ;;  %v5628_v33 = vpop.f32.mrf.mxu1  ;;  %7519 = vmatprep.subr.bf16.mxu0 %v12363_v23  ;;  %7560 = vmatprep.subr.bf16.mxu1 %v12366_v24  ;;  %v12421_v23 = vld [vmem:[%s15678_s9 + $0xd60] ss:$16 sps:$4 sm:$0xff]   ;;  %v12424_v24 = vld [vmem:[%s15678_s9 + $0xd68] ss:$16 sps:$4 sm:$0xff]  }
 0x729   : > { %v12427_v28 = vld [vmem:[%s15678_s9 + $0xd40] ss:$16 sps:$4 sm:$0xff]   ;;  %v12430_v29 = vld [vmem:[%s15678_s9 + $0xd48] ss:$16 sps:$4 sm:$0xff]  }
 0x72a   : > { %v12433_v32 = vld [vmem:[%s15678_s9 + $0xd20] ss:$16 sps:$4 sm:$0xff]   ;;  %v12436_v33 = vld [vmem:[%s15678_s9 + $0xd28] ss:$16 sps:$4 sm:$0xff]  }
 0x72b   : > { %7520 = vmatpush1.bf16.msra.mxu0 %v12361_v30  ;;  %7561 = vmatpush1.bf16.msra.mxu1 %v12364_v31  ;;  %v12435_v30 = vld [vmem:[%s15678_s9 + $0xd24] ss:$16 sps:$4 sm:$0xff]   ;;  %v12438_v31 = vld [vmem:[%s15678_s9 + $0xd2c] ss:$16 sps:$4 sm:$0xff]  }
 0x72c   : > { %7521 = vmatprep.subr.bf16.mxu0 %v12369_v34  ;;  %7562 = vmatprep.subr.bf16.mxu1 %v12372_v35  ;;  %v12441_v34 = vld [vmem:[%s15678_s9 + $0xd04] ss:$16 sps:$4 sm:$0xff]   ;;  %v12444_v35 = vld [vmem:[%s15678_s9 + $0xd0c] ss:$16 sps:$4 sm:$0xff]  }
 0x72f   : > { %7522 = vmatpush1.bf16.msra.mxu0 %v12367_v36  ;;  %7563 = vmatpush1.bf16.msra.mxu1 %v12370_v37  ;;  %v12439_v36 = vld [vmem:[%s15678_s9 + $0xd00] ss:$16 sps:$4 sm:$0xff]   ;;  %v12442_v37 = vld [vmem:[%s15678_s9 + $0xd08] ss:$16 sps:$4 sm:$0xff]  }
 0x730   : > { %7523 = vmatprep.subr.bf16.mxu0 %v12375_v38  ;;  %7564 = vmatprep.subr.bf16.mxu1 %v12378_v39  ;;  %v12447_v38 = vld [vmem:[%s15678_s9 + $0xee4] ss:$16 sps:$4 sm:$0xff]   ;;  %v12450_v39 = vld [vmem:[%s15678_s9 + $0xeec] ss:$16 sps:$4 sm:$0xff]  }
 0x733   : > { %7524 = vmatpush1.bf16.msra.mxu0 %v12373_v40  ;;  %7565 = vmatpush1.bf16.msra.mxu1 %v12376_v41  ;;  %v12445_v40 = vld [vmem:[%s15678_s9 + $0xee0] ss:$16 sps:$4 sm:$0xff]   ;;  %v12448_v41 = vld [vmem:[%s15678_s9 + $0xee8] ss:$16 sps:$4 sm:$0xff]  }
 0x734   : > { %7525 = vmatprep.subr.bf16.mxu0 %v12381_v42  ;;  %7566 = vmatprep.subr.bf16.mxu1 %v12384_v43  ;;  %v7634_v42 = vrot.slane %v13947_v21, 6  ;;  %v12453_v43 = vld [vmem:[%s15678_s9 + $0xec4] ss:$16 sps:$4 sm:$0xff]  }
 0x737   : > { %7526 = vmatpush1.bf16.msra.mxu0 %v12379_v44  ;;  %7567 = vmatpush1.bf16.msra.mxu1 %v12382_v45  ;;  %v12456_v44 = vld [vmem:[%s15678_s9 + $0xecc] ss:$16 sps:$4 sm:$0xff]  }
 0x738   : > { %7527 = vmatprep.subr.bf16.mxu0 %v12387_v46  ;;  %7568 = vmatprep.subr.bf16.mxu1 %v12390_v47 }
 0x73b   : > { %7528 = vmatpush1.bf16.msra.mxu0 %v12385_v48  ;;  %7569 = vmatpush1.bf16.msra.mxu1 %v12388_v49  ;;  %v12451_v49 = vld [vmem:[%s15678_s9 + $0xec0] ss:$16 sps:$4 sm:$0xff]  }
 0x73c   : > { %7529 = vmatprep.subr.bf16.mxu0 %v12393_v50  ;;  %7570 = vmatprep.subr.bf16.mxu1 %v12396_v51  ;;  %v12454_v50 = vld [vmem:[%s15678_s9 + $0xec8] ss:$16 sps:$4 sm:$0xff]  }
 0x73f   : > { %7530 = vmatpush1.bf16.msra.mxu0 %v12391_v52  ;;  %7571 = vmatpush1.bf16.msra.mxu1 %v12394_v53  ;;  %v12459_v53 = vld [vmem:[%s15678_s9 + $0xea4] ss:$16 sps:$4 sm:$0xff]  }
 0x740   : > { %7796 = vmatprep.subr.bf16.mxu0 %v12399_v54  ;;  %7837 = vmatprep.subr.bf16.mxu1 %v12402_v55  ;;  %v12462_v54 = vld [vmem:[%s15678_s9 + $0xeac] ss:$16 sps:$4 sm:$0xff]  }
 0x742   : > { %v5863_v61 = vpop.f32.mrf.mxu0  ;;  %v5904_v62 = vpop.f32.mrf.mxu1  ;;  %7548 = vmatmul.mubr.bf16.vlgmr.msra.gmra.mxu0 %v7353_v57  ;;  %7589 = vmatmul.mubr.bf16.vlgmr.msra.gmra.mxu1 %v7353_v57 }
 0x743   : > { %v15215_v63 = vadd.f32 %v5863_v61, %v15104_v15  ;;  %v15218_v0 = vadd.f32 %v5904_v62, %v15107_v16  ;;  %7797 = vmatpush1.bf16.msra.mxu0 %v12397_v56  ;;  %7838 = vmatpush1.bf16.msra.mxu1 %v12400_v26  ;;  %v12417_v15 = vld [vmem:[%s15678_s9 + $0xd84] ss:$16 sps:$4 sm:$0xff]   ;;  %v12420_v16 = vld [vmem:[%s15678_s9 + $0xd8c] ss:$16 sps:$4 sm:$0xff]  }
 0x744   : > { %v5865_v3 = vpop.f32.mrf.mxu0  ;;  %v5906_v4 = vpop.f32.mrf.mxu1  ;;  %7798 = vmatprep.subr.bf16.mxu0 %v12405_v58  ;;  %7839 = vmatprep.subr.bf16.mxu1 %v12408_v59  ;;  %v12457_v58 = vld [vmem:[%s15678_s9 + $0xea0] ss:$16 sps:$4 sm:$0xff]   ;;  %v12460_v59 = vld [vmem:[%s15678_s9 + $0xea8] ss:$16 sps:$4 sm:$0xff]  }
 0x745   : > { %v15233_v7 = vadd.f32 %v5865_v3, %v15122_v25  ;;  %v15236_v8 = vadd.f32 %v5906_v4, %v15125_v27  ;;  %7828 = vmatprep.mubr.bf16.mxu0 %v12636_v60  ;;  %7869 = vmatprep.mubr.bf16.mxu1 %v12636_v60  ;;  %v12429_v25 = vld [vmem:[%s15678_s9 + $0xd44] ss:$16 sps:$4 sm:$0xff]   ;;  %v12432_v27 = vld [vmem:[%s15678_s9 + $0xd4c] ss:$16 sps:$4 sm:$0xff]  }
 0x746   : > { %v5867_v9 = vpop.f32.mrf.mxu0  ;;  %v5908_v10 = vpop.f32.mrf.mxu1  ;;  %v12471_v3 = vld [vmem:[%s15678_s9 + $0xe64] ss:$16 sps:$4 sm:$0xff]   ;;  %v12474_v4 = vld [vmem:[%s15678_s9 + $0xe6c] ss:$16 sps:$4 sm:$0xff]  }
 0x747   : > { %7799 = vmatpush1.bf16.msra.mxu0 %v12403_v1  ;;  %7840 = vmatpush1.bf16.msra.mxu1 %v12406_v2  ;;  %v12463_v1 = vld [vmem:[%s15678_s9 + $0xe80] ss:$16 sps:$4 sm:$0xff]   ;;  %v12466_v2 = vld [vmem:[%s15678_s9 + $0xe88] ss:$16 sps:$4 sm:$0xff]  }
 0x748   : > { %v5868_v13 = vpop.f32.mrf.mxu0  ;;  %v5909_v14 = vpop.f32.mrf.mxu1  ;;  %7800 = vmatprep.subr.bf16.mxu0 %v12411_v5  ;;  %7841 = vmatprep.subr.bf16.mxu1 %v12414_v6  ;;  %v12469_v5 = vld [vmem:[%s15678_s9 + $0xe60] ss:$16 sps:$4 sm:$0xff]   ;;  %v12472_v6 = vld [vmem:[%s15678_s9 + $0xe68] ss:$16 sps:$4 sm:$0xff]  }
 0x749   : > { %v12475_v9 = vld [vmem:[%s15678_s9 + $0xe40] ss:$16 sps:$4 sm:$0xff]   ;;  %v12478_v10 = vld [vmem:[%s15678_s9 + $0xe48] ss:$16 sps:$4 sm:$0xff]  }
 0x74a   : > { %v12481_v13 = vld [vmem:[%s15678_s9 + $0xe20] ss:$16 sps:$4 sm:$0xff]   ;;  %v12484_v14 = vld [vmem:[%s15678_s9 + $0xe28] ss:$16 sps:$4 sm:$0xff]  }
 0x74b   : > { %7801 = vmatpush1.bf16.msra.mxu0 %v12409_v11  ;;  %7842 = vmatpush1.bf16.msra.mxu1 %v12412_v12  ;;  %v12483_v11 = vld [vmem:[%s15678_s9 + $0xe24] ss:$16 sps:$4 sm:$0xff]   ;;  %v12486_v12 = vld [vmem:[%s15678_s9 + $0xe2c] ss:$16 sps:$4 sm:$0xff]  }
 0x74c   : > { %7802 = vmatprep.subr.bf16.mxu0 %v12417_v15  ;;  %7843 = vmatprep.subr.bf16.mxu1 %v12420_v16  ;;  %v12489_v15 = vld [vmem:[%s15678_s9 + $0xe04] ss:$16 sps:$4 sm:$0xff]   ;;  %v12492_v16 = vld [vmem:[%s15678_s9 + $0xe0c] ss:$16 sps:$4 sm:$0xff]  }
 0x74f   : > { %7803 = vmatpush1.bf16.msra.mxu0 %v12415_v17  ;;  %7844 = vmatpush1.bf16.msra.mxu1 %v12418_v19  ;;  %v12487_v17 = vld [vmem:[%s15678_s9 + $0xe00] ss:$16 sps:$4 sm:$0xff]   ;;  %v12490_v19 = vld [vmem:[%s15678_s9 + $0xe08] ss:$16 sps:$4 sm:$0xff]  }
 0x750   : > { %7804 = vmatprep.subr.bf16.mxu0 %v12423_v20  ;;  %7845 = vmatprep.subr.bf16.mxu1 %v12426_v22  ;;  %v12495_v20 = vld [vmem:[%s15678_s9 + $0xfe4] ss:$16 sps:$4 sm:$0xff]   ;;  %v12498_v22 = vld [vmem:[%s15678_s9 + $0xfec] ss:$16 sps:$4 sm:$0xff]  }
 0x753   : > { %7805 = vmatpush1.bf16.msra.mxu0 %v12421_v23  ;;  %7846 = vmatpush1.bf16.msra.mxu1 %v12424_v24  ;;  %v12493_v23 = vld [vmem:[%s15678_s9 + $0xfe0] ss:$16 sps:$4 sm:$0xff]   ;;  %v12496_v24 = vld [vmem:[%s15678_s9 + $0xfe8] ss:$16 sps:$4 sm:$0xff]  }
 0x754   : > { %7806 = vmatprep.subr.bf16.mxu0 %v12429_v25  ;;  %7847 = vmatprep.subr.bf16.mxu1 %v12432_v27  ;;  %v7915_v25 = vrot.slane %v13938_v18, 7  ;;  %v12501_v27 = vld [vmem:[%s15678_s9 + $0xfc4] ss:$16 sps:$4 sm:$0xff]   ;;  %v12499_v18 = vld [vmem:[%s15678_s9 + $0xfc0] ss:$16 sps:$4 sm:$0xff]  }
 0x757   : > { %7807 = vmatpush1.bf16.msra.mxu0 %v12427_v28  ;;  %7848 = vmatpush1.bf16.msra.mxu1 %v12430_v29  ;;  %v12504_v28 = vld [vmem:[%s15678_s9 + $0xfcc] ss:$16 sps:$4 sm:$0xff]  }
 0x758   : > { %7808 = vmatprep.subr.bf16.mxu0 %v12435_v30  ;;  %7849 = vmatprep.subr.bf16.mxu1 %v12438_v31 }
 0x75b   : > { %7809 = vmatpush1.bf16.msra.mxu0 %v12433_v32  ;;  %7850 = vmatpush1.bf16.msra.mxu1 %v12436_v33  ;;  %v12502_v33 = vld [vmem:[%s15678_s9 + $0xfc8] ss:$16 sps:$4 sm:$0xff]  }
 0x75c   : > { %7810 = vmatprep.subr.bf16.mxu0 %v12441_v34  ;;  %7851 = vmatprep.subr.bf16.mxu1 %v12444_v35 }
 0x75f   : > { %7811 = vmatpush1.bf16.msra.mxu0 %v12439_v36  ;;  %7852 = vmatpush1.bf16.msra.mxu1 %v12442_v37  ;;  %v12507_v36 = vld [vmem:[%s15678_s9 + $0xfa4] ss:$16 sps:$4 sm:$0xff]   ;;  %v12510_v37 = vld [vmem:[%s15678_s9 + $0xfac] ss:$16 sps:$4 sm:$0xff]  }
 0x760   : > { %8077 = vmatprep.subr.bf16.mxu0 %v12447_v38  ;;  %8118 = vmatprep.subr.bf16.mxu1 %v12450_v39 }
 0x762   : > { %v6144_v45 = vpop.f32.mrf.mxu0  ;;  %v6185_v46 = vpop.f32.mrf.mxu1  ;;  %7829 = vmatmul.mubr.bf16.vlgmr.msra.gmra.mxu0 %v7634_v42  ;;  %7870 = vmatmul.mubr.bf16.vlgmr.msra.gmra.mxu1 %v7634_v42  ;;  %v12505_v42 = vld [vmem:[%s15678_s9 + $0xfa0] ss:$16 sps:$4 sm:$0xff]  }
 0x763   : > { %v15326_v47 = vadd.f32 %v6144_v45, %v15215_v63  ;;  %v15329_v48 = vadd.f32 %v6185_v46, %v15218_v0  ;;  %8078 = vmatpush1.bf16.msra.mxu0 %v12445_v40  ;;  %8119 = vmatpush1.bf16.msra.mxu1 %v12448_v41  ;;  %v12465_v63 = vld [vmem:[%s15678_s9 + $0xe84] ss:$16 sps:$4 sm:$0xff]   ;;  %v12468_v0 = vld [vmem:[%s15678_s9 + $0xe8c] ss:$16 sps:$4 sm:$0xff]  }
 0x764   : > { %v6146_v51 = vpop.f32.mrf.mxu0  ;;  %v6187_v52 = vpop.f32.mrf.mxu1  ;;  %8079 = vmatprep.subr.bf16.mxu0 %v12453_v43  ;;  %8120 = vmatprep.subr.bf16.mxu1 %v12456_v44  ;;  %v12508_v43 = vld [vmem:[%s15678_s9 + $0xfa8] ss:$16 sps:$4 sm:$0xff]   ;;  %v12516_v46 = vld [vmem:[%s15678_s9 + $0xf8c] ss:$16 sps:$4 sm:$0xff]  }
 0x765   : > { %v15344_v55 = vadd.f32 %v6146_v51, %v15233_v7  ;;  %v15347_v56 = vadd.f32 %v6187_v52, %v15236_v8  ;;  %8109 = vmatprep.mubr.bf16.mxu0 %v12636_v60  ;;  %8150 = vmatprep.mubr.bf16.mxu1 %v12636_v60  ;;  %v12477_v7 = vld [vmem:[%s15678_s9 + $0xe44] ss:$16 sps:$4 sm:$0xff]   ;;  %v12480_v8 = vld [vmem:[%s15678_s9 + $0xe4c] ss:$16 sps:$4 sm:$0xff]   ;;  %v12517_v51 = vld [vmem:[%s15678_s9 + $0xf60] ss:$16 sps:$4 sm:$0xff]  }
 0x766   : > { %v6148_v26 = vpop.f32.mrf.mxu0  ;;  %v6189_v57 = vpop.f32.mrf.mxu1  ;;  %v12520_v52 = vld [vmem:[%s15678_s9 + $0xf68] ss:$16 sps:$4 sm:$0xff]  }
 0x767   : > { %8080 = vmatpush1.bf16.msra.mxu0 %v12451_v49  ;;  %8121 = vmatpush1.bf16.msra.mxu1 %v12454_v50  ;;  %v12519_v49 = vld [vmem:[%s15678_s9 + $0xf64] ss:$16 sps:$4 sm:$0xff]   ;;  %v12522_v50 = vld [vmem:[%s15678_s9 + $0xf6c] ss:$16 sps:$4 sm:$0xff]  }
 0x768   : > { %v6149_v61 = vpop.f32.mrf.mxu0  ;;  %v6190_v62 = vpop.f32.mrf.mxu1  ;;  %8081 = vmatprep.subr.bf16.mxu0 %v12459_v53  ;;  %8122 = vmatprep.subr.bf16.mxu1 %v12462_v54  ;;  %v12525_v53 = vld [vmem:[%s15678_s9 + $0xf44] ss:$16 sps:$4 sm:$0xff]   ;;  %v12528_v54 = vld [vmem:[%s15678_s9 + $0xf4c] ss:$16 sps:$4 sm:$0xff]  }
 0x769   : > { %v12531_v26 = vld [vmem:[%s15678_s9 + $0xf24] ss:$16 sps:$4 sm:$0xff]   ;;  %v12534_v57 = vld [vmem:[%s15678_s9 + $0xf2c] ss:$16 sps:$4 sm:$0xff]  }
 0x76a   : > { %v12537_v61 = vld [vmem:[%s15678_s9 + $0xf04] ss:$16 sps:$4 sm:$0xff]   ;;  %v12540_v62 = vld [vmem:[%s15678_s9 + $0xf0c] ss:$16 sps:$4 sm:$0xff]  }
 0x76b   : > { %8082 = vmatpush1.bf16.msra.mxu0 %v12457_v58  ;;  %8123 = vmatpush1.bf16.msra.mxu1 %v12460_v59  ;;  %v12529_v58 = vld [vmem:[%s15678_s9 + $0xf20] ss:$16 sps:$4 sm:$0xff]   ;;  %v12532_v59 = vld [vmem:[%s15678_s9 + $0xf28] ss:$16 sps:$4 sm:$0xff]  }
 0x76c   : > { %8083 = vmatprep.subr.bf16.mxu0 %v12465_v63  ;;  %8124 = vmatprep.subr.bf16.mxu1 %v12468_v0  ;;  %v12535_v63 = vld [vmem:[%s15678_s9 + $0xf00] ss:$16 sps:$4 sm:$0xff]   ;;  %v12538_v0 = vld [vmem:[%s15678_s9 + $0xf08] ss:$16 sps:$4 sm:$0xff]  }
 0x76f   : > { %8084 = vmatpush1.bf16.msra.mxu0 %v12463_v1  ;;  %8125 = vmatpush1.bf16.msra.mxu1 %v12466_v2  ;;  %v8196_v1 = vrot.slane %v13947_v21, 7 }
 0x770   : > { %8085 = vmatprep.subr.bf16.mxu0 %v12471_v3  ;;  %8126 = vmatprep.subr.bf16.mxu1 %v12474_v4 }
 0x773   : > { %8086 = vmatpush1.bf16.msra.mxu0 %v12469_v5  ;;  %8127 = vmatpush1.bf16.msra.mxu1 %v12472_v6 }
 0x774   : > { %8087 = vmatprep.subr.bf16.mxu0 %v12477_v7  ;;  %8128 = vmatprep.subr.bf16.mxu1 %v12480_v8 }
 0x777   : > { %8088 = vmatpush1.bf16.msra.mxu0 %v12475_v9  ;;  %8129 = vmatpush1.bf16.msra.mxu1 %v12478_v10 }
 0x778   : > { %8089 = vmatprep.subr.bf16.mxu0 %v12483_v11  ;;  %8130 = vmatprep.subr.bf16.mxu1 %v12486_v12 }
 0x77b   : > { %8090 = vmatpush1.bf16.msra.mxu0 %v12481_v13  ;;  %8131 = vmatpush1.bf16.msra.mxu1 %v12484_v14 }
 0x77c   : > { %8091 = vmatprep.subr.bf16.mxu0 %v12489_v15  ;;  %8132 = vmatprep.subr.bf16.mxu1 %v12492_v16 }
 0x77f   : > { %8092 = vmatpush1.bf16.msra.mxu0 %v12487_v17  ;;  %8133 = vmatpush1.bf16.msra.mxu1 %v12490_v19 }
 0x780   : > { %8358 = vmatprep.subr.bf16.mxu0 %v12495_v20  ;;  %8399 = vmatprep.subr.bf16.mxu1 %v12498_v22 }
 0x782   : > { %v6425_v29 = vpop.f32.mrf.mxu0  ;;  %v6466_v30 = vpop.f32.mrf.mxu1  ;;  %8110 = vmatmul.mubr.bf16.vlgmr.msra.gmra.mxu0 %v7915_v25  ;;  %8151 = vmatmul.mubr.bf16.vlgmr.msra.gmra.mxu1 %v7915_v25 }
 0x783   : > { %v15437_v31 = vadd.f32 %v6425_v29, %v15326_v47  ;;  %v15440_v32 = vadd.f32 %v6466_v30, %v15329_v48  ;;  %8359 = vmatpush1.bf16.msra.mxu0 %v12493_v23  ;;  %8400 = vmatpush1.bf16.msra.mxu1 %v12496_v24  ;;  %v12511_v47 = vld [vmem:[%s15678_s9 + $0xf80] ss:$16 sps:$4 sm:$0xff]   ;;  %v12514_v48 = vld [vmem:[%s15678_s9 + $0xf88] ss:$16 sps:$4 sm:$0xff]  }
 0x784   : > { %v6427_v34 = vpop.f32.mrf.mxu0  ;;  %v6468_v35 = vpop.f32.mrf.mxu1  ;;  %8360 = vmatprep.subr.bf16.mxu0 %v12501_v27  ;;  %8401 = vmatprep.subr.bf16.mxu1 %v12504_v28  ;;  %v12541_v28 = vld [vmem:[%s15680_s11 + $0x78] sm:$0xff]  }
 0x785   : > { %v15455_v38 = vadd.f32 %v6427_v34, %v15344_v55  ;;  %v15458_v39 = vadd.f32 %v6468_v35, %v15347_v56  ;;  %8390 = vmatprep.mubr.bf16.mxu0 %v12636_v60  ;;  %8431 = vmatprep.mubr.bf16.mxu1 %v12636_v60  ;;  %v12513_v60 = vld [vmem:[%s15678_s9 + $0xf84] ss:$16 sps:$4 sm:$0xff]   ;;  %v12523_v55 = vld [vmem:[%s15678_s9 + $0xf40] ss:$16 sps:$4 sm:$0xff]   ;;  %v12526_v56 = vld [vmem:[%s15678_s9 + $0xf48] ss:$16 sps:$4 sm:$0xff]  }
 0x786   : > { %v6429_v40 = vpop.f32.mrf.mxu0  ;;  %v6470_v41 = vpop.f32.mrf.mxu1  ;;  %v12542_v29 = vld [vmem:[%s15680_s11 + $0xf8] sm:$0xff]   ;;  %v12548_v34 = vld [vmem:[%s15680_s11 + $0xb0] sm:$0xff]   ;;  %v12549_v35 = vld [vmem:[%s15680_s11 + $0x68] sm:$0xff]  }
 0x787   : > { %8361 = vmatpush1.bf16.msra.mxu0 %v12499_v18  ;;  %8402 = vmatpush1.bf16.msra.mxu1 %v12502_v33  ;;  %v12543_v30 = vld [vmem:[%s15680_s11 + $0x38] sm:$0xff]   ;;  %v12546_v18 = vld [vmem:[%s15680_s11 + $0xf0] sm:$0xff]   ;;  %v12554_v40 = vld [vmem:[%s15680_s11 + $0xe0] sm:$0xff]  }
 0x788   : > { %v6430_v44 = vpop.f32.mrf.mxu0  ;;  %v6471_v45 = vpop.f32.mrf.mxu1  ;;  %8362 = vmatprep.subr.bf16.mxu0 %v12507_v36  ;;  %8403 = vmatprep.subr.bf16.mxu1 %v12510_v37  ;;  %v12547_v33 = vld [vmem:[%s15680_s11 + $0x30] sm:$0xff]   ;;  %v12550_v36 = vld [vmem:[%s15680_s11 + $0xe8] sm:$0xff]   ;;  %v12555_v41 = vld [vmem:[%s15680_s11 + $0x20] sm:$0xff]  }
 0x789   : > { %v12551_v37 = vld [vmem:[%s15680_s11 + $0x28] sm:$0xff]   ;;  %v12558_v44 = vld [vmem:[%s15680_s11 + $0xd8] sm:$0xff]  }
 0x78a   : > { %v12559_v45 = vld [vmem:[%s15680_s11 + $0x18] sm:$0xff]  }
 0x78b   : > { %8363 = vmatpush1.bf16.msra.mxu0 %v12505_v42  ;;  %8404 = vmatpush1.bf16.msra.mxu1 %v12508_v43  ;;  %v12556_v42 = vld [vmem:[%s15680_s11 + $0xa0] sm:$0xff]   ;;  %v12557_v43 = vld [vmem:[%s15680_s11 + $0x58] sm:$0xff]  }
 0x78c   : > { %8364 = vmatprep.subr.bf16.mxu0 %v12513_v60  ;;  %8405 = vmatprep.subr.bf16.mxu1 %v12516_v46  ;;  %v12560_v60 = vld [vmem:[%s15680_s11 + $0x98] sm:$0xff]  }
 0x78f   : > { %8365 = vmatpush1.bf16.msra.mxu0 %v12511_v47  ;;  %8406 = vmatpush1.bf16.msra.mxu1 %v12514_v48 }
 0x790   : > { %8366 = vmatprep.subr.bf16.mxu0 %v12519_v49  ;;  %8407 = vmatprep.subr.bf16.mxu1 %v12522_v50 }
 0x793   : > { %8367 = vmatpush1.bf16.msra.mxu0 %v12517_v51  ;;  %8408 = vmatpush1.bf16.msra.mxu1 %v12520_v52  ;;  %v12561_v52 = vld [vmem:[%s15680_s11 + $0x50] sm:$0xff]  }
 0x794   : > { %8368 = vmatprep.subr.bf16.mxu0 %v12525_v53  ;;  %8409 = vmatprep.subr.bf16.mxu1 %v12528_v54  ;;  %v12562_v53 = vld [vmem:[%s15680_s11 + $0xd0] sm:$0xff]  }
 0x797   : > { %8369 = vmatpush1.bf16.msra.mxu0 %v12523_v55  ;;  %8410 = vmatpush1.bf16.msra.mxu1 %v12526_v56  ;;  %v12563_v56 = vld [vmem:[%s15680_s11 + $0x10] sm:$0xff]  }
 0x798   : > { %8370 = vmatprep.subr.bf16.mxu0 %v12531_v26  ;;  %8411 = vmatprep.subr.bf16.mxu1 %v12534_v57  ;;  %v12564_v26 = vld [vmem:[%s15680_s11 + $0x90] sm:$0xff]  }
 0x79b   : > { %8371 = vmatpush1.bf16.msra.mxu0 %v12529_v58  ;;  %8412 = vmatpush1.bf16.msra.mxu1 %v12532_v59 }
 0x79c   : > { %8372 = vmatprep.subr.bf16.mxu0 %v12537_v61  ;;  %8413 = vmatprep.subr.bf16.mxu1 %v12540_v62  ;;  %v12565_v62 = vld [vmem:[%s15680_s11 + $0x48] sm:$0xff]  }
 0x79f   : > { %8373 = vmatpush1.bf16.msra.mxu0 %v12535_v63  ;;  %8414 = vmatpush1.bf16.msra.mxu1 %v12538_v0  ;;  %v12566_v63 = vld [vmem:[%s15680_s11 + $0xc8] sm:$0xff]  }
 0x7a0   : > { %10856 = vmatprep.subr.bf16.mxu0 %v12541_v28  ;;  %10878 = vmatprep.subr.bf16.mxu1 %v12542_v29  ;;  %v12567_v0 = vld [vmem:[%s15680_s11 + $0x8] sm:$0xff]  }
 0x7a2   : > { %v6706_v2 = vpop.f32.mrf.mxu0  ;;  %v6747_v3 = vpop.f32.mrf.mxu1  ;;  %8391 = vmatmul.mubr.bf16.vlgmr.msra.gmra.mxu0 %v8196_v1  ;;  %8432 = vmatmul.mubr.bf16.vlgmr.msra.gmra.mxu1 %v8196_v1  ;;  %v12568_v1 = vld [vmem:[%s15680_s11 + $0x88] sm:$0xff]  }
 0x7a3   : > { %v6754_v4 = vadd.f32 %v6706_v2, %v15437_v31  ;;  %v6756_v5 = vadd.f32 %v6747_v3, %v15440_v32  ;;  %v12544_v31 = vld [vmem:[%s15680_s11 + $0xb8] sm:$0xff]   ;;  %v12545_v32 = vld [vmem:[%s15680_s11 + $0x70] sm:$0xff]   ;;  %10857 = vmatpush3.bf16.msra.mxu0 %v12543_v30  ;;  %v12569_v2 = vld [vmem:[%s15680_s11 + $0x40] sm:$0xff]  }
 0x7a4   : > { %v6708_v6 = vpop.f32.mrf.mxu0  ;;  %v6749_v7 = vpop.f32.mrf.mxu1  ;;  %10879 = vmatpush3.bf16.msra.mxu1 %v12544_v31  ;;  %10858 = vmatprep.subr.bf16.mxu0 %v12545_v32  ;;  %v12570_v3 = vld [vmem:[%s15680_s11 + $0xc0] sm:$0xff]  }
 0x7a5   : > { %v6755_v8 = vadd.f32 %v6708_v6, %v15455_v38  ;;  %v6757_v9 = vadd.f32 %v6749_v7, %v15458_v39  ;;  %10880 = vmatprep.subr.bf16.mxu1 %v12546_v18  ;;  %v12552_v38 = vld [vmem:[%s15680_s11 + $0xa8] sm:$0xff]   ;;  %v12553_v39 = vld [vmem:[%s15680_s11 + $0x60] sm:$0xff]  }
 0x7a6   : > { %v6710_v10 = vpop.f32.mrf.mxu0  ;;  %v6751_v11 = vpop.f32.mrf.mxu1 }
 0x7a7   : > { %10859 = vmatpush3.bf16.msra.mxu0 %v12547_v33 }
 0x7a8   : > { %v6711_v12 = vpop.f32.mrf.mxu0  ;;  %v6752_v13 = vpop.f32.mrf.mxu1  ;;  %10881 = vmatpush3.bf16.msra.mxu1 %v12548_v34  ;;  %10860 = vmatprep.subr.bf16.mxu0 %v12549_v35  ;;  %v8446_v35 = vlaneseq }
 0x7a9   : > { %10882 = vmatprep.subr.bf16.mxu1 %v12550_v36 }
 0x7aa   : > { %v8447_v36 = vshrl.u32 %v8446_v35, 7 }
 0x7ab   : > { %10861 = vmatpush3.bf16.msra.mxu0 %v12551_v37 }
 0x7ac   : > { %10883 = vmatpush3.bf16.msra.mxu1 %v12552_v38  ;;  %10862 = vmatprep.subr.bf16.mxu0 %v12553_v39  ;;  %v8448_v37 = vsub.s32 0, %v8447_v36  ;;  %v8456_v38 = vsub.s32 2, %v8447_v36  ;;  %v8444_v39 = vld [vmem:[%s15679_s10] sm:$0xf] }
 0x7ad   : > { %10884 = vmatprep.subr.bf16.mxu1 %v12554_v40  ;;  %v8452_v40 = vsub.s32 1, %v8447_v36 }
 0x7af   : > { %10863 = vmatpush3.bf16.msra.mxu0 %v12555_v41  ;;  %v8460_v41 = vsub.s32 3, %v8447_v36 }
 0x7b0   : > { %10885 = vmatpush3.bf16.msra.mxu1 %v12556_v42  ;;  %10864 = vmatprep.subr.bf16.mxu0 %v12557_v43 }
 0x7b1   : > { %10886 = vmatprep.subr.bf16.mxu1 %v12558_v44  ;;  %v8449_v44 = vrot.slane %v8444_v39, %v8448_v37 }
 0x7b3   : > { %10865 = vmatpush3.bf16.msra.mxu0 %v12559_v45  ;;  %v8457_v45 = vrot.slane %v8444_v39, %v8456_v38 }
 0x7b4   : > { %10887 = vmatpush3.bf16.msra.mxu1 %v12560_v60  ;;  %10866 = vmatprep.subr.bf16.mxu0 %v12561_v52  ;;  %v8461_v52 = vrot.slane %v8444_v39, %v8460_v41 }
 0x7b5   : > { %10888 = vmatprep.subr.bf16.mxu1 %v12562_v53 }
 0x7b7   : > { %10867 = vmatpush3.bf16.msra.mxu0 %v12563_v56 }
 0x7b8   : > { %10889 = vmatpush3.bf16.msra.mxu1 %v12564_v26  ;;  %10868 = vmatprep.subr.bf16.mxu0 %v12565_v62 }
 0x7b9   : > { %10890 = vmatprep.subr.bf16.mxu1 %v12566_v63 }
 0x7bb   : > { %10869 = vmatpush3.bf16.msra.mxu0 %v12567_v0 }
 0x7bc   : > { %10891 = vmatpush3.bf16.msra.mxu1 %v12568_v1  ;;  %10870 = vmatprep.subr.bf16.mxu0 %v12569_v2 }
 0x7bd   : > { %10892 = vmatprep.subr.bf16.mxu1 %v12570_v3 }
 0x7c2   : > { %v6987_v14 = vpop.f32.mrf.mxu0  ;;  %v7028_v21 = vpop.f32.mrf.mxu1 }
 0x7c3   : > { %v7035_v15 = vadd.f32 %v6987_v14, %v6754_v4  ;;  %v7037_v16 = vadd.f32 %v7028_v21, %v6756_v5  ;;  %v12571_v4 = vld [vmem:[%s15680_s11] sm:$0xff]  }
 0x7c4   : > { %v6989_v17 = vpop.f32.mrf.mxu0  ;;  %v7030_v19 = vpop.f32.mrf.mxu1  ;;  %v12572_v5 = vld [vmem:[%s15680_s11 + $0x80] sm:$0xff]   ;;  %10871 = vmatpush3.bf16.msra.mxu0 %v12571_v4 }
 0x7c5   : > { %v7036_v20 = vadd.f32 %v6989_v17, %v6755_v8  ;;  %v7038_v22 = vadd.f32 %v7030_v19, %v6757_v9  ;;  %10893 = vmatpush3.bf16.msra.mxu1 %v12572_v5 }
 0x7c6   : > { %v6991_v23 = vpop.f32.mrf.mxu0  ;;  %v7032_v24 = vpop.f32.mrf.mxu1 }
 0x7c8   : > { %v6992_v25 = vpop.f32.mrf.mxu0  ;;  %v7033_v27 = vpop.f32.mrf.mxu1 }
 0x7e2   : > { %v7268_v46 = vpop.f32.mrf.mxu0  ;;  %v7309_v47 = vpop.f32.mrf.mxu1 }
 0x7e3   : > { %v7316_v48 = vadd.f32 %v7268_v46, %v7035_v15  ;;  %v7318_v49 = vadd.f32 %v7309_v47, %v7037_v16 }
 0x7e4   : > { %v7270_v50 = vpop.f32.mrf.mxu0  ;;  %v7311_v51 = vpop.f32.mrf.mxu1 }
 0x7e5   : > { %v7317_v54 = vadd.f32 %v7270_v50, %v7036_v20  ;;  %v7319_v55 = vadd.f32 %v7311_v51, %v7038_v22  ;;  %v8453_v51 = vrot.slane %v8444_v39, %v8452_v40 }
 0x7e6   : > { %v7272_v57 = vpop.f32.mrf.mxu0  ;;  %v7313_v58 = vpop.f32.mrf.mxu1 }
 0x7e8   : > { %v7273_v59 = vpop.f32.mrf.mxu0  ;;  %v7314_v61 = vpop.f32.mrf.mxu1 }
 0x802   : > { %v7549_v6 = vpop.f32.mrf.mxu0  ;;  %v7590_v7 = vpop.f32.mrf.mxu1 }
 0x803   : > { %v7597_v8 = vadd.f32 %v7549_v6, %v7316_v48  ;;  %v7599_v9 = vadd.f32 %v7590_v7, %v7318_v49 }
 0x804   : > { %v7551_v10 = vpop.f32.mrf.mxu0  ;;  %v7592_v11 = vpop.f32.mrf.mxu1 }
 0x805   : > { %v7598_v12 = vadd.f32 %v7551_v10, %v7317_v54  ;;  %v7600_v13 = vadd.f32 %v7592_v11, %v7319_v55 }
 0x806   : > { %v7553_v14 = vpop.f32.mrf.mxu0  ;;  %v7594_v21 = vpop.f32.mrf.mxu1 }
 0x807   : > { %v8542_v21 = vld [vmem:[%s15681_s12] sm:$0x1] }
 0x808   : > { %v7554_v15 = vpop.f32.mrf.mxu0  ;;  %v7595_v16 = vpop.f32.mrf.mxu1 }
 0x822   : > { %v7830_v17 = vpop.f32.mrf.mxu0  ;;  %v7871_v19 = vpop.f32.mrf.mxu1 }
 0x823   : > { %v7878_v42 = vadd.f32 %v7830_v17, %v7597_v8  ;;  %v7880_v43 = vadd.f32 %v7871_v19, %v7599_v9 }
 0x824   : > { %v7832_v20 = vpop.f32.mrf.mxu0  ;;  %v7873_v22 = vpop.f32.mrf.mxu1 }
 0x825   : > { %v7879_v60 = vadd.f32 %v7832_v20, %v7598_v12  ;;  %v7881_v46 = vadd.f32 %v7873_v22, %v7600_v13 }
 0x826   : > { %v7834_v23 = vpop.f32.mrf.mxu0  ;;  %v7875_v24 = vpop.f32.mrf.mxu1 }
 0x828   : > { %v7835_v25 = vpop.f32.mrf.mxu0  ;;  %v7876_v27 = vpop.f32.mrf.mxu1 }
 0x842   : > { %v8111_v28 = vpop.f32.mrf.mxu0  ;;  %v8152_v29 = vpop.f32.mrf.mxu1 }
 0x843   : > { %v8159_v47 = vadd.f32 %v8111_v28, %v7878_v42  ;;  %v8161_v48 = vadd.f32 %v8152_v29, %v7880_v43 }
 0x844   : > { %v8113_v30 = vpop.f32.mrf.mxu0  ;;  %v8154_v31 = vpop.f32.mrf.mxu1 }
 0x845   : > { %v8160_v53 = vadd.f32 %v8113_v30, %v7879_v60  ;;  %v8162_v54 = vadd.f32 %v8154_v31, %v7881_v46 }
 0x846   : > { %v8115_v32 = vpop.f32.mrf.mxu0  ;;  %v8156_v18 = vpop.f32.mrf.mxu1 }
 0x848   : > { %v8116_v33 = vpop.f32.mrf.mxu0  ;;  %v8157_v34 = vpop.f32.mrf.mxu1 }
 0x862   : > { %v8392_v49 = vpop.f32.mrf.mxu0  ;;  %v8433_v50 = vpop.f32.mrf.mxu1 }
 0x863   : > { %v8440_v55 = vadd.f32 %v8392_v49, %v8159_v47  ;;  %v8442_v56 = vadd.f32 %v8433_v50, %v8161_v48 }
 0x864   : > { %v8394_v26 = vpop.f32.mrf.mxu0  ;;  %v8435_v57 = vpop.f32.mrf.mxu1 }
 0x865   : > { %v8466_v58 = vadd.f32 %v8449_v44, %v8440_v55  ;;  %v8468_v59 = vadd.f32 %v8457_v45, %v8442_v56  ;;  %v8441_v61 = vadd.f32 %v8394_v26, %v8160_v53  ;;  %v8443_v62 = vadd.f32 %v8435_v57, %v8162_v54 }
 0x866   : > { %v8396_v63 = vpop.f32.mrf.mxu0  ;;  %v8437_v0 = vpop.f32.mrf.mxu1 }
 0x867   : > { %v8467_v1 = vadd.f32 %v8453_v51, %v8441_v61  ;;  %v8469_v2 = vadd.f32 %v8461_v52, %v8443_v62  ;;  %v8470_v3 = vmax.f32 %v8466_v58, 0.0  ;;  %v8472_v4 = vmax.f32 %v8468_v59, 0.0 }
 0x868   : > { %v8397_v5 = vpop.f32.mrf.mxu0  ;;  %v8438_v6 = vpop.f32.mrf.mxu1 }
 0x869   : > { %v8471_v7 = vmax.f32 %v8467_v1, 0.0  ;;  %v8473_v8 = vmax.f32 %v8469_v2, 0.0  ;;  %v8474_v11 = vpack.c.bf16 %v8470_v3, %v8470_v3  ;;  %v8476_v12 = vpack.c.bf16 %v8472_v4, %v8472_v4 }
 0x86b   : > { %v8475_v9 = vpack.c.bf16 %v8471_v7, %v8471_v7  ;;  %v8477_v10 = vpack.c.bf16 %v8473_v8, %v8473_v8 }
 0x86d   : > { %8767 = vmatprep.mubr.bf16.mxu0 %v8475_v9  ;;  %8807 = vmatprep.mubr.bf16.mxu1 %v8477_v10 }
 0x86e   : > { %8768 = vmatmul.mubr.bf16.vlgmr.msra.gmra.mxu0 %v8474_v11  ;;  %8808 = vmatmul.mubr.bf16.vlgmr.msra.gmra.mxu1 %v8476_v12 }
 0x92e   : > { %v10872_v13 = vpop.f32.mrf.mxu0  ;;  %v10894_v14 = vpop.f32.mrf.mxu1 }
 0x930   : > { %v10873_v15 = vpop.f32.mrf.mxu0  ;;  %v10895_v16 = vpop.f32.mrf.mxu1 }
 0x931   : > { %v10874_v17 = vadd.f32 %v10873_v15, %v10872_v13  ;;  %v10896_v23 = vadd.f32 %v10895_v16, %v10894_v14 }
 0x932   : > { %v10875_v19 = vpop.f32.mrf.mxu0  ;;  %v10897_v20 = vpop.f32.mrf.mxu1 }
 0x933   : > { %v8770_v22 = vadd.f32 %v10874_v17, %v8542_v21 }
 0x934   : > { %v10876_v24 = vpop.f32.mrf.mxu0  ;;  %v10898_v25 = vpop.f32.mrf.mxu1 }
 0x935   : > { %v8810_v27 = vadd.f32 %v10896_v23, %v8770_v22 }
 0x937   : > { %8815 = vst [vmem:[%s432_s15] sm:$0x1] %v8810_v27 }
 0x938   : > { %12586 = shalt.err (!%p12583_p3)
}
 0x939   : > { %s12587_s17 = scalar_lea.hbm %s8827_s19, 16  ;;  %s12591_s30 = scalar_lea.hbm %s15682_s13, 32 }
 0x93a   : > { %p12588_p4 = scmp.ne.s32.totalorder %s8827_s19, %s12587_s17  ;;  %p12592_p9 = scmp.lt.s32.totalorder %s8827_s19, %s15682_s13 }
 0x93b   : > { %p12593_p10 = scmp.lt.s32.totalorder %s12591_s30, %s12587_s17 }
 0x93c   : > { %p12589_p7 = pnand %p12588_p4, %p12747_p5 }
 0x93d   : > { %p12594_p11 = por %p12593_p10, %p12592_p9 }
 0x93e   : > { %p12590_p8 = pneg %p12589_p7 }
 0x940   : > { %p12595_p12 = pnand %p12594_p11, %p12590_p8 }
 0x942   : > { %12598 = shalt.err (!%p12595_p12)
}
 0x943   : > { %11479 = dma.vmem_to_hbm [thread:$0]  (%p12747_p5), %s8830_s22, 16, %s8827_s19, %s8817_s25  }
 0x944 PF: > { %s15695_s27 = sld [smem:[#allocation5_spill]]  ;;  %p11485_p13 = scmp.ge.s32.totalorder %s12633_s28, 2 }
 0x946   : > { %p11482_p0 = pnand %p11485_p13, %p12751_p6 }
 0x948   : > { %p11483_p1 = pneg %p11482_p0 }
 0x94a   : > { %s8841_s29 = sand.u32 1, %s15695_s27  }
 0x94b   : > { %s8842_s20 = scalar_lea.sflag [#allocation3], %s8841_s29 }
 0x94c   : > { %12616 = dma.done.wait (%p11483_p1), %s8842_s20, 16  }
 0x94d   : > { %12618 = vsyncadd (%p11483_p1), %s8842_s20, 4294967280  ;;  %s15697_s28 = sld [smem:[#allocation7_spill]]  ;;  %s15700_s25 = smov %s12625_s26 }
 0x94e   : > { %s15698_s21 = sld [smem:[#allocation6_spill]] }
 0x94f   : > { %s15699_s27 = sld [smem:[#allocation8_spill]] }
 0x953   : > { %p23_p2 = scmp.ge.s32.totalorder %s15697_s28, 4  }
 0x954   : > { %s15701_s26 = smov %s15698_s21 }
 0x955   :  { %25 = sbr.rel (!%p23_p2) target bundleno = 3 (0x3), region = 145 }
 0x95a   :  { %8846 = vsyncpa [#allocation3], 1 }
 0x95b   :  { %8848 = vsyncpa [#allocation3 + $0x1], 1 }

</bundles_post_ra>
